<compile_context>
chip_gen: v6e
topology: v6e:2x2x1
jax: 0.10.0
libtpu: 0.0.40
codegen_flags: <defaults>
</compile_context>

<pallas_src>
import jax
import jax.numpy as jnp
from jax.experimental import pallas as pl
from jax.experimental.pallas import tpu as pltpu


# ----------------------------------------------------------------------------
# Fused Pallas kernel: per pixel-tile ->
#   1) MXU: f1 = x_fake @ wA + bA, f2 = x_ins @ wB + bB
#   2) VPU: logits[i, j, p] = <f1[i, p, :], f2[j, p, :]>  (loop over small j)
#   3) EUP/VPU: softmax cross-entropy partial sum accumulated in SMEM scratch
# ----------------------------------------------------------------------------
def _matcher_head_kernel(xf_ref, xi_ref, wa_ref, ba_ref, wb_ref, bb_ref,
                         matches_ref, loss_sum_ref, acc_ref):
    # xf/xi: (N, TP, Cin)  wa/wb: (Cin, Cout)  ba/bb: (1, Cout)
    # matches: (N, N, TP)  loss_sum: (1, 1) SMEM out  acc: (1,) SMEM scratch
    @pl.when(pl.program_id(0) == 0)
    def _init():
        acc_ref[0] = jnp.float32(0.0)

    N, TP, Cin = xf_ref.shape
    Cout = wa_ref.shape[1]

    # 1x1 conv projections as one MXU matmul per input, f32 accumulation.
    f1 = (jnp.dot(xf_ref[...].reshape(N * TP, Cin), wa_ref[...],
                  preferred_element_type=jnp.float32)
          + ba_ref[...]).reshape(N, TP, Cout)
    f2 = (jnp.dot(xi_ref[...].reshape(N * TP, Cin), wb_ref[...],
                  preferred_element_type=jnp.float32)
          + bb_ref[...]).reshape(N, TP, Cout)

    # logits[i, j, p] = sum_c f1[i, p, c] * f2[j, p, c]
    # Static loop over j keeps the largest intermediate at (N, TP, Cout).
    cols = []
    for j in range(N):
        cols.append(jnp.sum(f1 * f2[j][None, :, :], axis=-1))   # (N, TP)
    matches_ref[...] = jnp.stack(cols, axis=1)                  # (N, N, TP), lane-dense

    # Softmax cross-entropy over the class (j) axis, target class j == i,
    # done elementwise on (N, TP) slabs (no (N,N,P) iota masks).
    mx = cols[0]
    for j in range(1, N):
        mx = jnp.maximum(mx, cols[j])
    se = jnp.exp(cols[0] - mx)
    for j in range(1, N):
        se = se + jnp.exp(cols[j] - mx)
    lse = mx + jnp.log(se)                                      # (N, TP)
    diag = jnp.concatenate([cols[j][j:j + 1, :] for j in range(N)], axis=0)  # (N, TP)

    acc_ref[0] += jnp.sum(lse - diag)
    loss_sum_ref[0, 0] = acc_ref[0]   # resident SMEM output; last write wins


def _pick_tp(P):
    for t in (512, 256, 128):
        if P % t == 0:
            return t
    return P


def matcher_head(x_fake, x_ins, wA, bA, wB, bB, *, tp=None):
    """x_fake/x_ins: (N, P, Cin) pixel-major features -> ((N, N, P) matches, loss)."""
    N, P, Cin = x_fake.shape
    Cout = wA.shape[1]
    if tp is None:
        tp = _pick_tp(P)
    assert P % tp == 0, "pixel count must tile evenly"

    matches, loss_sum = pl.pallas_call(
        _matcher_head_kernel,
        out_shape=(
            jax.ShapeDtypeStruct((N, N, P), jnp.float32),
            jax.ShapeDtypeStruct((1, 1), jnp.float32),
        ),
        grid_spec=pltpu.PrefetchScalarGridSpec(
            num_scalar_prefetch=0,
            grid=(P // tp,),
            in_specs=[
                pl.BlockSpec((N, tp, Cin), lambda i: (0, i, 0)),
                pl.BlockSpec((N, tp, Cin), lambda i: (0, i, 0)),
                pl.BlockSpec((Cin, Cout), lambda i: (0, 0)),
                pl.BlockSpec((1, Cout), lambda i: (0, 0)),
                pl.BlockSpec((Cin, Cout), lambda i: (0, 0)),
                pl.BlockSpec((1, Cout), lambda i: (0, 0)),
            ],
            out_specs=(
                pl.BlockSpec((N, N, tp), lambda i: (0, 0, i)),
                pl.BlockSpec(memory_space=pltpu.MemorySpace.SMEM),
            ),
            scratch_shapes=[pltpu.SMEM((1,), jnp.float32)],
        ),
        compiler_params=pltpu.CompilerParams(
            # Pixel axis carries the loss accumulation -> "arbitrary".
            dimension_semantics=("arbitrary",),
        ),
    )(x_fake, x_ins, wA, bA, wB, bB)

    loss = loss_sum[0, 0] / jnp.float32(N * P)
    return matches, loss


# ----------------------------------------------------------------------------
# Backbone stub (plain JAX glue).
# TODO(synk): exact torchelie res_discr_3l (residual blocks + to_equal_lr) is not
#             reproduced; stubbed with a deterministic 3-layer strided-conv
#             extractor that yields the 128-channel /8 feature map Matcher uses.
# ----------------------------------------------------------------------------
def _kaiming(key, shape, fan_in):
    return jax.random.normal(key, shape, jnp.float32) * (jnp.sqrt(2.0) / jnp.sqrt(fan_in))


def init_params(key):
    keys = jax.random.split(key, 8)
    bb = []
    chans = [(3, 32), (32, 64), (64, 128)]
    for i, (cin, cout) in enumerate(chans):
        w = _kaiming(keys[i], (cout, cin, 3, 3), cin * 9)
        b = jnp.zeros((cout,), jnp.float32)
        bb.append((w, b))
    # Conv1x1(128, 256) projections stored as (Cin, Cout)
    wA = _kaiming(keys[5], (128, 256), 128)
    bA = jnp.zeros((1, 256), jnp.float32)
    wB = _kaiming(keys[6], (128, 256), 128)
    bB = jnp.zeros((1, 256), jnp.float32)
    return {"bb": bb, "wA": wA, "bA": bA, "wB": wB, "bB": bB}


def backbone_apply(bb_params, x_nchw):
    x = x_nchw
    for w, b in bb_params:
        x = jax.lax.conv_general_dilated(
            x, w, window_strides=(2, 2), padding="SAME",
            dimension_numbers=("NCHW", "OIHW", "NCHW"),
        )
        x = x + b[None, :, None, None]
        x = jnp.where(x > 0, x, 0.2 * x)  # LeakyReLU(0.2)
    return x  # (N, 128, H/8, W/8)


# ----------------------------------------------------------------------------
# Matcher.forward
# ----------------------------------------------------------------------------
def matcher_forward(params, fake, ins, *, tp=None):
    feat_fake = backbone_apply(params["bb"], fake)  # (N, 128, h, w)
    feat_ins = backbone_apply(params["bb"], ins)    # shared backbone (self.net)
    N, C, h, w = feat_fake.shape

    # NCHW -> (N, h*w, C): pixel-major rows, channels on lanes
    x_fake = jnp.transpose(feat_fake, (0, 2, 3, 1)).reshape(N, h * w, C)
    x_ins = jnp.transpose(feat_ins, (0, 2, 3, 1)).reshape(N, h * w, C)

    matches_p, loss = matcher_head(
        x_fake, x_ins, params["wA"], params["bA"], params["wB"], params["bB"], tp=tp
    )
    matches = matches_p.reshape(N, N, h, w)
    labels = jnp.broadcast_to(
        jnp.arange(N, dtype=jnp.int32)[:, None, None], (N, h, w)
    )
    return {"matches": matches, "loss": loss, "labels": labels}


# ----------------------------------------------------------------------------
# Pure-JAX reference of the Pallas-covered portion (proj + bmm + CE).
# ----------------------------------------------------------------------------
def _ref_head(x_fake, x_ins, wA, bA, wB, bB):
    N, P, C = x_fake.shape
    f1 = (x_fake.reshape(N * P, C) @ wA + bA).reshape(N, P, -1)
    f2 = (x_ins.reshape(N * P, C) @ wB + bB).reshape(N, P, -1)
    logits = jnp.einsum("ipc,jpc->ijp", f1, f2)
    lse = jax.scipy.special.logsumexp(logits, axis=1)
    diag = jnp.einsum("iip->ip", logits)
    loss = jnp.mean(lse - diag)
    return logits, loss


if __name__ == "__main__":
    key = jax.random.PRNGKey(0)
    kp, kf, ki = jax.random.split(key, 3)
    params = init_params(kp)

    # Deterministic inputs (NCHW). 128x128 -> 16x16 feature map -> P = 256,
    # so tp=128 exercises a multi-step grid + loss accumulation.
    fake = jax.random.normal(kf, (2, 3, 128, 128), jnp.float32)
    ins = jax.random.normal(ki, (2, 3, 128, 128), jnp.float32)

    out = jax.block_until_ready(matcher_forward(params, fake, ins, tp=128))

    # silent correctness check of the Pallas-computed head against pure JAX
    feat_fake = backbone_apply(params["bb"], fake)
    feat_ins = backbone_apply(params["bb"], ins)
    N, C, h, w = feat_fake.shape
    x_fake = jnp.transpose(feat_fake, (0, 2, 3, 1)).reshape(N, h * w, C)
    x_ins = jnp.transpose(feat_ins, (0, 2, 3, 1)).reshape(N, h * w, C)
    ref_logits, ref_loss = _ref_head(
        x_fake, x_ins, params["wA"], params["bA"], params["wB"], params["bB"]
    )
    ref_matches = ref_logits.reshape(N, N, h, w)

    assert out["matches"].shape == (N, N, h, w)
    assert out["labels"].shape == (N, h, w)
    assert jnp.allclose(out["matches"], ref_matches, atol=2e-3, rtol=2e-3)
    assert jnp.allclose(out["loss"], ref_loss, atol=1e-3, rtol=1e-3)

    print("KERNEL_OK")
</pallas_src>

<mosaic_0001>
module attributes {stable_mosaic.version = 11 : i64} {
  func.func @_matcher_head_kernel(%arg0: i32, %arg1: memref<2x128x128xf32, #tpu.memory_space<vmem>>, %arg2: memref<2x128x128xf32, #tpu.memory_space<vmem>>, %arg3: memref<128x256xf32, #tpu.memory_space<vmem>>, %arg4: memref<1x256xf32, #tpu.memory_space<vmem>>, %arg5: memref<128x256xf32, #tpu.memory_space<vmem>>, %arg6: memref<1x256xf32, #tpu.memory_space<vmem>>, %arg7: memref<2x2x128xf32, #tpu.memory_space<vmem>>, %arg8: memref<1x1xf32, #tpu.memory_space<smem>>, %arg9: memref<1xf32, #tpu.memory_space<smem>>) attributes {dimension_semantics = [#tpu.dimension_semantics<arbitrary>], iteration_bounds = array<i64: 2>, scalar_prefetch = 0 : i64, scratch_operands = 1 : i64, tpu.core_type = #tpu.core_type<tc>, window_params = [{transform_indices = @transform_0, window_bounds = array<i64: 2, 128, 128>}, {transform_indices = @transform_1, window_bounds = array<i64: 2, 128, 128>}, {pipeline_mode = #tpu.pipeline_mode<synchronous>, transform_indices = @transform_2, window_bounds = array<i64: 128, 256>}, {pipeline_mode = #tpu.pipeline_mode<synchronous>, transform_indices = @transform_3, window_bounds = array<i64: 1, 256>}, {pipeline_mode = #tpu.pipeline_mode<synchronous>, transform_indices = @transform_4, window_bounds = array<i64: 128, 256>}, {pipeline_mode = #tpu.pipeline_mode<synchronous>, transform_indices = @transform_5, window_bounds = array<i64: 1, 256>}, {transform_indices = @transform_6, window_bounds = array<i64: 2, 2, 128>}, {transform_indices = @transform_7, window_bounds = array<i64: 1, 1>}]} {
    %c0_i32 = arith.constant 0 : i32
    %0 = arith.cmpi eq, %arg0, %c0_i32 : i32
    %1 = arith.extui %0 : i1 to i32
    %c0_i32_0 = arith.constant 0 : i32
    %2 = arith.cmpi ne, %1, %c0_i32_0 : i32
    scf.if %2 {
      %cst_26 = arith.constant 0.000000e+00 : f32
      %c0_27 = arith.constant 0 : index
      %56 = memref.load %arg9[%c0_27] : memref<1xf32, #tpu.memory_space<smem>>
      memref.store %cst_26, %arg9[%c0_27] : memref<1xf32, #tpu.memory_space<smem>>
    } else {
    }
    %c0 = arith.constant 0 : index
    %c0_1 = arith.constant 0 : index
    %c0_2 = arith.constant 0 : index
    %3 = vector.load %arg1[%c0, %c0_1, %c0_2] : memref<2x128x128xf32, #tpu.memory_space<vmem>>, vector<2x128x128xf32>
    %4 = vector.shape_cast %3 : vector<2x128x128xf32> to vector<256x128xf32>
    %c0_3 = arith.constant 0 : index
    %c0_4 = arith.constant 0 : index
    %5 = vector.load %arg3[%c0_3, %c0_4] : memref<128x256xf32, #tpu.memory_space<vmem>>, vector<128x256xf32>
    %cst = arith.constant dense<0.000000e+00> : vector<256x256xf32>
    %6 = tpu.matmul %4, %5, %cst {dimension_numbers = #tpu.dot_dimension_numbers<[1], [0], [0], [1], [0, 0, 1, 1], [], []>} : vector<256x128xf32>, vector<128x256xf32>, vector<256x256xf32> -> vector<256x256xf32>
    %c0_5 = arith.constant 0 : index
    %c0_6 = arith.constant 0 : index
    %7 = vector.load %arg4[%c0_5, %c0_6] : memref<1x256xf32, #tpu.memory_space<vmem>>, vector<1x256xf32>
    %8 = vector.broadcast %7 : vector<1x256xf32> to vector<256x256xf32>
    %9 = arith.addf %6, %8 : vector<256x256xf32>
    %10 = vector.shape_cast %9 : vector<256x256xf32> to vector<2x128x256xf32>
    %c0_7 = arith.constant 0 : index
    %c0_8 = arith.constant 0 : index
    %c0_9 = arith.constant 0 : index
    %11 = vector.load %arg2[%c0_7, %c0_8, %c0_9] : memref<2x128x128xf32, #tpu.memory_space<vmem>>, vector<2x128x128xf32>
    %12 = vector.shape_cast %11 : vector<2x128x128xf32> to vector<256x128xf32>
    %c0_10 = arith.constant 0 : index
    %c0_11 = arith.constant 0 : index
    %13 = vector.load %arg5[%c0_10, %c0_11] : memref<128x256xf32, #tpu.memory_space<vmem>>, vector<128x256xf32>
    %cst_12 = arith.constant dense<0.000000e+00> : vector<256x256xf32>
    %14 = tpu.matmul %12, %13, %cst_12 {dimension_numbers = #tpu.dot_dimension_numbers<[1], [0], [0], [1], [0, 0, 1, 1], [], []>} : vector<256x128xf32>, vector<128x256xf32>, vector<256x256xf32> -> vector<256x256xf32>
    %c0_13 = arith.constant 0 : index
    %c0_14 = arith.constant 0 : index
    %15 = vector.load %arg6[%c0_13, %c0_14] : memref<1x256xf32, #tpu.memory_space<vmem>>, vector<1x256xf32>
    %16 = vector.broadcast %15 : vector<1x256xf32> to vector<256x256xf32>
    %17 = arith.addf %14, %16 : vector<256x256xf32>
    %18 = vector.shape_cast %17 : vector<256x256xf32> to vector<2x128x256xf32>
    %19 = vector.extract_strided_slice %18 {offsets = [0, 0, 0], sizes = [1, 128, 256], strides = [1, 1, 1]} : vector<2x128x256xf32> to vector<1x128x256xf32>
    %20 = vector.shape_cast %19 : vector<1x128x256xf32> to vector<128x256xf32>
    %21 = vector.shape_cast %20 : vector<128x256xf32> to vector<1x128x256xf32>
    %22 = vector.broadcast %21 : vector<1x128x256xf32> to vector<2x128x256xf32>
    %23 = arith.mulf %10, %22 : vector<2x128x256xf32>
    %cst_15 = arith.constant dense<0.000000e+00> : vector<2x128xf32>
    %24 = vector.multi_reduction <add>, %23, %cst_15 [2] : vector<2x128x256xf32> to vector<2x128xf32>
    %25 = vector.extract_strided_slice %18 {offsets = [1, 0, 0], sizes = [1, 128, 256], strides = [1, 1, 1]} : vector<2x128x256xf32> to vector<1x128x256xf32>
    %26 = vector.shape_cast %25 : vector<1x128x256xf32> to vector<128x256xf32>
    %27 = vector.shape_cast %26 : vector<128x256xf32> to vector<1x128x256xf32>
    %28 = vector.broadcast %27 : vector<1x128x256xf32> to vector<2x128x256xf32>
    %29 = arith.mulf %10, %28 : vector<2x128x256xf32>
    %cst_16 = arith.constant dense<0.000000e+00> : vector<2x128xf32>
    %30 = vector.multi_reduction <add>, %29, %cst_16 [2] : vector<2x128x256xf32> to vector<2x128xf32>
    %31 = vector.shape_cast %24 : vector<2x128xf32> to vector<2x1x128xf32>
    %32 = vector.shape_cast %30 : vector<2x128xf32> to vector<2x1x128xf32>
    %33 = tpu.concatenate %31, %32 in 1 : vector<2x1x128xf32>, vector<2x1x128xf32> -> vector<2x2x128xf32>
    %c0_17 = arith.constant 0 : index
    %c0_18 = arith.constant 0 : index
    %c0_19 = arith.constant 0 : index
    %34 = vector.load %arg7[%c0_17, %c0_18, %c0_19] : memref<2x2x128xf32, #tpu.memory_space<vmem>>, vector<2x2x128xf32>
    tpu.vector_store %arg7[%c0_17, %c0_18, %c0_19], %33 {strides = array<i32>} : memref<2x2x128xf32, #tpu.memory_space<vmem>>, vector<2x2x128xf32>,
    %35 = arith.maximumf %24, %30 : vector<2x128xf32>
    %36 = arith.subf %24, %35 : vector<2x128xf32>
    %37 = math.exp %36 : vector<2x128xf32>
    %38 = arith.subf %30, %35 : vector<2x128xf32>
    %39 = math.exp %38 : vector<2x128xf32>
    %40 = arith.addf %37, %39 : vector<2x128xf32>
    %41 = math.log %40 : vector<2x128xf32>
    %42 = arith.addf %35, %41 : vector<2x128xf32>
    %43 = vector.extract_strided_slice %24 {offsets = [0, 0], sizes = [1, 128], strides = [1, 1]} : vector<2x128xf32> to vector<1x128xf32>
    %44 = vector.extract_strided_slice %30 {offsets = [1, 0], sizes = [1, 128], strides = [1, 1]} : vector<2x128xf32> to vector<1x128xf32>
    %45 = tpu.concatenate %43, %44 in 0 : vector<1x128xf32>, vector<1x128xf32> -> vector<2x128xf32>
    %c0_20 = arith.constant 0 : index
    %46 = memref.load %arg9[%c0_20] : memref<1xf32, #tpu.memory_space<smem>>
    %47 = arith.subf %42, %45 : vector<2x128xf32>
    %48 = vector.shape_cast %47 : vector<2x128xf32> to vector<1x2x128xf32>
    %cst_21 = arith.constant dense<0.000000e+00> : vector<1xf32>
    %49 = vector.multi_reduction <add>, %48, %cst_21 [1, 2] : vector<1x2x128xf32> to vector<1xf32>
    %50 = vector.shape_cast %49 : vector<1xf32> to vector<1x1x1xf32>
    %51 = vector.extract %50[0, 0, 0] : f32 from vector<1x1x1xf32>
    %52 = arith.addf %46, %51 : f32
    %c0_22 = arith.constant 0 : index
    %53 = memref.load %arg9[%c0_22] : memref<1xf32, #tpu.memory_space<smem>>
    memref.store %52, %arg9[%c0_22] : memref<1xf32, #tpu.memory_space<smem>>
    %c0_23 = arith.constant 0 : index
    %54 = memref.load %arg9[%c0_23] : memref<1xf32, #tpu.memory_space<smem>>
    %c0_24 = arith.constant 0 : index
    %c0_25 = arith.constant 0 : index
    %55 = memref.load %arg8[%c0_24, %c0_25] : memref<1x1xf32, #tpu.memory_space<smem>>
    memref.store %54, %arg8[%c0_24, %c0_25] : memref<1x1xf32, #tpu.memory_space<smem>>
    return
  }
  func.func @transform_0(%arg0: i32) -> (i32, i32, i32) {
    %c0_i32 = arith.constant 0 : i32
    %c0_i32_0 = arith.constant 0 : i32
    %c0_i32_1 = arith.constant 0 : i32
    return %c0_i32, %arg0, %c0_i32_0 : i32, i32, i32
  }
  func.func @transform_1(%arg0: i32) -> (i32, i32, i32) {
    %c0_i32 = arith.constant 0 : i32
    %c0_i32_0 = arith.constant 0 : i32
    %c0_i32_1 = arith.constant 0 : i32
    return %c0_i32, %arg0, %c0_i32_0 : i32, i32, i32
  }
  func.func @transform_2(%arg0: i32) -> (i32, i32) {
    %c0_i32 = arith.constant 0 : i32
    %c0_i32_0 = arith.constant 0 : i32
    %c0_i32_1 = arith.constant 0 : i32
    return %c0_i32, %c0_i32_0 : i32, i32
  }
  func.func @transform_3(%arg0: i32) -> (i32, i32) {
    %c0_i32 = arith.constant 0 : i32
    %c0_i32_0 = arith.constant 0 : i32
    %c0_i32_1 = arith.constant 0 : i32
    return %c0_i32, %c0_i32_0 : i32, i32
  }
  func.func @transform_4(%arg0: i32) -> (i32, i32) {
    %c0_i32 = arith.constant 0 : i32
    %c0_i32_0 = arith.constant 0 : i32
    %c0_i32_1 = arith.constant 0 : i32
    return %c0_i32, %c0_i32_0 : i32, i32
  }
  func.func @transform_5(%arg0: i32) -> (i32, i32) {
    %c0_i32 = arith.constant 0 : i32
    %c0_i32_0 = arith.constant 0 : i32
    %c0_i32_1 = arith.constant 0 : i32
    return %c0_i32, %c0_i32_0 : i32, i32
  }
  func.func @transform_6(%arg0: i32) -> (i32, i32, i32) {
    %c0_i32 = arith.constant 0 : i32
    %c0_i32_0 = arith.constant 0 : i32
    %c0_i32_1 = arith.constant 0 : i32
    return %c0_i32, %c0_i32_0, %arg0 : i32, i32, i32
  }
  func.func @transform_7(%arg0: i32) -> (i32, i32) {
    %c0_i32 = arith.constant 0 : i32
    %c0_i32_0 = arith.constant 0 : i32
    %c0_i32_1 = arith.constant 0 : i32
    return %c0_i32, %c0_i32_0 : i32, i32
  }
}

</mosaic_0001>

<bundles_post_ra>
// kernel: tpu_custom_call.1
= control target key start
LH: loop header
LB: loop body
LE: loop exit
PB: predicated region body
PF: predicated region fallthrough
CT: control target
= control target key end

     0   :  { %s5049_s0 = inlined_call_operand.hbm [shape: f32[2,256,128], index: 0, kind: input, shape index: {}]   ;;  %s5050_s1 = inlined_call_operand.hbm [shape: f32[2,256,128], index: 1, kind: input, shape index: {}]   ;;  %s5051_s2 = inlined_call_operand.hbm [shape: f32[128,256], index: 2, kind: input, shape index: {}]   ;;  %s5052_s3 = inlined_call_operand.vmem [shape: f32[1,256], index: 3, kind: input, shape index: {}]   ;;  %s5053_s4 = inlined_call_operand.hbm [shape: f32[128,256], index: 4, kind: input, shape index: {}]   ;;  %s5054_s5 = inlined_call_operand.vmem [shape: f32[1,256], index: 5, kind: input, shape index: {}]   ;;  %s5055_s6 = inlined_call_operand.hbm [shape: f32[2,2,256], index: 6, kind: output, shape index: {0}]   ;;  %s5056_s7 = inlined_call_operand.hbm [shape: f32[1,1], index: 7, kind: output, shape index: {1}]  }
   0x1   :  { %5183 = sst [smem:[#allocation78_spill]] %s5049_s0 }
   0x2   :  { %5184 = sst [smem:[#allocation79_spill]] %s5051_s2 }
   0x3   :  { %5185 = sst [smem:[#allocation80_spill]] %s5053_s4 }
   0x4   :  { %13 = vsyncpa [#allocation4], 0 }
   0x5   :  { %15 = vsyncpa [#allocation4 + $0x1], 0 }
   0x6   :  { %16 = vsyncpa [#allocation8], 0 }
   0x7   :  { %18 = vsyncpa [#allocation8 + $0x1], 0 }
   0x8   :  { %19 = vsyncpa [#allocation11], 0 }
   0x9   :  { %20 = vsyncpa [#allocation5], 0 }
   0xa   :  { %22 = vsyncpa [#allocation5 + $0x1], 0 }
   0xb   :  { %23 = vsyncpa [#allocation6], 0  ;;  %s3382_s24 = smov 0   ;;  %s3384_s25 = smov 0  }
   0xc   :  { %s3386_s26 = smov 0   ;;  %s3388_s27 = smov 0  }
   0xd LB: > { %s3403_s28 = sadd.s32 4294967295, %s3316_s27   ;;  %s2840_s29 = sadd.s32 4294967294, %s3316_s27   ;;  %s3316_s27 = sphi %s3388_s27, %s5384_s27   ;;  %s3312_s26 = sphi %s3386_s26, %s5383_s26   ;;  %s3308_s25 = sphi %s3384_s25, %s5382_s25   ;;  %s3304_s24 = sphi %s3382_s24, %s5381_s24  }
   0xe   : > { %s3407_s30 = sadd.s32 1, %s3316_s27   ;;  %s36_s8 = sadd.s32 1, %s3312_s26 }
   0xf   : > { %s33_s9 = ssub.s32 %s3316_s27, %s3407_s30  ;;  %p43_p0 = scmp.ne.s32.totalorder %s3312_s26, %s3308_s25 }
  0x10   : > { %p34_p1 = scmp.eq.s32.totalorder %s33_s9, 0  ;;  %p44_p2 = scmp.eq.s32.totalorder %s3316_s27, 0 }
  0x11   : > { %p49_p3 = scmp.ne.s32.totalorder %s3308_s25, %s3304_s24  ;;  %p5058_p4 = scmp.eq.s32.totalorder %s3403_s28, 0 }
  0x12   : > { %s3419_s10 = scalar_select %p34_p1, %s3312_s26, %s36_s8  }
  0x13   : > { %p3421_p5 = por %p44_p2, %p43_p0  ;;  %p3427_p6 = por %p5058_p4, %p49_p3 }
  0x14   : > { %5186 = sst [smem:[#allocation26_spill]] %s3419_s10  ;;  %p5057_p7 = scmp.eq.s32.totalorder %s3403_s28, 1 }
  0x15   : > { %s5188_s12 = scalar_select %p3427_p6, 1, 0 }
  0x16   : > { %p189_p8 = scmp.eq.s32.totalorder %s2840_s29, 1  ;;  %p2841_p9 = scmp.ge.s32.totalorder %s3316_s27, 1 }
  0x17   : > { %p217_p10 = scmp.lt.s32.totalorder %s3316_s27, 3  ;;  %p3436_p11 = por %p5057_p7, %p43_p0 }
  0x18   : > { %p3440_p12 = por %p189_p8, %p49_p3  ;;  %s3318_s16 = smov [#allocation9]  }
  0x19   : > { %s5189_s13 = scalar_select %p3436_p11, 1, 0 }
  0x1a   : > { %s5190_s14 = scalar_select %p3440_p12, 1, 0 }
  0x1b   : > { %p3444_p13 = pnand %p2841_p9, %p217_p10  ;;  %s229_s17 = sshll.u32 %s3318_s16, 4  ;;  %s230_s17 = int_to_ptr.vmem [resolvable:$true] %s229_s17 }
  0x1c   : > { %s3319_s19 = smov [#allocation10]   ;;  %s3185_s21 = scalar_lea.vmem %s230_s17, 4096 }
  0x1d   : > { %p2906_p1 = pneg %p3444_p13  ;;  %s245_s20 = sshll.u32 %s3319_s19, 4  ;;  %s246_s20 = int_to_ptr.vmem [resolvable:$true] %s245_s20 }
  0x1e   : > { %p3186_p3 = scmp.ne.s32.totalorder %s230_s17, %s3185_s21  ;;  %p3193_p10 = scmp.lt.s32.totalorder %s230_s17, %s230_s17 }
  0x1f   : > { %p3452_p2 = pnand %p2906_p1, %p5058_p4  ;;  %p3194_p7 = scmp.lt.s32.totalorder %s3185_s21, %s3185_s21 }
  0x21   : > { %p3176_p0 = pneg %p3452_p2  ;;  %p3195_p12 = por %p3194_p7, %p3193_p10 }
  0x23   : > { %p3188_p8 = pnand %p3186_p3, %p3176_p0 }
  0x25   : > { %p3189_p9 = pneg %p3188_p8 }
  0x27   : > { %p3196_p1 = pnand %p3195_p12, %p3189_p9 }
  0x29   : > { %3199 = shalt.err (!%p3196_p1)
}
  0x2a   : > { %s3320_s22 = smov 256   ;;  %s3321_s23 = smov 16  }
  0x2b   : > { %s5193_s2 = sld [smem:[#allocation79_spill]]  ;;  %s3211_s9 = scalar_lea.vmem %s246_s20, 4096 }
  0x2c   : > { %p3212_p4 = scmp.ne.s32.totalorder %s246_s20, %s3211_s9  ;;  %p3219_p11 = scmp.lt.s32.totalorder %s246_s20, %s246_s20 }
  0x2d   : > { %p3220_p6 = scmp.lt.s32.totalorder %s3211_s9, %s3211_s9 }
  0x2e   : > { %p3214_p3 = pnand %p3212_p4, %p3176_p0 }
  0x2f   : > { %p3221_p7 = por %p3220_p6, %p3219_p11 }
  0x30   : > { %p3215_p8 = pneg %p3214_p3 }
  0x31   : > { %2909 = dma.hbm_to_vmem [thread:$0]  (!%p3452_p2), %s5193_s2, 4096, %s230_s17, [#allocation8], %s3320_s22, %s3320_s22, %s3321_s23  }
  0x32   : > { %p3222_p12 = pnand %p3221_p7, %p3215_p8 }
  0x34   : > { %3225 = shalt.err (!%p3222_p12)
}
  0x35   : > { %s5194_s4 = sld [smem:[#allocation80_spill]]  ;;  %p2844_p9 = scmp.ge.s32.totalorder %s3316_s27, 2 }
  0x37   : > { %258 = sbr.rel (%p2844_p9) target bundleno = 86 (0x56), region = 32 }
  0x3b   : > { %2912 = dma.hbm_to_vmem [thread:$0]  (!%p3452_p2), %s5194_s4, 4096, %s246_s20, [#allocation11], %s3320_s22, %s3320_s22, %s3321_s23  }
  0x3c   : > { %s262_s17 = sand.u32 1, %s3312_s26   ;;  %s2868_s21 = sshll.u32 %s3316_s27, 11 }
  0x3d   : > { %s2845_s18 = sshll.u32 %s262_s17, 8  ;;  %s5195_s0 = sld [smem:[#allocation78_spill]] }
  0x3e   : > { %s2876_s22 = scalar_select %p3421_p5, [#allocation0], [#allocation18] }
  0x3f   : > { %s266_s23 = scalar_lea.vmem [#allocation3], %s2845_s18  ;;  %s3322_s19 = smov 4096  }
  0x40   : > { %s285_s9 = sshll.u32 %s266_s23, 4  ;;  %s277_s16 = sld [smem:[%s2876_s22]]   ;;  %s286_s9 = int_to_ptr.vmem [resolvable:$true] %s285_s9 }
  0x41   : > { %2877 = sst [smem:[#allocation15]] (%p3421_p5), %s3322_s19  ;;  %s3323_s2 = smov 2048  }
  0x42   : > { %2878 = sst [smem:[#allocation15 + $0x1]] (%p3421_p5), %s3323_s2  ;;  %s3324_s4 = smov 16  }
  0x43   : > { %s272_s20 = scalar_lea.hbm %s5195_s0, %s2868_s21  ;;  %2879 = sst [smem:[#allocation15 + $0x2]] (%p3421_p5), %s3324_s4 }
  0x44   : > { %s3325_s10 = smov 128   ;;  %s3326_s8 = smov 8  }
  0x45   : > { %2880 = sst [smem:[#allocation15 + $0x3]] (%p3421_p5), %s3325_s10  ;;  %s263_s23 = scalar_lea.sflag [#allocation4], %s262_s17 }
  0x46   : > { %2881 = sst [smem:[#allocation15 + $0x4]] (%p3421_p5), %s3325_s10  ;;  %s2848_s29 = sshll.u32 %s277_s16, 26 }
  0x47   : > { %2882 = sst [smem:[#allocation15 + $0x5]] (%p3421_p5), %s3326_s8  ;;  %s2849_s22 = sadd.s32 134217728, %s2848_s29 }
  0x48   : > { %s3327_s0 = smov 131072  }
  0x49   : > { %2883 = dma.general (%p3421_p5), %s272_s20, 4096, %s286_s9, %s263_s23, %s3327_s0, [#allocation15], %s2849_s22, 0  }
  0x4a   : > { %s308_s2 = sand.u32 1, %s3316_s27   ;;  %s318_s10 = scalar_lea.hbm %s5050_s1, %s2868_s21 }
  0x4b   : > { %s2884_s16 = scalar_select %p3421_p5, [#allocation0], [#allocation19] }
  0x4c   : > { %s312_s29 = scalar_lea.vmem [#allocation7], %s2845_s18  ;;  %s3328_s0 = smov 4096  }
  0x4d   : > { %s331_s17 = sshll.u32 %s312_s29, 4  ;;  %s323_s8 = sld [smem:[%s2884_s16]]   ;;  %s332_s17 = int_to_ptr.vmem [resolvable:$true] %s331_s17 }
  0x4e   : > { %2885 = sst [smem:[#allocation17]] (%p3421_p5), %s3328_s0  ;;  %s3329_s20 = smov 2048  }
  0x4f   : > { %2886 = sst [smem:[#allocation17 + $0x1]] (%p3421_p5), %s3329_s20  ;;  %s3330_s9 = smov 16  }
  0x50   : > { %2887 = sst [smem:[#allocation17 + $0x2]] (%p3421_p5), %s3330_s9  ;;  %s3331_s22 = smov 128  }
  0x51   : > { %2888 = sst [smem:[#allocation17 + $0x3]] (%p3421_p5), %s3331_s22  ;;  %s3332_s18 = smov 8  }
  0x52   : > { %2889 = sst [smem:[#allocation17 + $0x4]] (%p3421_p5), %s3331_s22  ;;  %s309_s4 = scalar_lea.sflag [#allocation8], %s308_s2 }
  0x53   : > { %s2853_s21 = sshll.u32 %s323_s8, 26  ;;  %2890 = sst [smem:[#allocation17 + $0x5]] (%p3421_p5), %s3332_s18 }
  0x54   : > { %s2854_s23 = sadd.s32 134217728, %s2853_s21  ;;  %s3333_s19 = smov 131072  }
  0x55   : > { %2891 = dma.general (%p3421_p5), %s318_s10, 4096, %s332_s17, %s309_s4, %s3333_s19, [#allocation17], %s2854_s23, 0  }
  0x56 PF: > { %356 = sbr.rel (%p3444_p13) target bundleno = 1187 (0x4a3), region = 44 }
  0x5b   : > { %s3521_s16 = sand.u32 1, %s3308_s25   ;;  %p5196_p4 = scmp.ne.s32.totalorder %s5188_s12, 0 }
  0x5c   : > { %s2856_s29 = sshll.u32 %s3521_s16, 8  ;;  %s359_s8 = scalar_lea.sflag [#allocation4], %s3521_s16 }
  0x5d   : > { %s3525_s0 = scalar_lea.vmem [#allocation3], %s2856_s29 }
  0x5e   : > { %3279 = dma.done.wait (%p5196_p4), %s359_s8, 4096  }
  0x5f   : > { %3281 = vsyncadd (%p5196_p4), %s359_s8, 4294963200  ;;  %s367_s11 = sand.u32 1, %s3403_s28   ;;  %s3532_s2 = scalar_lea.vmem [#allocation7], %s2856_s29 }
  0x60   : > { %s368_s15 = scalar_lea.sflag [#allocation8], %s367_s11 }
  0x61   : > { %3283 = dma.done.wait (%p5196_p4), %s368_s15, 4096  }
  0x62   : > { %3285 = vsyncadd (%p5196_p4), %s368_s15, 4294963200  ;;  %p5197_p5 = scmp.eq.s32.totalorder %s3403_s28, 0 }
  0x64   : > { %3287 = dma.done.wait (%p5197_p5), [#allocation8], 4096   ;;  %p5198_p6 = pmov %p5197_p5 }
  0x65   : > { %p5199_p11 = pmov %p5197_p5 }
  0x66   : > { %3289 = vsyncadd (%p5198_p6), [#allocation8], 4294963200 }
  0x67   : > { %3291 = dma.done.wait (%p5199_p11), [#allocation11], 4096   ;;  %p5200_p13 = pmov %p5197_p5 }
  0x68   : > { %v3334_v0 = vmov 0.0   ;;  %v486_v1 = vld [vmem:[#allocation9 + $0xf8] sm:$0xff]  ;;  %v485_v3 = vld [vmem:[#allocation9 + $0xf0] sm:$0xff]  ;;  %v484_v5 = vld [vmem:[#allocation9 + $0xe8] sm:$0xff]  ;;  %vm1452_vm0 = vcmask 130112   ;;  %vm1459_vm1 = vcmask 195712   ;;  %p5374_p2 = pmov %p5197_p5 }
  0x69   : > { %3293 = vsyncadd (%p5200_p13), [#allocation11], 4294963200  ;;  %563 = vmatprep.mubr.f32.mxu0 %v3334_v0  ;;  %896 = vmatprep.mubr.f32.mxu1 %v3334_v0  ;;  %v819_v2 = vld [vmem:[#allocation10 + $0xf8] sm:$0xff]  ;;  %v818_v4 = vld [vmem:[#allocation10 + $0xf0] sm:$0xff]  ;;  %vm1466_vm2 = vcmask 261312   ;;  %vm1473_vm3 = vcmask 326912  }
  0x6a   : > { %499 = vmatprep.subr.mxu0 %v486_v1  ;;  %832 = vmatprep.subr.mxu1 %v819_v2  ;;  %v817_v6 = vld [vmem:[#allocation10 + $0xe8] sm:$0xff]  ;;  %v483_v7 = vld [vmem:[#allocation9 + $0xe0] sm:$0xff]  ;;  %v482_v9 = vld [vmem:[#allocation9 + $0xd8] sm:$0xff]  ;;  %vm1480_vm4 = vcmask 392512   ;;  %vm1487_vm5 = vcmask 458112   ;;  %vm1494_vm6 = vcmask 523712  }
  0x6b   : > { %500 = vmatpush1.msra.mxu0 %v485_v3  ;;  %833 = vmatpush1.msra.mxu1 %v818_v4  ;;  %v816_v8 = vld [vmem:[#allocation10 + $0xe0] sm:$0xff]  ;;  %v815_v10 = vld [vmem:[#allocation10 + $0xd8] sm:$0xff]  ;;  %v481_v11 = vld [vmem:[#allocation9 + $0xd0] sm:$0xff]  ;;  %vm1501_vm7 = vcmask 589312   ;;  %vm1508_vm8 = vcmask 654912   ;;  %vm1515_vm9 = vcmask 720512  }
  0x6c   : > { %501 = vmatprep.subr.mxu0 %v484_v5  ;;  %834 = vmatprep.subr.mxu1 %v817_v6  ;;  %v814_v12 = vld [vmem:[#allocation10 + $0xd0] sm:$0xff]  ;;  %v480_v13 = vld [vmem:[#allocation9 + $0xc8] sm:$0xff]  ;;  %v479_v15 = vld [vmem:[#allocation9 + $0xc0] sm:$0xff]  ;;  %vm1522_vm10 = vcmask 786112   ;;  %vm1529_vm11 = vcmask 851712   ;;  %vm1536_vm12 = vcmask 917312  }
  0x6d   : > { %502 = vmatpush1.msra.mxu0 %v483_v7  ;;  %835 = vmatpush1.msra.mxu1 %v816_v8  ;;  %v813_v14 = vld [vmem:[#allocation10 + $0xc8] sm:$0xff]  ;;  %v812_v16 = vld [vmem:[#allocation10 + $0xc0] sm:$0xff]  ;;  %v478_v17 = vld [vmem:[#allocation9 + $0xb8] sm:$0xff]  ;;  %vm1543_vm13 = vcmask 982912   ;;  %vm1550_vm14 = vcmask 1048512   ;;  %vm1825_vm15 = vcmask 1040384  }
  0x6e   : > { %503 = vmatprep.subr.mxu0 %v482_v9  ;;  %836 = vmatprep.subr.mxu1 %v815_v10  ;;  %v811_v18 = vld [vmem:[#allocation10 + $0xb8] sm:$0xff]  ;;  %v477_v19 = vld [vmem:[#allocation9 + $0xb0] sm:$0xff]  ;;  %v476_v21 = vld [vmem:[#allocation9 + $0xa8] sm:$0xff]  ;;  %s2860_s9 = sshll.u32 %s3521_s16, 2  ;;  %s3336_s21 = smov 0.0  }
  0x6f   : > { %504 = vmatpush1.msra.mxu0 %v481_v11  ;;  %837 = vmatpush1.msra.mxu1 %v814_v12  ;;  %v810_v20 = vld [vmem:[#allocation10 + $0xb0] sm:$0xff]  ;;  %v809_v22 = vld [vmem:[#allocation10 + $0xa8] sm:$0xff]  ;;  %v475_v23 = vld [vmem:[#allocation9 + $0xa0] sm:$0xff]  ;;  %s4604_s22 = scalar_lea.vmem [#allocation12], %s2860_s9  ;;  %2899 = sst [smem:[#allocation2]] (%p5374_p2), %s3336_s21 }
  0x70   : > { %505 = vmatprep.subr.mxu0 %v480_v13  ;;  %838 = vmatprep.subr.mxu1 %v813_v14  ;;  %v808_v24 = vld [vmem:[#allocation10 + $0xa0] sm:$0xff]  ;;  %v474_v25 = vld [vmem:[#allocation9 + $0x98] sm:$0xff]  ;;  %v473_v27 = vld [vmem:[#allocation9 + $0x90] sm:$0xff]  ;;  %s2702_s18 = sshll.u32 %s4604_s22, 4  ;;  %s2863_s23 = sshll.u32 %s3403_s28, 5  ;;  %s4991_s18 = int_to_ptr.vmem [resolvable:$true] %s2702_s18 }
  0x71   : > { %506 = vmatpush1.msra.mxu0 %v479_v15  ;;  %839 = vmatpush1.msra.mxu1 %v812_v16  ;;  %v807_v26 = vld [vmem:[#allocation10 + $0x98] sm:$0xff]  ;;  %v806_v28 = vld [vmem:[#allocation10 + $0x90] sm:$0xff]  ;;  %v472_v29 = vld [vmem:[#allocation9 + $0x88] sm:$0xff]  ;;  %s4997_s29 = scalar_lea.hbm %s5055_s6, %s2863_s23  ;;  %s2690_s8 = scalar_lea.sflag [#allocation5], %s3521_s16 }
  0x72   : > { %507 = vmatprep.subr.mxu0 %v478_v17  ;;  %840 = vmatprep.subr.mxu1 %v811_v18  ;;  %v805_v30 = vld [vmem:[#allocation10 + $0x88] sm:$0xff]  ;;  %v471_v31 = vld [vmem:[#allocation9 + $0x80] sm:$0xff]  ;;  %v470_v33 = vld [vmem:[#allocation9 + $0x78] sm:$0xff]  ;;  %p5375_p10 = scmp.ne.s32.totalorder %s5189_s13, 0  ;;  %s3337_s11 = smov [#allocation12]  }
  0x73   : > { %508 = vmatpush1.msra.mxu0 %v477_v19  ;;  %841 = vmatpush1.msra.mxu1 %v810_v20  ;;  %v804_v32 = vld [vmem:[#allocation10 + $0x80] sm:$0xff]  ;;  %v803_v34 = vld [vmem:[#allocation10 + $0x78] sm:$0xff]  ;;  %v469_v35 = vld [vmem:[#allocation9 + $0x70] sm:$0xff]  ;;  %s3230_s15 = sshll.u32 %s3337_s11, 4  ;;  %s3231_s15 = int_to_ptr.vmem [resolvable:$false] %s3230_s15 }
  0x74   : > { %509 = vmatprep.subr.mxu0 %v476_v21  ;;  %842 = vmatprep.subr.mxu1 %v809_v22  ;;  %v802_v36 = vld [vmem:[#allocation10 + $0x70] sm:$0xff]  ;;  %v468_v37 = vld [vmem:[#allocation9 + $0x68] sm:$0xff]  ;;  %v467_v39 = vld [vmem:[#allocation9 + $0x60] sm:$0xff]  ;;  %p3233_p8 = scmp.lt.s32.totalorder %s4991_s18, %s3231_s15 }
  0x75   : > { %510 = vmatpush1.msra.mxu0 %v475_v23  ;;  %843 = vmatpush1.msra.mxu1 %v808_v24  ;;  %v801_v38 = vld [vmem:[#allocation10 + $0x68] sm:$0xff]  ;;  %v800_v40 = vld [vmem:[#allocation10 + $0x60] sm:$0xff]  ;;  %v466_v41 = vld [vmem:[#allocation9 + $0x58] sm:$0xff] }
  0x76   : > { %511 = vmatprep.subr.mxu0 %v474_v25  ;;  %844 = vmatprep.subr.mxu1 %v807_v26  ;;  %v799_v42 = vld [vmem:[#allocation10 + $0x58] sm:$0xff]  ;;  %v465_v43 = vld [vmem:[#allocation9 + $0x50] sm:$0xff]  ;;  %v464_v45 = vld [vmem:[#allocation9 + $0x48] sm:$0xff] }
  0x77   : > { %512 = vmatpush1.msra.mxu0 %v473_v27  ;;  %845 = vmatpush1.msra.mxu1 %v806_v28  ;;  %v798_v44 = vld [vmem:[#allocation10 + $0x50] sm:$0xff]  ;;  %v797_v46 = vld [vmem:[#allocation10 + $0x48] sm:$0xff]  ;;  %v463_v47 = vld [vmem:[#allocation9 + $0x40] sm:$0xff] }
  0x78   : > { %513 = vmatprep.subr.mxu0 %v472_v29  ;;  %846 = vmatprep.subr.mxu1 %v805_v30  ;;  %v796_v48 = vld [vmem:[#allocation10 + $0x40] sm:$0xff]  ;;  %v462_v49 = vld [vmem:[#allocation9 + $0x38] sm:$0xff]  ;;  %v461_v51 = vld [vmem:[#allocation9 + $0x30] sm:$0xff] }
  0x79   : > { %514 = vmatpush1.msra.mxu0 %v471_v31  ;;  %847 = vmatpush1.msra.mxu1 %v804_v32  ;;  %v795_v50 = vld [vmem:[#allocation10 + $0x38] sm:$0xff]  ;;  %v794_v52 = vld [vmem:[#allocation10 + $0x30] sm:$0xff]  ;;  %v460_v53 = vld [vmem:[#allocation9 + $0x28] sm:$0xff] }
  0x7a   : > { %515 = vmatprep.subr.mxu0 %v470_v33  ;;  %848 = vmatprep.subr.mxu1 %v803_v34  ;;  %v793_v54 = vld [vmem:[#allocation10 + $0x28] sm:$0xff]  ;;  %v459_v55 = vld [vmem:[#allocation9 + $0x20] sm:$0xff]  ;;  %v458_v57 = vld [vmem:[#allocation9 + $0x18] sm:$0xff] }
  0x7b   : > { %516 = vmatpush1.msra.mxu0 %v469_v35  ;;  %849 = vmatpush1.msra.mxu1 %v802_v36  ;;  %v792_v56 = vld [vmem:[#allocation10 + $0x20] sm:$0xff]  ;;  %v791_v58 = vld [vmem:[#allocation10 + $0x18] sm:$0xff]  ;;  %v457_v59 = vld [vmem:[#allocation9 + $0x10] sm:$0xff] }
  0x7c   : > { %517 = vmatprep.subr.mxu0 %v468_v37  ;;  %850 = vmatprep.subr.mxu1 %v801_v38  ;;  %v790_v60 = vld [vmem:[#allocation10 + $0x10] sm:$0xff]  ;;  %v456_v61 = vld [vmem:[#allocation9 + $0x8] sm:$0xff]  ;;  %v455_v63 = vld [vmem:[#allocation9] sm:$0xff] }
  0x7d   : > { %518 = vmatpush1.msra.mxu0 %v467_v39  ;;  %851 = vmatpush1.msra.mxu1 %v800_v40  ;;  %v789_v62 = vld [vmem:[#allocation10 + $0x8] sm:$0xff]  ;;  %v788_v1 = vld [vmem:[#allocation10] sm:$0xff]  ;;  %v425_v6 = vld [vmem:[%s3525_s0 + $0x10] sm:$0xff] }
  0x7e   : > { %519 = vmatprep.subr.mxu0 %v466_v41  ;;  %852 = vmatprep.subr.mxu1 %v799_v42  ;;  %v423_v2 = vld [vmem:[%s3525_s0] sm:$0xff]  ;;  %v424_v4 = vld [vmem:[%s3525_s0 + $0x8] sm:$0xff]  ;;  %v758_v7 = vld [vmem:[%s3532_s2 + $0x10] sm:$0xff] }
  0x7f   : > { %520 = vmatpush1.msra.mxu0 %v465_v43  ;;  %853 = vmatpush1.msra.mxu1 %v798_v44  ;;  %v756_v3 = vld [vmem:[%s3532_s2] sm:$0xff]  ;;  %v757_v5 = vld [vmem:[%s3532_s2 + $0x8] sm:$0xff]  ;;  %v426_v8 = vld [vmem:[%s3525_s0 + $0x18] sm:$0xff] }
  0x80   : > { %521 = vmatprep.subr.mxu0 %v464_v45  ;;  %854 = vmatprep.subr.mxu1 %v797_v46  ;;  %v759_v9 = vld [vmem:[%s3532_s2 + $0x18] sm:$0xff]  ;;  %v427_v10 = vld [vmem:[%s3525_s0 + $0x20] sm:$0xff]  ;;  %v428_v12 = vld [vmem:[%s3525_s0 + $0x28] sm:$0xff] }
  0x81   : > { %522 = vmatpush1.msra.mxu0 %v463_v47  ;;  %855 = vmatpush1.msra.mxu1 %v796_v48  ;;  %v760_v11 = vld [vmem:[%s3532_s2 + $0x20] sm:$0xff]  ;;  %v761_v13 = vld [vmem:[%s3532_s2 + $0x28] sm:$0xff]  ;;  %v429_v14 = vld [vmem:[%s3525_s0 + $0x30] sm:$0xff] }
  0x82   : > { %523 = vmatprep.subr.mxu0 %v462_v49  ;;  %856 = vmatprep.subr.mxu1 %v795_v50  ;;  %v762_v15 = vld [vmem:[%s3532_s2 + $0x30] sm:$0xff]  ;;  %v430_v16 = vld [vmem:[%s3525_s0 + $0x38] sm:$0xff]  ;;  %v431_v18 = vld [vmem:[%s3525_s0 + $0x40] sm:$0xff] }
  0x83   : > { %524 = vmatpush1.msra.mxu0 %v461_v51  ;;  %857 = vmatpush1.msra.mxu1 %v794_v52  ;;  %v763_v17 = vld [vmem:[%s3532_s2 + $0x38] sm:$0xff]  ;;  %v764_v19 = vld [vmem:[%s3532_s2 + $0x40] sm:$0xff]  ;;  %v432_v20 = vld [vmem:[%s3525_s0 + $0x48] sm:$0xff] }
  0x84   : > { %525 = vmatprep.subr.mxu0 %v460_v53  ;;  %858 = vmatprep.subr.mxu1 %v793_v54  ;;  %v765_v21 = vld [vmem:[%s3532_s2 + $0x48] sm:$0xff]  ;;  %v433_v22 = vld [vmem:[%s3525_s0 + $0x50] sm:$0xff]  ;;  %v434_v24 = vld [vmem:[%s3525_s0 + $0x58] sm:$0xff] }
  0x85   : > { %526 = vmatpush1.msra.mxu0 %v459_v55  ;;  %859 = vmatpush1.msra.mxu1 %v792_v56  ;;  %v766_v23 = vld [vmem:[%s3532_s2 + $0x50] sm:$0xff]  ;;  %v767_v25 = vld [vmem:[%s3532_s2 + $0x58] sm:$0xff]  ;;  %v435_v26 = vld [vmem:[%s3525_s0 + $0x60] sm:$0xff] }
  0x86   : > { %527 = vmatprep.subr.mxu0 %v458_v57  ;;  %860 = vmatprep.subr.mxu1 %v791_v58  ;;  %v768_v27 = vld [vmem:[%s3532_s2 + $0x60] sm:$0xff]  ;;  %v436_v28 = vld [vmem:[%s3525_s0 + $0x68] sm:$0xff]  ;;  %v437_v30 = vld [vmem:[%s3525_s0 + $0x70] sm:$0xff] }
  0x87   : > { %528 = vmatpush1.msra.mxu0 %v457_v59  ;;  %861 = vmatpush1.msra.mxu1 %v790_v60  ;;  %v769_v29 = vld [vmem:[%s3532_s2 + $0x68] sm:$0xff]  ;;  %v770_v31 = vld [vmem:[%s3532_s2 + $0x70] sm:$0xff]  ;;  %v438_v32 = vld [vmem:[%s3525_s0 + $0x78] sm:$0xff] }
  0x88   : > { %529 = vmatprep.subr.mxu0 %v456_v61  ;;  %862 = vmatprep.subr.mxu1 %v789_v62  ;;  %v771_v33 = vld [vmem:[%s3532_s2 + $0x78] sm:$0xff]  ;;  %v439_v34 = vld [vmem:[%s3525_s0 + $0x80] sm:$0xff]  ;;  %v440_v36 = vld [vmem:[%s3525_s0 + $0x88] sm:$0xff] }
  0x89   : > { %530 = vmatpush1.msra.mxu0 %v455_v63  ;;  %863 = vmatpush1.msra.mxu1 %v788_v1  ;;  %v772_v35 = vld [vmem:[%s3532_s2 + $0x80] sm:$0xff]  ;;  %v773_v37 = vld [vmem:[%s3532_s2 + $0x88] sm:$0xff]  ;;  %v441_v38 = vld [vmem:[%s3525_s0 + $0x90] sm:$0xff] }
  0x8a   : > { %564 = vmatmul.mubr.f32.vlgmr.msra.gmra.mxu0 %v423_v2  ;;  %897 = vmatmul.mubr.f32.vlgmr.msra.gmra.mxu1 %v756_v3  ;;  %v774_v39 = vld [vmem:[%s3532_s2 + $0x90] sm:$0xff]  ;;  %v442_v40 = vld [vmem:[%s3525_s0 + $0x98] sm:$0xff]  ;;  %v443_v42 = vld [vmem:[%s3525_s0 + $0xa0] sm:$0xff]  ;;  %v5061_v3 = vlaneseq }
  0x8b   : > { %569 = vmatprep.mubr.f32.mxu0 %v3334_v0  ;;  %902 = vmatprep.mubr.f32.mxu1 %v3334_v0  ;;  %v775_v41 = vld [vmem:[%s3532_s2 + $0x98] sm:$0xff]  ;;  %v776_v43 = vld [vmem:[%s3532_s2 + $0xa0] sm:$0xff]  ;;  %v444_v44 = vld [vmem:[%s3525_s0 + $0xa8] sm:$0xff] }
  0x8c   : > { %v777_v45 = vld [vmem:[%s3532_s2 + $0xa8] sm:$0xff]  ;;  %v445_v46 = vld [vmem:[%s3525_s0 + $0xb0] sm:$0xff]  ;;  %v446_v48 = vld [vmem:[%s3525_s0 + $0xb8] sm:$0xff] }
  0x8d   : > { %v778_v47 = vld [vmem:[%s3532_s2 + $0xb0] sm:$0xff]  ;;  %v779_v49 = vld [vmem:[%s3532_s2 + $0xb8] sm:$0xff]  ;;  %v447_v50 = vld [vmem:[%s3525_s0 + $0xc0] sm:$0xff] }
  0x8e   : > { %570 = vmatmul.mubr.f32.gmra.mxu0 %v424_v4  ;;  %903 = vmatmul.mubr.f32.gmra.mxu1 %v757_v5  ;;  %v780_v51 = vld [vmem:[%s3532_s2 + $0xc0] sm:$0xff]  ;;  %v448_v52 = vld [vmem:[%s3525_s0 + $0xc8] sm:$0xff]  ;;  %v449_v54 = vld [vmem:[%s3525_s0 + $0xd0] sm:$0xff]  ;;  %v3675_v4 = vshrl.u32 %v5061_v3, 7 }
  0x8f   : > { %575 = vmatprep.mubr.f32.mxu0 %v3334_v0  ;;  %908 = vmatprep.mubr.f32.mxu1 %v3334_v0  ;;  %v781_v53 = vld [vmem:[%s3532_s2 + $0xc8] sm:$0xff]  ;;  %v782_v55 = vld [vmem:[%s3532_s2 + $0xd0] sm:$0xff]  ;;  %v450_v56 = vld [vmem:[%s3525_s0 + $0xd8] sm:$0xff] }
  0x90   : > { %v783_v57 = vld [vmem:[%s3532_s2 + $0xd8] sm:$0xff]  ;;  %v451_v58 = vld [vmem:[%s3525_s0 + $0xe0] sm:$0xff]  ;;  %v452_v60 = vld [vmem:[%s3525_s0 + $0xe8] sm:$0xff]  ;;  %5201 = vst [vmem:[#allocation27_spill] sm:$0xff] %v3675_v4  ;;  %v3678_v5 = vsub.s32 0, %v3675_v4 }
  0x91   : > { %v784_v59 = vld [vmem:[%s3532_s2 + $0xe0] sm:$0xff]  ;;  %v785_v61 = vld [vmem:[%s3532_s2 + $0xe8] sm:$0xff]  ;;  %v453_v62 = vld [vmem:[%s3525_s0 + $0xf0] sm:$0xff] }
  0x92   : > { %576 = vmatmul.mubr.f32.gmra.mxu0 %v425_v6  ;;  %909 = vmatmul.mubr.f32.gmra.mxu1 %v758_v7  ;;  %v786_v63 = vld [vmem:[%s3532_s2 + $0xf0] sm:$0xff]  ;;  %v454_v1 = vld [vmem:[%s3525_s0 + $0xf8] sm:$0xff]  ;;  %5202 = vst [vmem:[#allocation28_spill] sm:$0xff] %v3678_v5  ;;  %v487_v6 = vld [vmem:[%s5052_s3] sm:$0x3]  ;;  %s3226_s0 = scalar_lea.vmem %s4991_s18, 64 }
  0x93   : > { %581 = vmatprep.mubr.f32.mxu0 %v3334_v0  ;;  %914 = vmatprep.mubr.f32.mxu1 %v3334_v0  ;;  %v787_v2 = vld [vmem:[%s3532_s2 + $0xf8] sm:$0xff]  ;;  %v820_v7 = vld [vmem:[%s5054_s5] sm:$0x3]  ;;  %p3227_p0 = scmp.ne.s32.totalorder %s4991_s18, %s3226_s0  ;;  %s3232_s2 = scalar_lea.vmem %s3231_s15, 128 }
  0x94   : > { %p3234_p7 = scmp.lt.s32.totalorder %s3232_s2, %s3226_s0 }
  0x95   : > { %p3228_p1 = pnand %p3227_p0, %p5375_p10 }
  0x96   : > { %582 = vmatmul.mubr.f32.gmra.mxu0 %v426_v8  ;;  %915 = vmatmul.mubr.f32.gmra.mxu1 %v759_v9  ;;  %v3690_v8 = vrot.slane %v487_v6, %v3678_v5  ;;  %v3693_v9 = vrot.slane %v820_v7, %v3678_v5  ;;  %p3235_p12 = por %p3234_p7, %p3233_p8 }
  0x97   : > { %587 = vmatprep.mubr.f32.mxu0 %v3334_v0  ;;  %920 = vmatprep.mubr.f32.mxu1 %v3334_v0  ;;  %p3229_p3 = pneg %p3228_p1 }
  0x99   : > { %p3236_p4 = pnand %p3235_p12, %p3229_p3 }
  0x9a   : > { %588 = vmatmul.mubr.f32.gmra.mxu0 %v427_v10  ;;  %921 = vmatmul.mubr.f32.gmra.mxu1 %v760_v11 }
  0x9b   : > { %593 = vmatprep.mubr.f32.mxu0 %v3334_v0  ;;  %926 = vmatprep.mubr.f32.mxu1 %v3334_v0 }
  0x9e   : > { %594 = vmatmul.mubr.f32.gmra.mxu0 %v428_v12  ;;  %927 = vmatmul.mubr.f32.gmra.mxu1 %v761_v13 }
  0x9f   : > { %599 = vmatprep.mubr.f32.mxu0 %v3334_v0  ;;  %932 = vmatprep.mubr.f32.mxu1 %v3334_v0 }
  0xa2   : > { %600 = vmatmul.mubr.f32.gmra.mxu0 %v429_v14  ;;  %933 = vmatmul.mubr.f32.gmra.mxu1 %v762_v15 }
  0xa3   : > { %605 = vmatprep.mubr.f32.mxu0 %v3334_v0  ;;  %938 = vmatprep.mubr.f32.mxu1 %v3334_v0 }
  0xa6   : > { %606 = vmatmul.mubr.f32.gmra.mxu0 %v430_v16  ;;  %939 = vmatmul.mubr.f32.gmra.mxu1 %v763_v17 }
  0xa7   : > { %611 = vmatprep.mubr.f32.mxu0 %v3334_v0  ;;  %944 = vmatprep.mubr.f32.mxu1 %v3334_v0 }
  0xaa   : > { %612 = vmatmul.mubr.f32.gmra.mxu0 %v431_v18  ;;  %945 = vmatmul.mubr.f32.gmra.mxu1 %v764_v19 }
  0xab   : > { %617 = vmatprep.mubr.f32.mxu0 %v3334_v0  ;;  %950 = vmatprep.mubr.f32.mxu1 %v3334_v0 }
  0xae   : > { %618 = vmatmul.mubr.f32.gmra.mxu0 %v432_v20  ;;  %951 = vmatmul.mubr.f32.gmra.mxu1 %v765_v21 }
  0xaf   : > { %623 = vmatprep.mubr.f32.mxu0 %v3334_v0  ;;  %956 = vmatprep.mubr.f32.mxu1 %v3334_v0 }
  0xb2   : > { %624 = vmatmul.mubr.f32.gmra.mxu0 %v433_v22  ;;  %957 = vmatmul.mubr.f32.gmra.mxu1 %v766_v23 }
  0xb3   : > { %629 = vmatprep.mubr.f32.mxu0 %v3334_v0  ;;  %962 = vmatprep.mubr.f32.mxu1 %v3334_v0 }
  0xb6   : > { %630 = vmatmul.mubr.f32.gmra.mxu0 %v434_v24  ;;  %963 = vmatmul.mubr.f32.gmra.mxu1 %v767_v25 }
  0xb7   : > { %635 = vmatprep.mubr.f32.mxu0 %v3334_v0  ;;  %968 = vmatprep.mubr.f32.mxu1 %v3334_v0 }
  0xba   : > { %636 = vmatmul.mubr.f32.gmra.mxu0 %v435_v26  ;;  %969 = vmatmul.mubr.f32.gmra.mxu1 %v768_v27 }
  0xbb   : > { %641 = vmatprep.mubr.f32.mxu0 %v3334_v0  ;;  %974 = vmatprep.mubr.f32.mxu1 %v3334_v0 }
  0xbe   : > { %642 = vmatmul.mubr.f32.gmra.mxu0 %v436_v28  ;;  %975 = vmatmul.mubr.f32.gmra.mxu1 %v769_v29 }
  0xbf   : > { %647 = vmatprep.mubr.f32.mxu0 %v3334_v0  ;;  %980 = vmatprep.mubr.f32.mxu1 %v3334_v0 }
  0xc2   : > { %648 = vmatmul.mubr.f32.gmra.mxu0 %v437_v30  ;;  %981 = vmatmul.mubr.f32.gmra.mxu1 %v770_v31 }
  0xc3   : > { %653 = vmatprep.mubr.f32.mxu0 %v3334_v0  ;;  %986 = vmatprep.mubr.f32.mxu1 %v3334_v0 }
  0xc6   : > { %654 = vmatmul.mubr.f32.gmra.mxu0 %v438_v32  ;;  %987 = vmatmul.mubr.f32.gmra.mxu1 %v771_v33 }
  0xc7   : > { %659 = vmatprep.mubr.f32.mxu0 %v3334_v0  ;;  %992 = vmatprep.mubr.f32.mxu1 %v3334_v0 }
  0xca   : > { %660 = vmatmul.mubr.f32.gmra.mxu0 %v439_v34  ;;  %993 = vmatmul.mubr.f32.gmra.mxu1 %v772_v35 }
  0xcb   : > { %665 = vmatprep.mubr.f32.mxu0 %v3334_v0  ;;  %998 = vmatprep.mubr.f32.mxu1 %v3334_v0 }
  0xce   : > { %666 = vmatmul.mubr.f32.gmra.mxu0 %v440_v36  ;;  %999 = vmatmul.mubr.f32.gmra.mxu1 %v773_v37 }
  0xcf   : > { %671 = vmatprep.mubr.f32.mxu0 %v3334_v0  ;;  %1004 = vmatprep.mubr.f32.mxu1 %v3334_v0 }
  0xd2   : > { %672 = vmatmul.mubr.f32.gmra.mxu0 %v441_v38  ;;  %1005 = vmatmul.mubr.f32.gmra.mxu1 %v774_v39 }
  0xd3   : > { %677 = vmatprep.mubr.f32.mxu0 %v3334_v0  ;;  %1010 = vmatprep.mubr.f32.mxu1 %v3334_v0 }
  0xd6   : > { %678 = vmatmul.mubr.f32.gmra.mxu0 %v442_v40  ;;  %1011 = vmatmul.mubr.f32.gmra.mxu1 %v775_v41 }
  0xd7   : > { %683 = vmatprep.mubr.f32.mxu0 %v3334_v0  ;;  %1016 = vmatprep.mubr.f32.mxu1 %v3334_v0 }
  0xda   : > { %684 = vmatmul.mubr.f32.gmra.mxu0 %v443_v42  ;;  %1017 = vmatmul.mubr.f32.gmra.mxu1 %v776_v43 }
  0xdb   : > { %689 = vmatprep.mubr.f32.mxu0 %v3334_v0  ;;  %1022 = vmatprep.mubr.f32.mxu1 %v3334_v0 }
  0xde   : > { %690 = vmatmul.mubr.f32.gmra.mxu0 %v444_v44  ;;  %1023 = vmatmul.mubr.f32.gmra.mxu1 %v777_v45 }
  0xdf   : > { %695 = vmatprep.mubr.f32.mxu0 %v3334_v0  ;;  %1028 = vmatprep.mubr.f32.mxu1 %v3334_v0 }
  0xe2   : > { %696 = vmatmul.mubr.f32.gmra.mxu0 %v445_v46  ;;  %1029 = vmatmul.mubr.f32.gmra.mxu1 %v778_v47 }
  0xe3   : > { %701 = vmatprep.mubr.f32.mxu0 %v3334_v0  ;;  %1034 = vmatprep.mubr.f32.mxu1 %v3334_v0 }
  0xe6   : > { %702 = vmatmul.mubr.f32.gmra.mxu0 %v446_v48  ;;  %1035 = vmatmul.mubr.f32.gmra.mxu1 %v779_v49 }
  0xe7   : > { %707 = vmatprep.mubr.f32.mxu0 %v3334_v0  ;;  %1040 = vmatprep.mubr.f32.mxu1 %v3334_v0 }
  0xea   : > { %708 = vmatmul.mubr.f32.gmra.mxu0 %v447_v50  ;;  %1041 = vmatmul.mubr.f32.gmra.mxu1 %v780_v51 }
  0xeb   : > { %713 = vmatprep.mubr.f32.mxu0 %v3334_v0  ;;  %1046 = vmatprep.mubr.f32.mxu1 %v3334_v0 }
  0xee   : > { %714 = vmatmul.mubr.f32.gmra.mxu0 %v448_v52  ;;  %1047 = vmatmul.mubr.f32.gmra.mxu1 %v781_v53 }
  0xef   : > { %719 = vmatprep.mubr.f32.mxu0 %v3334_v0  ;;  %1052 = vmatprep.mubr.f32.mxu1 %v3334_v0 }
  0xf2   : > { %720 = vmatmul.mubr.f32.gmra.mxu0 %v449_v54  ;;  %1053 = vmatmul.mubr.f32.gmra.mxu1 %v782_v55 }
  0xf3   : > { %725 = vmatprep.mubr.f32.mxu0 %v3334_v0  ;;  %1058 = vmatprep.mubr.f32.mxu1 %v3334_v0 }
  0xf6   : > { %726 = vmatmul.mubr.f32.gmra.mxu0 %v450_v56  ;;  %1059 = vmatmul.mubr.f32.gmra.mxu1 %v783_v57 }
  0xf7   : > { %731 = vmatprep.mubr.f32.mxu0 %v3334_v0  ;;  %1064 = vmatprep.mubr.f32.mxu1 %v3334_v0 }
  0xfa   : > { %732 = vmatmul.mubr.f32.gmra.mxu0 %v451_v58  ;;  %1065 = vmatmul.mubr.f32.gmra.mxu1 %v784_v59 }
  0xfb   : > { %737 = vmatprep.mubr.f32.mxu0 %v3334_v0  ;;  %1070 = vmatprep.mubr.f32.mxu1 %v3334_v0 }
  0xfe   : > { %738 = vmatmul.mubr.f32.gmra.mxu0 %v452_v60  ;;  %1071 = vmatmul.mubr.f32.gmra.mxu1 %v785_v61 }
  0xff   : > { %743 = vmatprep.mubr.f32.mxu0 %v3334_v0  ;;  %1076 = vmatprep.mubr.f32.mxu1 %v3334_v0 }
 0x102   : > { %744 = vmatmul.mubr.f32.gmra.mxu0 %v453_v62  ;;  %1077 = vmatmul.mubr.f32.gmra.mxu1 %v786_v63 }
 0x103   : > { %749 = vmatprep.mubr.f32.mxu0 %v3334_v0  ;;  %1082 = vmatprep.mubr.f32.mxu1 %v3334_v0  ;;  %v3687_v0 = vsub.s32 1, %v3675_v4 }
 0x105   : > { %5203 = vst [vmem:[#allocation29_spill] sm:$0xff] %v3687_v0  ;;  %v3696_v10 = vrot.slane %v487_v6, %v3687_v0  ;;  %v3699_v11 = vrot.slane %v820_v7, %v3687_v0 }
 0x106   : > { %750 = vmatmul.mubr.f32.gmra.mxu0 %v454_v1  ;;  %1083 = vmatmul.mubr.f32.gmra.mxu1 %v787_v2 }
 0x14a   : > { %v565_v12 = vpop.f32.mrf.mxu0  ;;  %v898_v13 = vpop.f32.mrf.mxu1 }
 0x14b   : > { %v3702_v14 = vadd.f32 %v565_v12, %v3690_v8  ;;  %v3705_v15 = vadd.f32 %v898_v13, %v3693_v9 }
 0x14c   : > { %v567_v16 = vpop.f32.mrf.mxu0  ;;  %v900_v17 = vpop.f32.mrf.mxu1 }
 0x14d   : > { %v3708_v18 = vadd.f32 %v567_v16, %v3696_v10  ;;  %v3711_v19 = vadd.f32 %v900_v17, %v3699_v11  ;;  %v1089_v24 = vmul.f32 %v3705_v15, %v3702_v14 }
 0x14e   : > { %v571_v20 = vpop.f32.mrf.mxu0  ;;  %v904_v21 = vpop.f32.mrf.mxu1 }
 0x14f   : > { %v3714_v22 = vadd.f32 %v571_v20, %v3690_v8  ;;  %v3717_v23 = vadd.f32 %v904_v21, %v3693_v9  ;;  %v1090_v25 = vmul.f32 %v3711_v19, %v3708_v18 }
 0x150   : > { %v573_v26 = vpop.f32.mrf.mxu0  ;;  %v906_v27 = vpop.f32.mrf.mxu1 }
 0x151   : > { %v3724_v28 = vadd.f32 %v573_v26, %v3696_v10  ;;  %v3727_v29 = vadd.f32 %v906_v27, %v3699_v11  ;;  %v1153_v30 = vadd.f32 %v1090_v25, %v1089_v24  ;;  %v1091_v33 = vmul.f32 %v3717_v23, %v3714_v22 }
 0x152   : > { %v577_v31 = vpop.f32.mrf.mxu0  ;;  %v910_v32 = vpop.f32.mrf.mxu1 }
 0x153   : > { %v1092_v34 = vmul.f32 %v3727_v29, %v3724_v28  ;;  %v3734_v35 = vadd.f32 %v577_v31, %v3690_v8  ;;  %v3737_v36 = vadd.f32 %v910_v32, %v3693_v9  ;;  %1154 = vadd.xlane.f32.xlu0 %v1153_v30 }
 0x154   : > { %v579_v37 = vpop.f32.mrf.mxu0  ;;  %v912_v38 = vpop.f32.mrf.mxu1 }
 0x155   : > { %v3740_v39 = vadd.f32 %v579_v37, %v3696_v10  ;;  %v3743_v40 = vadd.f32 %v912_v38, %v3699_v11  ;;  %v1156_v41 = vadd.f32 %v1092_v34, %v1091_v33  ;;  %v1093_v44 = vmul.f32 %v3737_v36, %v3734_v35 }
 0x156   : > { %v583_v42 = vpop.f32.mrf.mxu0  ;;  %v916_v43 = vpop.f32.mrf.mxu1 }
 0x157   : > { %v1094_v45 = vmul.f32 %v3743_v40, %v3740_v39  ;;  %v3750_v46 = vadd.f32 %v583_v42, %v3690_v8  ;;  %v3753_v47 = vadd.f32 %v916_v43, %v3693_v9  ;;  %1157 = vadd.xlane.f32.xlu0 %v1156_v41 }
 0x158   : > { %v585_v48 = vpop.f32.mrf.mxu0  ;;  %v918_v49 = vpop.f32.mrf.mxu1 }
 0x159   : > { %v3756_v50 = vadd.f32 %v585_v48, %v3696_v10  ;;  %v3759_v51 = vadd.f32 %v918_v49, %v3699_v11  ;;  %v1159_v52 = vadd.f32 %v1094_v45, %v1093_v44  ;;  %v1095_v55 = vmul.f32 %v3753_v47, %v3750_v46 }
 0x15a   : > { %v589_v53 = vpop.f32.mrf.mxu0  ;;  %v922_v54 = vpop.f32.mrf.mxu1 }
 0x15b   : > { %v1096_v56 = vmul.f32 %v3759_v51, %v3756_v50  ;;  %v3766_v57 = vadd.f32 %v589_v53, %v3690_v8  ;;  %v3769_v58 = vadd.f32 %v922_v54, %v3693_v9  ;;  %1160 = vadd.xlane.f32.xlu0 %v1159_v52 }
 0x15c   : > { %v591_v59 = vpop.f32.mrf.mxu0  ;;  %v924_v60 = vpop.f32.mrf.mxu1 }
 0x15d   : > { %v3772_v61 = vadd.f32 %v591_v59, %v3696_v10  ;;  %v3775_v62 = vadd.f32 %v924_v60, %v3699_v11  ;;  %v1162_v63 = vadd.f32 %v1096_v56, %v1095_v55  ;;  %v1097_v6 = vmul.f32 %v3769_v58, %v3766_v57 }
 0x15e   : > { %v595_v1 = vpop.f32.mrf.mxu0  ;;  %v928_v2 = vpop.f32.mrf.mxu1 }
 0x15f   : > { %v1098_v7 = vmul.f32 %v3775_v62, %v3772_v61  ;;  %v3782_v12 = vadd.f32 %v595_v1, %v3690_v8  ;;  %v3785_v13 = vadd.f32 %v928_v2, %v3693_v9  ;;  %1163 = vadd.xlane.f32.xlu0 %v1162_v63 }
 0x160   : > { %v597_v16 = vpop.f32.mrf.mxu0  ;;  %v930_v17 = vpop.f32.mrf.mxu1 }
 0x161   : > { %v3788_v20 = vadd.f32 %v597_v16, %v3696_v10  ;;  %v3791_v21 = vadd.f32 %v930_v17, %v3699_v11  ;;  %v1165_v24 = vadd.f32 %v1098_v7, %v1097_v6  ;;  %v1099_v27 = vmul.f32 %v3785_v13, %v3782_v12 }
 0x162   : > { %v601_v25 = vpop.f32.mrf.mxu0  ;;  %v934_v26 = vpop.f32.mrf.mxu1 }
 0x163   : > { %v1100_v30 = vmul.f32 %v3791_v21, %v3788_v20  ;;  %v3798_v31 = vadd.f32 %v601_v25, %v3690_v8  ;;  %v3801_v32 = vadd.f32 %v934_v26, %v3693_v9  ;;  %1166 = vadd.xlane.f32.xlu0 %v1165_v24 }
 0x164   : > { %v603_v33 = vpop.f32.mrf.mxu0  ;;  %v936_v34 = vpop.f32.mrf.mxu1 }
 0x165   : > { %5204 = vst [vmem:[#allocation30_spill] sm:$0xff] %v3798_v31  ;;  %v3804_v37 = vadd.f32 %v603_v33, %v3696_v10  ;;  %v3807_v38 = vadd.f32 %v936_v34, %v3699_v11  ;;  %v1168_v41 = vadd.f32 %v1100_v30, %v1099_v27  ;;  %v1101_v44 = vmul.f32 %v3801_v32, %v3798_v31 }
 0x166   : > { %v607_v42 = vpop.f32.mrf.mxu0  ;;  %v940_v43 = vpop.f32.mrf.mxu1 }
 0x167   : > { %5205 = vst [vmem:[#allocation31_spill] sm:$0xff] %v3804_v37  ;;  %v1102_v45 = vmul.f32 %v3807_v38, %v3804_v37  ;;  %v3814_v48 = vadd.f32 %v607_v42, %v3690_v8  ;;  %v3817_v49 = vadd.f32 %v940_v43, %v3693_v9  ;;  %1169 = vadd.xlane.f32.xlu0 %v1168_v41 }
 0x168   : > { %v609_v52 = vpop.f32.mrf.mxu0  ;;  %v942_v53 = vpop.f32.mrf.mxu1 }
 0x169   : > { %5206 = vst [vmem:[#allocation32_spill] sm:$0xff] %v3814_v48  ;;  %v3820_v54 = vadd.f32 %v609_v52, %v3696_v10  ;;  %v3823_v55 = vadd.f32 %v942_v53, %v3699_v11  ;;  %v1171_v56 = vadd.f32 %v1102_v45, %v1101_v44  ;;  %v1103_v63 = vmul.f32 %v3817_v49, %v3814_v48 }
 0x16a   : > { %v613_v59 = vpop.f32.mrf.mxu0  ;;  %v946_v60 = vpop.f32.mrf.mxu1 }
 0x16b   : > { %5207 = vst [vmem:[#allocation33_spill] sm:$0xff] %v3820_v54  ;;  %v1104_v1 = vmul.f32 %v3823_v55, %v3820_v54  ;;  %v3830_v2 = vadd.f32 %v613_v59, %v3690_v8  ;;  %v3833_v6 = vadd.f32 %v946_v60, %v3693_v9  ;;  %1172 = vadd.xlane.f32.xlu0 %v1171_v56 }
 0x16c   : > { %v615_v7 = vpop.f32.mrf.mxu0  ;;  %v948_v16 = vpop.f32.mrf.mxu1 }
 0x16d   : > { %5208 = vst [vmem:[#allocation34_spill] sm:$0xff] %v3830_v2  ;;  %v3836_v17 = vadd.f32 %v615_v7, %v3696_v10  ;;  %v3839_v24 = vadd.f32 %v948_v16, %v3699_v11  ;;  %v1174_v25 = vadd.f32 %v1104_v1, %v1103_v63  ;;  %v1105_v30 = vmul.f32 %v3833_v6, %v3830_v2 }
 0x16e   : > { %v619_v26 = vpop.f32.mrf.mxu0  ;;  %v952_v27 = vpop.f32.mrf.mxu1 }
 0x16f   : > { %5209 = vst [vmem:[#allocation35_spill] sm:$0xff] %v3836_v17  ;;  %v1106_v33 = vmul.f32 %v3839_v24, %v3836_v17  ;;  %v3846_v34 = vadd.f32 %v619_v26, %v3690_v8  ;;  %v3849_v41 = vadd.f32 %v952_v27, %v3693_v9  ;;  %1175 = vadd.xlane.f32.xlu0 %v1174_v25 }
 0x170   : > { %v621_v42 = vpop.f32.mrf.mxu0  ;;  %v954_v43 = vpop.f32.mrf.mxu1 }
 0x171   : > { %5210 = vst [vmem:[#allocation36_spill] sm:$0xff] %v3846_v34  ;;  %v3852_v44 = vadd.f32 %v621_v42, %v3696_v10  ;;  %v3855_v45 = vadd.f32 %v954_v43, %v3699_v11  ;;  %v1177_v52 = vadd.f32 %v1106_v33, %v1105_v30  ;;  %v1107_v59 = vmul.f32 %v3849_v41, %v3846_v34 }
 0x172   : > { %v625_v53 = vpop.f32.mrf.mxu0  ;;  %v958_v56 = vpop.f32.mrf.mxu1 }
 0x173   : > { %5211 = vst [vmem:[#allocation37_spill] sm:$0xff] %v3852_v44  ;;  %v1108_v60 = vmul.f32 %v3855_v45, %v3852_v44  ;;  %v3862_v63 = vadd.f32 %v625_v53, %v3690_v8  ;;  %v3865_v1 = vadd.f32 %v958_v56, %v3693_v9  ;;  %1178 = vadd.xlane.f32.xlu0 %v1177_v52 }
 0x174   : > { %v627_v7 = vpop.f32.mrf.mxu0  ;;  %v960_v16 = vpop.f32.mrf.mxu1 }
 0x175   : > { %5212 = vst [vmem:[#allocation38_spill] sm:$0xff] %v3862_v63  ;;  %v3868_v25 = vadd.f32 %v627_v7, %v3696_v10  ;;  %v3871_v26 = vadd.f32 %v960_v16, %v3699_v11  ;;  %v1180_v27 = vadd.f32 %v1108_v60, %v1107_v59  ;;  %v1109_v42 = vmul.f32 %v3865_v1, %v3862_v63 }
 0x176   : > { %v631_v30 = vpop.f32.mrf.mxu0  ;;  %v964_v33 = vpop.f32.mrf.mxu1 }
 0x177   : > { %5213 = vst [vmem:[#allocation39_spill] sm:$0xff] %v3868_v25  ;;  %v1110_v43 = vmul.f32 %v3871_v26, %v3868_v25  ;;  %v3878_v53 = vadd.f32 %v631_v30, %v3690_v8  ;;  %v3881_v52 = vadd.f32 %v964_v33, %v3693_v9  ;;  %1181 = vadd.xlane.f32.xlu0 %v1180_v27 }
 0x178   : > { %v633_v56 = vpop.f32.mrf.mxu0  ;;  %v966_v7 = vpop.f32.mrf.mxu1 }
 0x179   : > { %5214 = vst [vmem:[#allocation40_spill] sm:$0xff] %v3878_v53  ;;  %v3884_v16 = vadd.f32 %v633_v56, %v3696_v10  ;;  %v3887_v59 = vadd.f32 %v966_v7, %v3699_v11  ;;  %v1183_v60 = vadd.f32 %v1110_v43, %v1109_v42  ;;  %v1111_v5 = vmul.f32 %v3881_v52, %v3878_v53 }
 0x17a   : > { %v637_v3 = vpop.f32.mrf.mxu0  ;;  %v970_v0 = vpop.f32.mrf.mxu1 }
 0x17b   : > { %5215 = vst [vmem:[#allocation41_spill] sm:$0xff] %v3884_v16  ;;  %v1112_v30 = vmul.f32 %v3887_v59, %v3884_v16  ;;  %v3894_v33 = vadd.f32 %v637_v3, %v3690_v8  ;;  %v3897_v27 = vadd.f32 %v970_v0, %v3693_v9  ;;  %1184 = vadd.xlane.f32.xlu0 %v1183_v60 }
 0x17c   : > { %v639_v56 = vpop.f32.mrf.mxu0  ;;  %v972_v4 = vpop.f32.mrf.mxu1 }
 0x17d   : > { %5216 = vst [vmem:[#allocation42_spill] sm:$0xff] %v3894_v33  ;;  %v3900_v7 = vadd.f32 %v639_v56, %v3696_v10  ;;  %v3903_v42 = vadd.f32 %v972_v4, %v3699_v11  ;;  %v1186_v43 = vadd.f32 %v1112_v30, %v1111_v5  ;;  %v1113_v16 = vmul.f32 %v3897_v27, %v3894_v33 }
 0x17e   : > { %v643_v53 = vpop.f32.mrf.mxu0  ;;  %v976_v63 = vpop.f32.mrf.mxu1 }
 0x17f   : > { %5217 = vst [vmem:[#allocation43_spill] sm:$0xff] %v3900_v7  ;;  %v1114_v3 = vmul.f32 %v3903_v42, %v3900_v7  ;;  %v3910_v0 = vadd.f32 %v643_v53, %v3690_v8  ;;  %v3913_v60 = vadd.f32 %v976_v63, %v3693_v9  ;;  %1187 = vadd.xlane.f32.xlu0 %v1186_v43 }
 0x180   : > { %v645_v56 = vpop.f32.mrf.mxu0  ;;  %v978_v25 = vpop.f32.mrf.mxu1 }
 0x181   : > { %5218 = vst [vmem:[#allocation44_spill] sm:$0xff] %v3910_v0  ;;  %5219 = vst [vmem:[#allocation45_spill] sm:$0xff] %v3913_v60  ;;  %v3916_v4 = vadd.f32 %v645_v56, %v3696_v10  ;;  %v3919_v5 = vadd.f32 %v978_v25, %v3699_v11  ;;  %v1189_v30 = vadd.f32 %v1114_v3, %v1113_v16 }
 0x182   : > { %v649_v33 = vpop.f32.mrf.mxu0  ;;  %v982_v34 = vpop.f32.mrf.mxu1  ;;  %v1115_v7 = vmul.f32 %v3913_v60, %v3910_v0 }
 0x183   : > { %5220 = vst [vmem:[#allocation46_spill] sm:$0xff] %v3916_v4  ;;  %5221 = vst [vmem:[#allocation47_spill] sm:$0xff] %v3919_v5  ;;  %v1116_v53 = vmul.f32 %v3919_v5, %v3916_v4  ;;  %v3926_v63 = vadd.f32 %v649_v33, %v3690_v8  ;;  %v3929_v43 = vadd.f32 %v982_v34, %v3693_v9  ;;  %1190 = vadd.xlane.f32.xlu0 %v1189_v30 }
 0x184   : > { %v651_v56 = vpop.f32.mrf.mxu0  ;;  %v984_v44 = vpop.f32.mrf.mxu1 }
 0x185   : > { %5222 = vst [vmem:[#allocation48_spill] sm:$0xff] %v3926_v63  ;;  %5223 = vst [vmem:[#allocation49_spill] sm:$0xff] %v3929_v43  ;;  %v3932_v25 = vadd.f32 %v651_v56, %v3696_v10  ;;  %v3935_v16 = vadd.f32 %v984_v44, %v3699_v11  ;;  %v1192_v3 = vadd.f32 %v1116_v53, %v1115_v7 }
 0x186   : > { %v655_v0 = vpop.f32.mrf.mxu0  ;;  %v988_v2 = vpop.f32.mrf.mxu1  ;;  %v1117_v4 = vmul.f32 %v3929_v43, %v3926_v63 }
 0x187   : > { %5224 = vst [vmem:[#allocation50_spill] sm:$0xff] %v3932_v25  ;;  %5225 = vst [vmem:[#allocation51_spill] sm:$0xff] %v3935_v16  ;;  %v1118_v33 = vmul.f32 %v3935_v16, %v3932_v25  ;;  %1193 = vadd.xlane.f32.xlu0 %v1192_v3  ;;  %v3942_v34 = vadd.f32 %v655_v0, %v3690_v8  ;;  %v3945_v30 = vadd.f32 %v988_v2, %v3693_v9 }
 0x188   : > { %v657_v56 = vpop.f32.mrf.mxu0  ;;  %v990_v17 = vpop.f32.mrf.mxu1 }
 0x189   : > { %5226 = vst [vmem:[#allocation52_spill] sm:$0xff] %v3942_v34  ;;  %5227 = vst [vmem:[#allocation53_spill] sm:$0xff] %v3945_v30  ;;  %v3948_v44 = vadd.f32 %v657_v56, %v3696_v10  ;;  %v3951_v7 = vadd.f32 %v990_v17, %v3699_v11  ;;  %v1195_v53 = vadd.f32 %v1118_v33, %v1117_v4 }
 0x18a   : > { %v661_v63 = vpop.f32.mrf.mxu0  ;;  %v994_v48 = vpop.f32.mrf.mxu1  ;;  %v1119_v2 = vmul.f32 %v3945_v30, %v3942_v34 }
 0x18b   : > { %5228 = vst [vmem:[#allocation54_spill] sm:$0xff] %v3948_v44  ;;  %5229 = vst [vmem:[#allocation55_spill] sm:$0xff] %v3951_v7  ;;  %v1120_v3 = vmul.f32 %v3951_v7, %v3948_v44  ;;  %v662_v0 = vadd.f32 %v661_v63, %v3690_v8  ;;  %1196 = vadd.xlane.f32.xlu0 %v1195_v53  ;;  %v995_v25 = vadd.f32 %v994_v48, %v3693_v9 }
 0x18c   : > { %v663_v54 = vpop.f32.mrf.mxu0  ;;  %v996_v56 = vpop.f32.mrf.mxu1 }
 0x18d   : > { %v664_v43 = vadd.f32 %v663_v54, %v3696_v10  ;;  %v997_v17 = vadd.f32 %v996_v56, %v3699_v11  ;;  %v1198_v16 = vadd.f32 %v1120_v3, %v1119_v2  ;;  %v1121_v60 = vmul.f32 %v3705_v15, %v662_v0 }
 0x18e   : > { %v667_v4 = vpop.f32.mrf.mxu0  ;;  %v1000_v33 = vpop.f32.mrf.mxu1  ;;  %v1249_v34 = vmul.f32 %v995_v25, %v3702_v14  ;;  %v1281_v30 = vmul.f32 %v995_v25, %v662_v0 }
 0x18f   : > { %v1122_v44 = vmul.f32 %v3711_v19, %v664_v43  ;;  %v1250_v63 = vmul.f32 %v997_v17, %v3708_v18  ;;  %v668_v53 = vadd.f32 %v667_v4, %v3690_v8  ;;  %v1001_v48 = vadd.f32 %v1000_v33, %v3693_v9  ;;  %1199 = vadd.xlane.f32.xlu0 %v1198_v16 }
 0x190   : > { %v669_v7 = vpop.f32.mrf.mxu0  ;;  %v1002_v54 = vpop.f32.mrf.mxu1  ;;  %v1282_v56 = vmul.f32 %v997_v17, %v664_v43 }
 0x191   : > { %v670_v5 = vadd.f32 %v669_v7, %v3696_v10  ;;  %v1003_v3 = vadd.f32 %v1002_v54, %v3699_v11  ;;  %v1201_v19 = vadd.f32 %v1122_v44, %v1121_v60  ;;  %v1313_v31 = vadd.f32 %v1250_v63, %v1249_v34 }
 0x192   : > { %v673_v15 = vpop.f32.mrf.mxu0  ;;  %v1361_v2 = vadd.f32 %v1282_v56, %v1281_v30  ;;  %v1123_v18 = vmul.f32 %v3717_v23, %v668_v53  ;;  %v1283_v14 = vmul.f32 %v1001_v48, %v668_v53  ;;  %v1006_v43 = vpop.f32.mrf.mxu1  ;;  %v1251_v54 = vmul.f32 %v1001_v48, %v3714_v22 }
 0x193   : > { %v1124_v4 = vmul.f32 %v3727_v29, %v670_v5  ;;  %v1284_v37 = vmul.f32 %v1003_v3, %v670_v5  ;;  %v674_v16 = vadd.f32 %v673_v15, %v3690_v8  ;;  %1202 = vadd.xlane.f32.xlu0 %v1201_v19  ;;  %v1252_v44 = vmul.f32 %v1003_v3, %v3724_v28 }
 0x194   : > { %1362 = vadd.xlane.f32.xlu1 %v1361_v2  ;;  %v675_v25 = vpop.f32.mrf.mxu0  ;;  %v1008_v5 = vpop.f32.mrf.mxu1 }
 0x195   : > { %v676_v7 = vadd.f32 %v675_v25, %v3696_v10  ;;  %v1364_v17 = vadd.f32 %v1284_v37, %v1283_v14  ;;  %v1204_v33 = vadd.f32 %v1124_v4, %v1123_v18  ;;  %v1125_v34 = vmul.f32 %v3737_v36, %v674_v16 }
 0x196   : > { %v679_v0 = vpop.f32.mrf.mxu0  ;;  %v1007_v37 = vadd.f32 %v1006_v43, %v3693_v9  ;;  %v1009_v36 = vadd.f32 %v1008_v5, %v3699_v11  ;;  %v1012_v2 = vpop.f32.mrf.mxu1  ;;  %v1316_v22 = vadd.f32 %v1252_v44, %v1251_v54 }
 0x197   : > { %v1126_v60 = vmul.f32 %v3743_v40, %v676_v7  ;;  %v680_v23 = vadd.f32 %v679_v0, %v3690_v8  ;;  %1314 = vadd.xlane.f32.xlu0 %v1313_v31 }
 0x198   : > { %1365 = vadd.xlane.f32.xlu1 %v1364_v17  ;;  %v681_v29 = vpop.f32.mrf.mxu0  ;;  %v1285_v3 = vmul.f32 %v1007_v37, %v674_v16  ;;  %v1286_v19 = vmul.f32 %v1009_v36, %v676_v7  ;;  %v1014_v25 = vpop.f32.mrf.mxu1  ;;  %v1254_v16 = vmul.f32 %v1009_v36, %v3740_v39 }
 0x199   : > { %v682_v30 = vadd.f32 %v681_v29, %v3696_v10  ;;  %v1207_v53 = vadd.f32 %v1126_v60, %v1125_v34  ;;  %v1127_v56 = vmul.f32 %v3753_v47, %v680_v23  ;;  %v1015_v60 = vadd.f32 %v1014_v25, %v3699_v11 }
 0x19a   : > { %v685_v63 = vpop.f32.mrf.mxu0  ;;  %v1367_v0 = vadd.f32 %v1286_v19, %v1285_v3  ;;  %v1018_v5 = vpop.f32.mrf.mxu1 }
 0x19b   : > { %v1128_v40 = vmul.f32 %v3759_v51, %v682_v30  ;;  %v686_v31 = vadd.f32 %v685_v63, %v3690_v8  ;;  %1208 = vadd.xlane.f32.xlu0 %v1207_v53  ;;  %v1288_v63 = vmul.f32 %v1015_v60, %v682_v30  ;;  %v1019_v19 = vadd.f32 %v1018_v5, %v3693_v9 }
 0x19c   : > { %1205 = vadd.xlane.f32.xlu1 %v1204_v33  ;;  %v687_v15 = vpop.f32.mrf.mxu0  ;;  %v1253_v33 = vmul.f32 %v1007_v37, %v3734_v35 }
 0x19d   : > { %v688_v28 = vadd.f32 %v687_v15, %v3696_v10  ;;  %v1210_v48 = vadd.f32 %v1128_v40, %v1127_v56  ;;  %v1129_v51 = vmul.f32 %v3769_v58, %v686_v31  ;;  %v1020_v56 = vpop.f32.mrf.mxu1 }
 0x19e   : > { %v691_v18 = vpop.f32.mrf.mxu0  ;;  %v1319_v54 = vadd.f32 %v1254_v16, %v1253_v33 }
 0x19f   : > { %v1130_v4 = vmul.f32 %v3775_v62, %v688_v28  ;;  %v3988_v14 = vadd.f32 %v691_v18, %v3690_v8  ;;  %1211 = vadd.xlane.f32.xlu0 %v1210_v48  ;;  %v1013_v62 = vadd.f32 %v1012_v2, %v3693_v9  ;;  %v1021_v18 = vadd.f32 %v1020_v56, %v3699_v11 }
 0x1a0   : > { %1317 = vadd.xlane.f32.xlu1 %v1316_v22  ;;  %v693_v47 = vpop.f32.mrf.mxu0 }
 0x1a1   : > { %v3991_v43 = vadd.f32 %v693_v47, %v3696_v10  ;;  %v1213_v17 = vadd.f32 %v1130_v4, %v1129_v51  ;;  %v1131_v34 = vmul.f32 %v3785_v13, %v3988_v14  ;;  %v1287_v35 = vmul.f32 %v1013_v62, %v680_v23  ;;  %v1024_v4 = vpop.f32.mrf.mxu1 }
 0x1a2   : > { %v697_v7 = vpop.f32.mrf.mxu0  ;;  %v1256_v23 = vmul.f32 %v1015_v60, %v3756_v50  ;;  %v1290_v47 = vmul.f32 %v1021_v18, %v688_v28 }
 0x1a3   : > { %v1132_v58 = vmul.f32 %v3791_v21, %v3991_v43  ;;  %v4002_v29 = vadd.f32 %v697_v7, %v3690_v8  ;;  %1214 = vadd.xlane.f32.xlu0 %v1213_v17  ;;  %v1370_v2 = vadd.f32 %v1288_v63, %v1287_v35  ;;  %v1026_v33 = vpop.f32.mrf.mxu1 }
 0x1a4   : > { %1368 = vadd.xlane.f32.xlu1 %v1367_v0  ;;  %v699_v39 = vpop.f32.mrf.mxu0 }
 0x1a5   : > { %v4005_v44 = vadd.f32 %v699_v39, %v3696_v10  ;;  %v1216_v21 = vadd.f32 %v1132_v58, %v1131_v34  ;;  %v1133_v13 = vmul.f32 %v3801_v32, %v4002_v29  ;;  %v1025_v34 = vadd.f32 %v1024_v4, %v3693_v9  ;;  %v1030_v63 = vpop.f32.mrf.mxu1 }
 0x1a6   : > { %v703_v53 = vpop.f32.mrf.mxu0  ;;  %v1027_v39 = vadd.f32 %v1026_v33, %v3699_v11 }
 0x1a7   : > { %v1134_v37 = vmul.f32 %v3807_v38, %v4005_v44  ;;  %v4012_v40 = vadd.f32 %v703_v53, %v3690_v8  ;;  %1217 = vadd.xlane.f32.xlu0 %v1216_v21  ;;  %v1255_v38 = vmul.f32 %v1013_v62, %v3750_v46  ;;  %v1289_v46 = vmul.f32 %v1019_v19, %v686_v31 }
 0x1a8   : > { %1320 = vadd.xlane.f32.xlu1 %v1319_v54  ;;  %v705_v36 = vpop.f32.mrf.mxu0  ;;  %v1258_v31 = vmul.f32 %v1021_v18, %v3772_v61  ;;  %v1292_v54 = vmul.f32 %v1027_v39, %v3991_v43  ;;  %v1260_v43 = vmul.f32 %v1027_v39, %v3788_v20 }
 0x1a9   : > { %v4015_v15 = vadd.f32 %v705_v36, %v3696_v10  ;;  %v1219_v3 = vadd.f32 %v1134_v37, %v1133_v13  ;;  %v1135_v22 = vmul.f32 %v3817_v49, %v4012_v40  ;;  %v1322_v16 = vadd.f32 %v1256_v23, %v1255_v38  ;;  %v1032_v23 = vpop.f32.mrf.mxu1 }
 0x1aa   : > { %v709_v30 = vpop.f32.mrf.mxu0  ;;  %v1373_v58 = vadd.f32 %v1290_v47, %v1289_v46  ;;  %v1031_v38 = vadd.f32 %v1030_v63, %v3693_v9 }
 0x1ab   : > { %v1136_v32 = vmul.f32 %v3823_v55, %v4015_v15  ;;  %v4026_v48 = vadd.f32 %v709_v30, %v3690_v8  ;;  %1220 = vadd.xlane.f32.xlu0 %v1219_v3 }
 0x1ac   : > { %1371 = vadd.xlane.f32.xlu1 %v1370_v2  ;;  %v711_v50 = vpop.f32.mrf.mxu0 }
 0x1ad   : > { %v4029_v51 = vadd.f32 %v711_v50, %v3696_v10  ;;  %v1222_v55 = vadd.f32 %v1136_v32, %v1135_v22  ;;  %v1137_v49 = vmul.f32 %v3833_v6, %v4026_v48  ;;  %v1036_v22 = vpop.f32.mrf.mxu1 }
 0x1ae   : > { %v715_v25 = vpop.f32.mrf.mxu0 }
 0x1af   : > { %v1138_v7 = vmul.f32 %v3839_v24, %v4029_v51  ;;  %v4036_v0 = vadd.f32 %v715_v25, %v3690_v8  ;;  %1223 = vadd.xlane.f32.xlu0 %v1222_v55  ;;  %v1257_v24 = vmul.f32 %v1019_v19, %v3766_v57  ;;  %v1291_v57 = vmul.f32 %v1025_v34, %v3988_v14 }
 0x1b0   : > { %1323 = vadd.xlane.f32.xlu1 %v1322_v16  ;;  %v717_v17 = vpop.f32.mrf.mxu0  ;;  %v1033_v19 = vadd.f32 %v1032_v23, %v3699_v11  ;;  %v5235_v23 = vld [vmem:[#allocation49_spill] sm:$0xff] }
 0x1b1   : > { %v4039_v62 = vadd.f32 %v717_v17, %v3696_v10  ;;  %v1225_v60 = vadd.f32 %v1138_v7, %v1137_v49  ;;  %v1139_v5 = vmul.f32 %v3849_v41, %v4036_v0  ;;  %v1325_v21 = vadd.f32 %v1258_v31, %v1257_v24  ;;  %v1038_v7 = vpop.f32.mrf.mxu1 }
 0x1b2   : > { %v721_v28 = vpop.f32.mrf.mxu0  ;;  %v1376_v2 = vadd.f32 %v1292_v54, %v1291_v57  ;;  %v1294_v4 = vmul.f32 %v1033_v19, %v4005_v44  ;;  %v5230_v44 = vld [vmem:[#allocation31_spill] sm:$0xff]  ;;  %v1039_v24 = vadd.f32 %v1038_v7, %v3699_v11 }
 0x1b3   : > { %v1140_v6 = vmul.f32 %v3855_v45, %v4039_v62  ;;  %v4050_v35 = vadd.f32 %v721_v28, %v3690_v8  ;;  %1226 = vadd.xlane.f32.xlu0 %v1225_v60  ;;  %v1262_v49 = vmul.f32 %v1033_v19, %v5230_v44  ;;  %v5231_v28 = vld [vmem:[#allocation30_spill] sm:$0xff] }
 0x1b4   : > { %1374 = vadd.xlane.f32.xlu1 %v1373_v58  ;;  %v723_v61 = vpop.f32.mrf.mxu0  ;;  %v1037_v58 = vadd.f32 %v1036_v22, %v3693_v9  ;;  %v1296_v54 = vmul.f32 %v1039_v24, %v4015_v15  ;;  %v5236_v15 = vld [vmem:[#allocation33_spill] sm:$0xff] }
 0x1b5   : > { %v4053_v53 = vadd.f32 %v723_v61, %v3696_v10  ;;  %v1228_v37 = vadd.f32 %v1140_v6, %v1139_v5  ;;  %v1141_v13 = vmul.f32 %v3865_v1, %v4050_v35  ;;  %v1042_v61 = vpop.f32.mrf.mxu1 }
 0x1b6   : > { %v727_v45 = vpop.f32.mrf.mxu0  ;;  %v1295_v57 = vmul.f32 %v1037_v58, %v4012_v40 }
 0x1b7   : > { %v1142_v41 = vmul.f32 %v3871_v26, %v4053_v53  ;;  %v4062_v36 = vadd.f32 %v727_v45, %v3690_v8  ;;  %1229 = vadd.xlane.f32.xlu0 %v1228_v37  ;;  %v1259_v26 = vmul.f32 %v1025_v34, %v3782_v12  ;;  %v1293_v12 = vmul.f32 %v1031_v38, %v4002_v29  ;;  %v5233_v34 = vld [vmem:[#allocation45_spill] sm:$0xff] }
 0x1b8   : > { %1326 = vadd.xlane.f32.xlu1 %v1325_v21  ;;  %v729_v56 = vpop.f32.mrf.mxu0 }
 0x1b9   : > { %v4065_v14 = vadd.f32 %v729_v56, %v3696_v10  ;;  %v1231_v3 = vadd.f32 %v1142_v41, %v1141_v13  ;;  %v1143_v32 = vmul.f32 %v3881_v52, %v4062_v36  ;;  %v1328_v46 = vadd.f32 %v1260_v43, %v1259_v26  ;;  %v5234_v41 = vld [vmem:[#allocation51_spill] sm:$0xff] }
 0x1ba   : > { %v733_v30 = vpop.f32.mrf.mxu0  ;;  %v1379_v33 = vadd.f32 %v1294_v4, %v1293_v12  ;;  %v1382_v26 = vadd.f32 %v1296_v54, %v1295_v57  ;;  %v1043_v12 = vadd.f32 %v1042_v61, %v3693_v9 }
 0x1bb   : > { %v1144_v1 = vmul.f32 %v3887_v59, %v4065_v14  ;;  %v4076_v18 = vadd.f32 %v733_v30, %v3690_v8  ;;  %1232 = vadd.xlane.f32.xlu0 %v1231_v3  ;;  %v1264_v3 = vmul.f32 %v1039_v24, %v5236_v15 }
 0x1bc   : > { %1377 = vadd.xlane.f32.xlu1 %v1376_v2  ;;  %v735_v20 = vpop.f32.mrf.mxu0  ;;  %v1044_v2 = vpop.f32.mrf.mxu1 }
 0x1bd   : > { %v4079_v50 = vadd.f32 %v735_v20, %v3696_v10  ;;  %v1234_v47 = vadd.f32 %v1144_v1, %v1143_v32  ;;  %v1145_v25 = vmul.f32 %v3897_v27, %v4076_v18  ;;  %v5232_v27 = vld [vmem:[#allocation47_spill] sm:$0xff]  ;;  %v5237_v1 = vld [vmem:[#allocation53_spill] sm:$0xff]  ;;  %v5239_v20 = vld [vmem:[#allocation32_spill] sm:$0xff]  ;;  %v1045_v4 = vadd.f32 %v1044_v2, %v3699_v11 }
 0x1be   : > { %v739_v59 = vpop.f32.mrf.mxu0  ;;  %v1263_v22 = vmul.f32 %v1037_v58, %v5239_v20 }
 0x1bf   : > { %v1146_v52 = vmul.f32 %v3903_v42, %v4079_v50  ;;  %v4088_v16 = vadd.f32 %v739_v59, %v3690_v8  ;;  %1235 = vadd.xlane.f32.xlu0 %v1234_v47  ;;  %v1261_v42 = vmul.f32 %v1031_v38, %v5231_v28  ;;  %v1298_v47 = vmul.f32 %v1045_v4, %v4029_v51 }
 0x1c0   : > { %1329 = vadd.xlane.f32.xlu1 %v1328_v46  ;;  %v741_v55 = vpop.f32.mrf.mxu0  ;;  %v1297_v46 = vmul.f32 %v1043_v12, %v4026_v48 }
 0x1c1   : > { %v4091_v29 = vadd.f32 %v741_v55, %v3696_v10  ;;  %v1237_v31 = vadd.f32 %v1146_v52, %v1145_v25  ;;  %v1147_v6 = vmul.f32 %v5233_v34, %v4088_v16  ;;  %v1331_v21 = vadd.f32 %v1262_v49, %v1261_v42  ;;  %v5240_v55 = vld [vmem:[#allocation35_spill] sm:$0xff]  ;;  %v5241_v49 = vld [vmem:[#allocation34_spill] sm:$0xff]  ;;  %v5243_v34 = vld [vmem:[#allocation36_spill] sm:$0xff] }
 0x1c2   : > { %v745_v17 = vpop.f32.mrf.mxu0  ;;  %v1334_v52 = vadd.f32 %v1264_v3, %v1263_v22  ;;  %v1266_v7 = vmul.f32 %v1045_v4, %v5240_v55  ;;  %v1385_v44 = vadd.f32 %v1298_v47, %v1297_v46  ;;  %v5251_v22 = vld [vmem:[#allocation40_spill] sm:$0xff]  ;;  %v5254_v55 = vld [vmem:[#allocation43_spill] sm:$0xff] }
 0x1c3   : > { %v1148_v60 = vmul.f32 %v5232_v27, %v4091_v29  ;;  %v4102_v39 = vadd.f32 %v745_v17, %v3690_v8  ;;  %1238 = vadd.xlane.f32.xlu0 %v1237_v31  ;;  %v1265_v17 = vmul.f32 %v1043_v12, %v5241_v49  ;;  %v5242_v27 = vld [vmem:[#allocation37_spill] sm:$0xff]  ;;  %v5255_v49 = vld [vmem:[#allocation42_spill] sm:$0xff] }
 0x1c4   : > { %1380 = vadd.xlane.f32.xlu1 %v1379_v33  ;;  %v747_v5 = vpop.f32.mrf.mxu0 }
 0x1c5   : > { %v4105_v63 = vadd.f32 %v747_v5, %v3696_v10  ;;  %v1240_v37 = vadd.f32 %v1148_v60, %v1147_v6  ;;  %v1149_v43 = vmul.f32 %v5235_v23, %v4102_v39  ;;  %v1337_v51 = vadd.f32 %v1266_v7, %v1265_v17 }
 0x1c6   : > { %v751_v45 = vpop.f32.mrf.mxu0 }
 0x1c7   : > { %v1150_v13 = vmul.f32 %v5234_v41, %v4105_v63  ;;  %v4112_v56 = vadd.f32 %v751_v45, %v3690_v8  ;;  %1241 = vadd.xlane.f32.xlu0 %v1240_v37  ;;  %v5238_v8 = vld [vmem:[#allocation55_spill] sm:$0xff] }
 0x1c8   : > { %1332 = vadd.xlane.f32.xlu1 %v1331_v21  ;;  %v753_v30 = vpop.f32.mrf.mxu0  ;;  %v5246_v41 = vld [vmem:[#allocation39_spill] sm:$0xff] }
 0x1c9   : > { %v4117_v40 = vadd.f32 %v753_v30, %v3696_v10  ;;  %v1243_v38 = vadd.f32 %v1150_v13, %v1149_v43  ;;  %v1151_v19 = vmul.f32 %v5237_v1, %v4112_v56  ;;  %v1048_v10 = vpop.f32.mrf.mxu1  ;;  %v5247_v43 = vld [vmem:[#allocation38_spill] sm:$0xff] }
 0x1ca   : > { %v1049_v33 = vadd.f32 %v1048_v10, %v3693_v9 }
 0x1cb   : > { %v1152_v32 = vmul.f32 %v5238_v8, %v4117_v40  ;;  %1244 = vadd.xlane.f32.xlu0 %v1243_v38  ;;  %v1050_v25 = vpop.f32.mrf.mxu1  ;;  %v5250_v8 = vld [vmem:[#allocation41_spill] sm:$0xff] }
 0x1cc   : > { %1383 = vadd.xlane.f32.xlu1 %v1382_v26  ;;  %v1051_v31 = vadd.f32 %v1050_v25, %v3699_v11  ;;  %v1299_v42 = vmul.f32 %v1049_v33, %v4036_v0  ;;  %v1267_v6 = vmul.f32 %v1049_v33, %v5243_v34  ;;  %v5259_v34 = vld [vmem:[#allocation44_spill] sm:$0xff] }
 0x1cd   : > { %v1246_v59 = vadd.f32 %v1152_v32, %v1151_v19  ;;  %v1054_v28 = vpop.f32.mrf.mxu1 }
 0x1ce   : > { %v1300_v48 = vmul.f32 %v1051_v31, %v4039_v62  ;;  %v1268_v60 = vmul.f32 %v1051_v31, %v5242_v27  ;;  %v1055_v5 = vadd.f32 %v1054_v28, %v3693_v9  ;;  %v5258_v27 = vld [vmem:[#allocation46_spill] sm:$0xff] }
 0x1cf   : > { %1247 = vadd.xlane.f32.xlu0 %v1246_v59  ;;  %v1056_v58 = vpop.f32.mrf.mxu1 }
 0x1d0   : > { %1335 = vadd.xlane.f32.xlu1 %v1334_v52  ;;  %v1388_v24 = vadd.f32 %v1300_v48, %v1299_v42  ;;  %v1057_v61 = vadd.f32 %v1056_v58, %v3699_v11  ;;  %v1301_v0 = vmul.f32 %v1055_v5, %v4050_v35  ;;  %v1340_v45 = vadd.f32 %v1268_v60, %v1267_v6 }
 0x1d1   : > { %v1060_v54 = vpop.f32.mrf.mxu1  ;;  %v1269_v30 = vmul.f32 %v1055_v5, %v5247_v43 }
 0x1d2   : > { %v1302_v62 = vmul.f32 %v1057_v61, %v4053_v53  ;;  %v1270_v13 = vmul.f32 %v1057_v61, %v5246_v41  ;;  %v1061_v2 = vadd.f32 %v1060_v54, %v3693_v9 }
 0x1d3   : > { %v1062_v37 = vpop.f32.mrf.mxu1 }
 0x1d4   : > { %1386 = vadd.xlane.f32.xlu1 %v1385_v44  ;;  %v1391_v23 = vadd.f32 %v1302_v62, %v1301_v0  ;;  %v1063_v15 = vadd.f32 %v1062_v37, %v3699_v11  ;;  %v1303_v53 = vmul.f32 %v1061_v2, %v4062_v36  ;;  %v1343_v38 = vadd.f32 %v1270_v13, %v1269_v30  ;;  %v5261_v37 = vld [vmem:[#allocation50_spill] sm:$0xff] }
 0x1d5   : > { %v1066_v35 = vpop.f32.mrf.mxu1  ;;  %v1271_v12 = vmul.f32 %v1061_v2, %v5251_v22 }
 0x1d6   : > { %v1304_v26 = vmul.f32 %v1063_v15, %v4065_v14  ;;  %v1272_v32 = vmul.f32 %v1063_v15, %v5250_v8  ;;  %v1067_v4 = vadd.f32 %v1066_v35, %v3693_v9  ;;  %v5266_v8 = vld [vmem:[#allocation52_spill] sm:$0xff] }
 0x1d7   : > { %v1068_v19 = vpop.f32.mrf.mxu1 }
 0x1d8   : > { %1338 = vadd.xlane.f32.xlu1 %v1337_v51  ;;  %v1394_v20 = vadd.f32 %v1304_v26, %v1303_v53  ;;  %v1069_v10 = vadd.f32 %v1068_v19, %v3699_v11  ;;  %v1305_v14 = vmul.f32 %v1067_v4, %v4076_v18  ;;  %v1346_v47 = vadd.f32 %v1272_v32, %v1271_v12  ;;  %v5264_v53 = vld [vmem:[#allocation54_spill] sm:$0xff] }
 0x1d9   : > { %v1072_v36 = vpop.f32.mrf.mxu1  ;;  %v1273_v17 = vmul.f32 %v1067_v4, %v5255_v49 }
 0x1da   : > { %v1306_v46 = vmul.f32 %v1069_v10, %v4079_v50  ;;  %v1274_v7 = vmul.f32 %v1069_v10, %v5254_v55  ;;  %v1073_v33 = vadd.f32 %v1072_v36, %v3693_v9 }
 0x1db   : > { %v1074_v25 = vpop.f32.mrf.mxu1 }
 0x1dc   : > { %1389 = vadd.xlane.f32.xlu1 %v1388_v24  ;;  %v4139_v57 = vpop.xlane.xlu0 %1154  ;;  %v1397_v44 = vadd.f32 %v1306_v46, %v1305_v14  ;;  %v1075_v31 = vadd.f32 %v1074_v25, %v3699_v11  ;;  %v1307_v50 = vmul.f32 %v1073_v33, %v4088_v16  ;;  %v1349_v48 = vadd.f32 %v1274_v7, %v1273_v17 }
 0x1dd   : > { %5244 = vst [vmem:[#allocation31_spill] sm:$0xff] %v4139_v57  ;;  %v1078_v18 = vpop.f32.mrf.mxu1  ;;  %v1275_v6 = vmul.f32 %v1073_v33, %v5259_v34 }
 0x1de   : > { %v1308_v42 = vmul.f32 %v1075_v31, %v4091_v29  ;;  %v1276_v60 = vmul.f32 %v1075_v31, %v5258_v27  ;;  %v1079_v5 = vadd.f32 %v1078_v18, %v3693_v9 }
 0x1df   : > { %v1080_v51 = vpop.f32.mrf.mxu1 }
 0x1e0   : > { %1341 = vadd.xlane.f32.xlu1 %v1340_v45  ;;  %v4143_v21 = vpop.xlane.xlu0 %1157  ;;  %v1400_v24 = vadd.f32 %v1308_v42, %v1307_v50  ;;  %v1081_v61 = vadd.f32 %v1080_v51, %v3699_v11  ;;  %v1309_v16 = vmul.f32 %v1079_v5, %v4102_v39  ;;  %v1352_v0 = vadd.f32 %v1276_v60, %v1275_v6 }
 0x1e1   : > { %5245 = vst [vmem:[#allocation30_spill] sm:$0xff] %v4143_v21  ;;  %v1084_v54 = vpop.f32.mrf.mxu1  ;;  %v5282_v6 = vlaneseq }
 0x1e2   : > { %v1310_v29 = vmul.f32 %v1081_v61, %v4105_v63  ;;  %v1278_v41 = vmul.f32 %v1081_v61, %v5261_v37  ;;  %v1085_v30 = vadd.f32 %v1084_v54, %v3693_v9 }
 0x1e3   : > { %v1086_v45 = vpop.f32.mrf.mxu1 }
 0x1e4   : > { %1392 = vadd.xlane.f32.xlu1 %v1391_v23  ;;  %v4149_v3 = vpop.xlane.xlu0 %1160  ;;  %v1403_v13 = vadd.f32 %v1310_v29, %v1309_v16  ;;  %v5262_v23 = vld [vmem:[#allocation48_spill] sm:$0xff]  ;;  %v1087_v2 = vadd.f32 %v1086_v45, %v3699_v11  ;;  %v1311_v39 = vmul.f32 %v1085_v30, %v4112_v56  ;;  %v1279_v32 = vmul.f32 %v1085_v30, %v5266_v8 }
 0x1e5   : > { %5248 = vst [vmem:[#allocation47_spill] sm:$0xff] %v4149_v3  ;;  %v1277_v43 = vmul.f32 %v1079_v5, %v5262_v23  ;;  %v4254_v5 = vand.u32 127, %v5282_v6  ;;  %v5286_v23 = vld [vmem:[#allocation27_spill] sm:$0xff] }
 0x1e6   : > { %v1312_v63 = vmul.f32 %v1087_v2, %v4117_v40  ;;  %v1280_v26 = vmul.f32 %v1087_v2, %v5264_v53 }
 0x1e7   : > { %v1355_v35 = vadd.f32 %v1278_v41, %v1277_v43  ;;  %v1447_v54 = vadd.s32 4294967288, %v4254_v5  ;;  %v1454_v29 = vadd.s32 4294967280, %v4254_v5  ;;  %v1468_v45 = vadd.s32 4294967264, %v4254_v5 }
 0x1e8   : > { %1344 = vadd.xlane.f32.xlu1 %v1343_v38  ;;  %v4153_v1 = vpop.xlane.xlu0 %1163  ;;  %v1406_v38 = vadd.f32 %v1312_v63, %v1311_v39  ;;  %v1358_v9 = vadd.f32 %v1280_v26, %v1279_v32  ;;  %v1475_v41 = vadd.s32 4294967256, %v4254_v5  ;;  %v4270_v43 = vsub.s32 %v4254_v5, %v5286_v23 }
 0x1e9   : > { %5249 = vst [vmem:[#allocation45_spill] sm:$0xff] %v4153_v1  ;;  %v4273_v30 = vsub.s32 %v1447_v54, %v5286_v23  ;;  %v1489_v2 = vadd.s32 4294967240, %v4254_v5  ;;  %v4277_v39 = vsub.s32 %v1454_v29, %v5286_v23  ;;  %v4284_v53 = vsub.s32 %v1468_v45, %v5286_v23 }
 0x1ea   : > { %5287 = vst [vmem:[#allocation27_spill] sm:$0xff] %v4270_v43  ;;  %v1503_v26 = vadd.s32 4294967224, %v4254_v5  ;;  %v4292_v32 = vsub.s32 %v1475_v41, %v5286_v23  ;;  %v1510_v29 = vadd.s32 4294967216, %v4254_v5 }
 0x1eb   : > { %5288 = vst [vmem:[#allocation59_spill] sm:$0xff] %v4273_v30  ;;  %5289 = vst [vmem:[#allocation60_spill] sm:$0xff] %v4277_v39  ;;  %v4302_v54 = vsub.s32 %v1489_v2, %v5286_v23 }
 0x1ec   : > { %1395 = vadd.xlane.f32.xlu1 %v1394_v20  ;;  %v4159_v59 = vpop.xlane.xlu0 %1166  ;;  %5291 = vst [vmem:[#allocation62_spill] sm:$0xff] %v4284_v53  ;;  %5293 = vst [vmem:[#allocation64_spill] sm:$0xff] %v4292_v32  ;;  %v4317_v2 = vsub.s32 %v1503_v26, %v5286_v23  ;;  %v1524_v26 = vadd.s32 4294967200, %v4254_v5 }
 0x1ed   : > { %5252 = vst [vmem:[#allocation51_spill] sm:$0xff] %v4159_v59  ;;  %5296 = vst [vmem:[#allocation67_spill] sm:$0xff] %v4302_v54 }
 0x1ee   : > { %5298 = vst [vmem:[#allocation69_spill] sm:$0xff] %v4317_v2 }
 0x1f0   : > { %1347 = vadd.xlane.f32.xlu1 %v1346_v47  ;;  %v4163_v52 = vpop.xlane.xlu0 %1169 }
 0x1f1   : > { %5253 = vst [vmem:[#allocation49_spill] sm:$0xff] %v4163_v52 }
 0x1f4   : > { %1398 = vadd.xlane.f32.xlu1 %v1397_v44  ;;  %v4169_v28 = vpop.xlane.xlu0 %1172 }
 0x1f5   : > { %5256 = vst [vmem:[#allocation33_spill] sm:$0xff] %v4169_v28 }
 0x1f8   : > { %1350 = vadd.xlane.f32.xlu1 %v1349_v48  ;;  %v4173_v58 = vpop.xlane.xlu0 %1175 }
 0x1f9   : > { %5257 = vst [vmem:[#allocation53_spill] sm:$0xff] %v4173_v58 }
 0x1fc   : > { %1401 = vadd.xlane.f32.xlu1 %v1400_v24  ;;  %v4181_v62 = vpop.xlane.xlu0 %1178 }
 0x1fd   : > { %5260 = vst [vmem:[#allocation55_spill] sm:$0xff] %v4181_v62 }
 0x200   : > { %1353 = vadd.xlane.f32.xlu1 %v1352_v0  ;;  %v4187_v15 = vpop.xlane.xlu0 %1181  ;;  %v1461_v0 = vadd.s32 4294967272, %v4254_v5 }
 0x201   : > { %5263 = vst [vmem:[#allocation32_spill] sm:$0xff] %v4187_v15 }
 0x202   : > { %v4280_v63 = vsub.s32 %v1461_v0, %v5286_v23  ;;  %v1451_v0 = vrot.slane %v4143_v21, %v4273_v30 }
 0x204   : > { %1404 = vadd.xlane.f32.xlu1 %v1403_v13  ;;  %v4192_v19 = vpop.xlane.xlu0 %1184  ;;  %v1482_v13 = vadd.s32 4294967248, %v4254_v5  ;;  %5290 = vst [vmem:[#allocation61_spill] sm:$0xff] %v4280_v63  ;;  %v1465_v21 = vrot.slane %v4153_v1, %v4280_v63 }
 0x205   : > { %5265 = vst [vmem:[#allocation35_spill] sm:$0xff] %v4192_v19 }
 0x208   : > { %1356 = vadd.xlane.f32.xlu1 %v1355_v35  ;;  %v4195_v11 = vpop.xlane.xlu0 %1187  ;;  %v1496_v35 = vadd.s32 4294967232, %v4254_v5 }
 0x209   : > { %5267 = vst [vmem:[#allocation34_spill] sm:$0xff] %v4195_v11 }
 0x20a   : > { %v4308_v45 = vsub.s32 %v1496_v35, %v5286_v23  ;;  %v1446_v35 = vrot.slane %v4139_v57, %v4270_v43  ;;  %v1531_v57 = vadd.s32 4294967192, %v4254_v5 }
 0x20c   : > { %1407 = vadd.xlane.f32.xlu1 %v1406_v38  ;;  %v4197_v20 = vpop.xlane.xlu0 %1190  ;;  %5297 = vst [vmem:[#allocation68_spill] sm:$0xff] %v4308_v45 }
 0x20d   : > { %5268 = vst [vmem:[#allocation37_spill] sm:$0xff] %v4197_v20 }
 0x210   : > { %1359 = vadd.xlane.f32.xlu1 %v1358_v9  ;;  %v4199_v22 = vpop.xlane.xlu0 %1193  ;;  %v4295_v9 = vsub.s32 %v1482_v13, %v5286_v23 }
 0x211   : > { %5269 = vst [vmem:[#allocation36_spill] sm:$0xff] %v4199_v22 }
 0x212   : > { %5294 = vst [vmem:[#allocation65_spill] sm:$0xff] %v4295_v9 }
 0x214   : > { %v4205_v12 = vpop.xlane.xlu0 %1196 }
 0x215   : > { %5270 = vst [vmem:[#allocation39_spill] sm:$0xff] %v4205_v12 }
 0x218   : > { %v4209_v10 = vpop.xlane.xlu0 %1199 }
 0x21c   : > { %v4215_v46 = vpop.xlane.xlu0 %1202 }
 0x21d   : > { %v4201_v56 = vpop.xlane.xlu1 %1362 }
 0x220   : > { %v4219_v25 = vpop.xlane.xlu0 %1314 }
 0x221   : > { %v4203_v40 = vpop.xlane.xlu1 %1365 }
 0x224   : > { %v4225_v44 = vpop.xlane.xlu0 %1208 }
 0x225   : > { %v4207_v4 = vpop.xlane.xlu1 %1205  ;;  %5273 = vst [vmem:[#allocation40_spill] sm:$0xff] %v4225_v44 }
 0x228   : > { %v4229_v17 = vpop.xlane.xlu0 %1211 }
 0x229   : > { %v4211_v36 = vpop.xlane.xlu1 %1317  ;;  %5274 = vst [vmem:[#allocation43_spill] sm:$0xff] %v4229_v17 }
 0x22c   : > { %v4235_v18 = vpop.xlane.xlu0 %1214 }
 0x22d   : > { %v4213_v14 = vpop.xlane.xlu1 %1368  ;;  %5275 = vst [vmem:[#allocation42_spill] sm:$0xff] %v4235_v18 }
 0x230   : > { %v4239_v42 = vpop.xlane.xlu0 %1217 }
 0x231   : > { %v4217_v47 = vpop.xlane.xlu1 %1320  ;;  %5276 = vst [vmem:[#allocation46_spill] sm:$0xff] %v4239_v42 }
 0x234   : > { %v4245_v27 = vpop.xlane.xlu0 %1220 }
 0x235   : > { %v4221_v55 = vpop.xlane.xlu1 %1371  ;;  %5278 = vst [vmem:[#allocation50_spill] sm:$0xff] %v4245_v27 }
 0x236   : > { %5271 = vst [vmem:[#allocation38_spill] sm:$0xff] %v4221_v55 }
 0x238   : > { %v4249_v24 = vpop.xlane.xlu0 %1223 }
 0x239   : > { %v4223_v7 = vpop.xlane.xlu1 %1323  ;;  %5280 = vst [vmem:[#allocation54_spill] sm:$0xff] %v4249_v24 }
 0x23a   : > { %5272 = vst [vmem:[#allocation41_spill] sm:$0xff] %v4223_v7 }
 0x23c   : > { %v4259_v16 = vpop.xlane.xlu0 %1226 }
 0x23d   : > { %v4227_v49 = vpop.xlane.xlu1 %1374  ;;  %5284 = vst [vmem:[#allocation57_spill] sm:$0xff] %v4259_v16 }
 0x240   : > { %v4287_v38 = vpop.xlane.xlu0 %1229 }
 0x241   : > { %v4231_v33 = vpop.xlane.xlu1 %1326 }
 0x244   : > { %v4340_v1 = vpop.xlane.xlu0 %1232 }
 0x245   : > { %v4233_v31 = vpop.xlane.xlu1 %1377 }
 0x249   : > { %v4237_v50 = vpop.xlane.xlu1 %1329 }
 0x24d   : > { %v4241_v48 = vpop.xlane.xlu1 %1380 }
 0x251   : > { %v4243_v51 = vpop.xlane.xlu1 %1332 }
 0x252   : > { %5277 = vst [vmem:[#allocation44_spill] sm:$0xff] %v4243_v51 }
 0x255   : > { %v4247_v60 = vpop.xlane.xlu1 %1383 }
 0x256   : > { %5279 = vst [vmem:[#allocation48_spill] sm:$0xff] %v4247_v60 }
 0x259   : > { %v4251_v34 = vpop.xlane.xlu1 %1335 }
 0x25a   : > { %5281 = vst [vmem:[#allocation52_spill] sm:$0xff] %v4251_v34 }
 0x25d   : > { %v4256_v61 = vpop.xlane.xlu1 %1386 }
 0x25e   : > { %5283 = vst [vmem:[#allocation56_spill] sm:$0xff] %v4256_v61  ;;  %v1517_v61 = vadd.s32 4294967208, %v4254_v5 }
 0x261   : > { %v4264_v37 = vpop.xlane.xlu1 %1338 }
 0x262   : > { %5285 = vst [vmem:[#allocation58_spill] sm:$0xff] %v4264_v37  ;;  %v1458_v37 = vrot.slane %v4149_v3, %v4277_v39  ;;  %v4329_v3 = vsub.s32 %v1510_v29, %v5286_v23 }
 0x264   : > { %5300 = vst [vmem:[#allocation71_spill] sm:$0xff] %v4329_v3 }
 0x265   : > { %v4289_v8 = vpop.xlane.xlu1 %1389 }
 0x266   : > { %5292 = vst [vmem:[#allocation63_spill] sm:$0xff] %v4289_v8  ;;  %v4299_v6 = vmax.f32 %v4287_v38, %v4289_v8 }
 0x268   : > { %5295 = vst [vmem:[#allocation66_spill] sm:$0xff] %v4299_v6  ;;  %v1887_v41 = vsub.f32 %v4287_v38, %v4299_v6  ;;  %v1983_v13 = vsub.f32 %v4289_v8, %v4299_v6  ;;  %v1472_v6 = vrot.slane %v4159_v59, %v4284_v53  ;;  %v1453_v8 = vsel %vm1452_vm0, %v1451_v0, %v1446_v35 }
 0x269   : > { %v4320_v34 = vpop.xlane.xlu1 %1341  ;;  %v1538_v59 = vadd.s32 4294967184, %v4254_v5  ;;  %v1493_v35 = vrot.slane %v4173_v58, %v4302_v54 }
 0x26a   : > { %5299 = vst [vmem:[#allocation70_spill] sm:$0xff] %v4320_v34  ;;  %v1944_v60 = vmul.f32 1.442695, %v1887_v41  ;;  %v2040_v51 = vmul.f32 1.442695, %v1983_v13  ;;  %v1479_v34 = vrot.slane %v4163_v52, %v4292_v32  ;;  %v1460_v41 = vsel %vm1459_vm1, %v1458_v37, %v1453_v8 }
 0x26b   : > { %v1486_v13 = vrot.slane %v4169_v28, %v4295_v9  ;;  %v1467_v0 = vsel %vm1466_vm2, %v1465_v21, %v1460_v41  ;;  %v4348_v52 = vsub.s32 %v1517_v61, %v5286_v23  ;;  %v1500_v8 = vrot.slane %v4181_v62, %v4308_v45 }
 0x26c   : > { %2982 = vpow2.f32 %v1944_v60  ;;  %v1474_v37 = vsel %vm1473_vm3, %v1472_v6, %v1467_v0  ;;  %v1507_v41 = vrot.slane %v4187_v15, %v4317_v2  ;;  %v1514_v0 = vrot.slane %v4192_v19, %v4329_v3 }
 0x26d   : > { %2984 = vpow2.f32 %v2040_v51  ;;  %v4342_v29 = vpop.xlane.xlu1 %1392  ;;  %5301 = vst [vmem:[#allocation72_spill] sm:$0xff] %v4348_v52  ;;  %v4358_v51 = vsub.s32 %v1524_v26, %v5286_v23  ;;  %v1481_v21 = vsel %vm1480_vm4, %v1479_v34, %v1474_v37  ;;  %v4371_v62 = vsub.s32 %v1531_v57, %v5286_v23 }
 0x26e   : > { %v4352_v60 = vmax.f32 %v4340_v1, %v4342_v29  ;;  %v1488_v6 = vsel %vm1487_vm5, %v1486_v13, %v1481_v21  ;;  %v4374_v26 = vsub.s32 %v1538_v59, %v5286_v23  ;;  %v1521_v15 = vrot.slane %v4195_v11, %v4348_v52 }
 0x26f   : > { %5303 = vst [vmem:[#allocation74_spill] sm:$0xff] %v4358_v51  ;;  %5304 = vst [vmem:[#allocation75_spill] sm:$0xff] %v4371_v62  ;;  %v1495_v37 = vsel %vm1494_vm6, %v1493_v35, %v1488_v6  ;;  %v1528_v57 = vrot.slane %v4197_v20, %v4358_v51  ;;  %v1559_v59 = vrot.slane %v4207_v4, %v4273_v30 }
 0x270   : > { %5302 = vst [vmem:[#allocation73_spill] sm:$0xff] %v4352_v60  ;;  %v1888_v61 = vsub.f32 %v4340_v1, %v4352_v60  ;;  %v1984_v58 = vsub.f32 %v4342_v29, %v4352_v60  ;;  %5305 = vst [vmem:[#allocation76_spill] sm:$0xff] %v4374_v26  ;;  %v1502_v13 = vsel %vm1501_vm7, %v1500_v8, %v1495_v37  ;;  %v4391_v8 = vpop.xlane.xlu0 %1235 }
 0x271   : > { %v4376_v34 = vpop.xlane.xlu1 %1344  ;;  %v1509_v21 = vsel %vm1508_vm8, %v1507_v41, %v1502_v13  ;;  %v1542_v41 = vrot.slane %v4205_v12, %v4374_v26 }
 0x272   : > { %v1946_v28 = vmul.f32 1.442695, %v1888_v61  ;;  %v2042_v60 = vmul.f32 1.442695, %v1984_v58  ;;  %v1516_v35 = vsel %vm1515_vm9, %v1514_v0, %v1509_v21  ;;  %v1535_v61 = vrot.slane %v4199_v22, %v4371_v62 }
 0x273   : > { %v1545_v58 = vadd.s32 4294967176, %v4254_v5  ;;  %v1523_v37 = vsel %vm1522_vm10, %v1521_v15, %v1516_v35  ;;  %v1564_v5 = vrot.slane %v4225_v44, %v4277_v39  ;;  %v1569_v15 = vrot.slane %v4229_v17, %v4280_v63 }
 0x274   : > { %2986 = vpow2.f32 %v1946_v28  ;;  %v1555_v28 = vrot.slane %v4215_v46, %v4270_v43  ;;  %v1530_v13 = vsel %vm1529_vm11, %v1528_v57, %v1523_v37  ;;  %v1574_v57 = vrot.slane %v4235_v18, %v4284_v53 }
 0x275   : > { %2988 = vpow2.f32 %v2042_v60  ;;  %v4393_v6 = vpop.xlane.xlu1 %1395  ;;  %v1537_v22 = vsel %vm1536_vm12, %v1535_v61, %v1530_v13  ;;  %v1751_v17 = vrot.slane %v4203_v40, %v4273_v30  ;;  %v1579_v61 = vrot.slane %v4239_v42, %v4292_v32 }
 0x276   : > { %v4402_v0 = vmax.f32 %v4391_v8, %v4393_v6  ;;  %v1560_v60 = vsel %vm1452_vm0, %v1559_v59, %v1555_v28  ;;  %v4420_v59 = vsel %vm1543_vm13, %v1542_v41, %v1537_v22  ;;  %v4423_v28 = vsub.s32 %v1545_v58, %v5286_v23  ;;  %v4435_v58 = vpop.xlane.xlu0 %1238 }
 0x277   : > { %v1565_v44 = vsel %vm1459_vm1, %v1564_v5, %v1560_v60  ;;  %v1747_v18 = vrot.slane %v4201_v56, %v4270_v43  ;;  %v1672_v22 = vrot.slane %v4211_v36, %v4273_v30  ;;  %v1756_v41 = vrot.slane %v4213_v14, %v4277_v39 }
 0x278   : > { %v1889_v21 = vsub.f32 %v4391_v8, %v4402_v0  ;;  %v1985_v35 = vsub.f32 %v4393_v6, %v4402_v0  ;;  %5306 = vst [vmem:[#allocation77_spill] sm:$0xff] %v4423_v28  ;;  %v1570_v23 = vsel %vm1466_vm2, %v1569_v15, %v1565_v44  ;;  %v1584_v60 = vrot.slane %v4245_v27, %v4295_v9 }
 0x279   : > { %v2983_v12 = vpop.eup %2982  ;;  %v4417_v37 = vpop.xlane.xlu1 %1347  ;;  %v1575_v5 = vsel %vm1473_vm3, %v1574_v57, %v1570_v23  ;;  %v1589_v44 = vrot.slane %v4249_v24, %v4302_v54  ;;  %v1752_v15 = vsel %vm1452_vm0, %v1751_v17, %v1747_v18  ;;  %v1682_v57 = vrot.slane %v4223_v7, %v4280_v63 }
 0x27a   : > { %v2985_v20 = vpop.eup %2984  ;;  %v1948_v11 = vmul.f32 1.442695, %v1889_v21  ;;  %v2044_v19 = vmul.f32 1.442695, %v1985_v35  ;;  %v1668_v21 = vrot.slane %v4219_v25, %v4270_v43  ;;  %v1761_v35 = vrot.slane %v4221_v55, %v4280_v63  ;;  %v1242_v27 = vpop.xlane.xlu0 %1241 }
 0x27b   : > { %v2079_v13 = vadd.f32 %v2985_v20, %v2983_v12  ;;  %v1677_v12 = vrot.slane %v4217_v47, %v4277_v39  ;;  %v1594_v23 = vrot.slane %v4259_v16, %v4308_v45  ;;  %v1766_v55 = vrot.slane %v4227_v49, %v4284_v53 }
 0x27c   : > { %2990 = vpow2.f32 %v1948_v11 }
 0x27d   : > { %2992 = vpow2.f32 %v2044_v19  ;;  %v4442_v20 = vpop.xlane.xlu1 %1398  ;;  %v1580_v19 = vsel %vm1480_vm4, %v1579_v61, %v1575_v5  ;;  %v1673_v61 = vsel %vm1452_vm0, %v1672_v22, %v1668_v21  ;;  %v1757_v5 = vsel %vm1459_vm1, %v1756_v41, %v1752_v15 }
 0x27e   : > { %v4450_v11 = vmax.f32 %v4435_v58, %v4442_v20  ;;  %2994 = vlog2.f32 %v2079_v13  ;;  %v1549_v13 = vrot.slane %v4209_v10, %v4423_v28  ;;  %v1585_v43 = vsel %vm1487_vm5, %v1584_v60, %v1580_v19 }
 0x27f   : > { %v1678_v16 = vsel %vm1459_vm1, %v1677_v12, %v1673_v61  ;;  %v1590_v24 = vsel %vm1494_vm6, %v1589_v44, %v1585_v43  ;;  %v1687_v22 = vrot.slane %v4231_v33, %v4284_v53  ;;  %v1599_v41 = vrot.slane %v4287_v38, %v4317_v2  ;;  %v5315_v53 = vld [vmem:[#allocation70_spill] sm:$0xff] }
 0x280   : > { %v1890_v39 = vsub.f32 %v4435_v58, %v4450_v11  ;;  %v1986_v17 = vsub.f32 %v4442_v20, %v4450_v11  ;;  %v1762_v15 = vsel %vm1466_vm2, %v1761_v35, %v1757_v5  ;;  %v1683_v21 = vsel %vm1466_vm2, %v1682_v57, %v1678_v16  ;;  %v5307_v35 = vld [vmem:[#allocation44_spill] sm:$0xff] }
 0x281   : > { %v2987_v18 = vpop.eup %2986  ;;  %v4471_v63 = vpop.xlane.xlu1 %1350  ;;  %v1595_v12 = vsel %vm1501_vm7, %v1594_v23, %v1590_v24  ;;  %v1771_v43 = vrot.slane %v4233_v31, %v4292_v32  ;;  %v1692_v44 = vrot.slane %v4237_v50, %v4292_v32  ;;  %v1776_v16 = vrot.slane %v4241_v48, %v4295_v9 }
 0x282   : > { %v2989_v30 = vpop.eup %2988  ;;  %v1950_v42 = vmul.f32 1.442695, %v1890_v39  ;;  %v2046_v7 = vmul.f32 1.442695, %v1986_v17  ;;  %v1604_v39 = vrot.slane %v4340_v1, %v4329_v3  ;;  %v1767_v24 = vsel %vm1473_vm3, %v1766_v55, %v1762_v15  ;;  %v4507_v23 = vpop.xlane.xlu0 %1244 }
 0x283   : > { %v2080_v60 = vadd.f32 %v2989_v30, %v2987_v18  ;;  %v1609_v30 = vrot.slane %v4391_v8, %v4348_v52  ;;  %v1688_v1 = vsel %vm1473_vm3, %v1687_v22, %v1683_v21  ;;  %v1600_v38 = vsel %vm1508_vm8, %v1599_v41, %v1595_v12 }
 0x284   : > { %2996 = vpow2.f32 %v1950_v42  ;;  %v1697_v57 = vrot.slane %v5307_v35, %v4295_v9  ;;  %v1619_v8 = vrot.slane %v1242_v27, %v4371_v62  ;;  %v4514_v61 = vsel %vm1550_vm14, %v1549_v13, %v4420_v59  ;;  %v5308_v59 = vld [vmem:[#allocation48_spill] sm:$0xff] }
 0x285   : > { %2998 = vpow2.f32 %v2046_v7  ;;  %v4490_v19 = vpop.xlane.xlu1 %1401  ;;  %v1614_v7 = vrot.slane %v4435_v58, %v4358_v51  ;;  %v1772_v5 = vsel %vm1480_vm4, %v1771_v43, %v1767_v24  ;;  %v1605_v58 = vsel %vm1515_vm9, %v1604_v39, %v1600_v38  ;;  %v5309_v43 = vld [vmem:[#allocation52_spill] sm:$0xff] }
 0x286   : > { %v4497_v42 = vmax.f32 %v1242_v27, %v4490_v19  ;;  %3000 = vlog2.f32 %v2080_v60  ;;  %v1693_v22 = vsel %vm1480_vm4, %v1692_v44, %v1688_v1  ;;  %v1610_v15 = vsel %vm1522_vm10, %v1609_v30, %v1605_v58  ;;  %v5310_v38 = vld [vmem:[#allocation56_spill] sm:$0xff]  ;;  %v4536_v58 = vpop.xlane.xlu0 %1247 }
 0x287   : > { %v1615_v32 = vsel %vm1529_vm11, %v1614_v7, %v1610_v15  ;;  %v1781_v13 = vrot.slane %v5308_v59, %v4302_v54  ;;  %v1702_v39 = vrot.slane %v5309_v43, %v4302_v54  ;;  %v1698_v44 = vsel %vm1487_vm5, %v1697_v57, %v1693_v22  ;;  %v5311_v7 = vld [vmem:[#allocation58_spill] sm:$0xff] }
 0x288   : > { %v1891_v17 = vsub.f32 %v1242_v27, %v4497_v42  ;;  %v1987_v18 = vsub.f32 %v4490_v19, %v4497_v42  ;;  %v1777_v27 = vsel %vm1487_vm5, %v1776_v16, %v1772_v5  ;;  %v1620_v1 = vsel %vm1536_vm12, %v1619_v8, %v1615_v32 }
 0x289   : > { %v2991_v55 = vpop.eup %2990  ;;  %v4519_v41 = vpop.xlane.xlu1 %1353  ;;  %v1624_v16 = vrot.slane %v4507_v23, %v4374_v26  ;;  %v1782_v22 = vsel %vm1494_vm6, %v1781_v13, %v1777_v27  ;;  %v1796_v15 = vrot.slane %v4342_v29, %v4329_v3  ;;  %v1629_v27 = vrot.slane %v4536_v58, %v4423_v28 }
 0x28a   : > { %v2993_v60 = vpop.eup %2992  ;;  %v1952_v21 = vmul.f32 1.442695, %v1891_v17  ;;  %v2048_v12 = vmul.f32 1.442695, %v1987_v18  ;;  %v1786_v17 = vrot.slane %v5310_v38, %v4308_v45  ;;  %v1707_v18 = vrot.slane %v5311_v7, %v4308_v45 }
 0x28b   : > { %v2995_v9 = vpop.eup %2994  ;;  %v2081_v24 = vadd.f32 %v2993_v60, %v2991_v55  ;;  %v5312_v55 = vld [vmem:[#allocation63_spill] sm:$0xff]  ;;  %v1703_v60 = vsel %vm1494_vm6, %v1702_v39, %v1698_v44  ;;  %v3335_v45 = vmov 0  }
 0x28c   : > { %3002 = vpow2.f32 %v1952_v21  ;;  %v2137_v30 = vmul.f32 0.6931472, %v2995_v9  ;;  %v1791_v57 = vrot.slane %v5312_v55, %v4317_v2  ;;  %v5313_v9 = vld [vmem:[#allocation66_spill] sm:$0xff]  ;;  %v1801_v21 = vrot.slane %v4393_v6, %v4348_v52  ;;  %2981 = vset.pattern.permute.xlu1 %v3335_v45  ;;  %2980 = vset.pattern.permute.xlu0 %v3335_v45 }
 0x28d   : > { %3004 = vpow2.f32 %v2048_v12  ;;  %v1405_v5 = vpop.xlane.xlu1 %1404  ;;  %v1708_v13 = vsel %vm1501_vm7, %v1707_v18, %v1703_v60  ;;  %v1787_v29 = vsel %vm1501_vm7, %v1786_v17, %v1782_v22  ;;  %v1806_v6 = vrot.slane %v4442_v20, %v4358_v51 }
 0x28e   : > { %v4541_v32 = vmax.f32 %v4507_v23, %v1405_v5  ;;  %v4544_v8 = vadd.f32 %v2137_v30, %v5313_v9  ;;  %3006 = vlog2.f32 %v2081_v24  ;;  %v1792_v44 = vsel %vm1508_vm8, %v1791_v57, %v1787_v29 }
 0x28f   : > { %v1811_v45 = vrot.slane %v4490_v19, %v4371_v62  ;;  %v1712_v18 = vrot.slane %v5315_v53, %v4317_v2  ;;  %v1797_v17 = vsel %vm1515_vm9, %v1796_v15, %v1792_v44  ;;  %v1816_v22 = vrot.slane %v1405_v5, %v4374_v26 }
 0x290   : > { %5314 = vst [vmem:[#allocation44_spill] sm:$0xff] %v4544_v8  ;;  %v1892_v12 = vsub.f32 %v4507_v23, %v4541_v32  ;;  %v1988_v55 = vsub.f32 %v1405_v5, %v4541_v32  ;;  %v1717_v20 = vrot.slane %v4376_v34, %v4329_v3  ;;  %v1802_v8 = vsel %vm1522_vm10, %v1801_v21, %v1797_v17  ;;  %v5316_v21 = vld [vmem:[#allocation73_spill] sm:$0xff] }
 0x291   : > { %v2997_v24 = vpop.eup %2996  ;;  %v4561_v39 = vpop.xlane.xlu1 %1356  ;;  %v1722_v19 = vrot.slane %v4417_v37, %v4348_v52  ;;  %v5345_v52 = vld [vmem:[#allocation34_spill] sm:$0xff] }
 0x292   : > { %v2999_v23 = vpop.eup %2998  ;;  %v1954_v30 = vmul.f32 1.442695, %v1892_v12  ;;  %v2050_v9 = vmul.f32 1.442695, %v1988_v55  ;;  %v1807_v12 = vsel %vm1529_vm11, %v1806_v6, %v1802_v8  ;;  %v1727_v55 = vrot.slane %v4471_v63, %v4358_v51 }
 0x293   : > { %v3001_v54 = vpop.eup %3000  ;;  %v2082_v60 = vadd.f32 %v2999_v23, %v2997_v24  ;;  %v1812_v5 = vsel %vm1536_vm12, %v1811_v45, %v1807_v12  ;;  %v1713_v23 = vsel %vm1508_vm8, %v1712_v18, %v1708_v13  ;;  %v1732_v8 = vrot.slane %v4519_v41, %v4371_v62 }
 0x294   : > { %3008 = vpow2.f32 %v1954_v30  ;;  %v2139_v57 = vmul.f32 0.6931472, %v3001_v54  ;;  %v1625_v54 = vsel %vm1543_vm13, %v1624_v16, %v1620_v1  ;;  %v1817_v6 = vsel %vm1543_vm13, %v1816_v22, %v1812_v5  ;;  %v5318_v22 = vld [vmem:[#allocation28_spill] sm:$0xff] }
 0x295   : > { %3010 = vpow2.f32 %v2050_v9  ;;  %v4579_v15 = vpop.xlane.xlu1 %1407  ;;  %v1630_v44 = vsel %vm1550_vm14, %v1629_v27, %v1625_v54  ;;  %v1718_v45 = vsel %vm1515_vm9, %v1717_v20, %v1713_v23  ;;  %v1737_v30 = vrot.slane %v4561_v39, %v4374_v26  ;;  %v5319_v54 = vld [vmem:[#allocation29_spill] sm:$0xff] }
 0x296   : > { %v1821_v24 = vrot.slane %v4579_v15, %v4423_v28  ;;  %v4585_v29 = vadd.f32 %v2139_v57, %v5316_v21  ;;  %3012 = vlog2.f32 %v2082_v60  ;;  %v1723_v60 = vsel %vm1522_vm10, %v1722_v19, %v1718_v45 }
 0x297   : > { %v1728_v27 = vsel %vm1529_vm11, %v1727_v55, %v1723_v60 }
 0x298   : > { %5317 = vst [vmem:[#allocation48_spill] sm:$0xff] %v4585_v29  ;;  %v1822_v9 = vsel %vm1550_vm14, %v1821_v24, %v1817_v6  ;;  %v1733_v19 = vsel %vm1536_vm12, %v1732_v8, %v1728_v27 }
 0x299   : > { %v3003_v17 = vpop.eup %3002  ;;  %v1827_v1 = vsel %vm1825_vm15, %v1630_v44, %v1822_v9  ;;  %v2182_v16 = vsel %vm1825_vm15, %v4514_v61, %v1822_v9  ;;  %v4601_v13 = vpop.xlane.xlu1 %1359  ;;  %v1738_v5 = vsel %vm1543_vm13, %v1737_v30, %v1733_v19 }
 0x29a   : > { %v3005_v18 = vpop.eup %3004  ;;  %1829 = vst [vmem:[%s4604_s22 + $0x2] sm:$0x3] %v1827_v1  ;;  %v4608_v20 = vrot.slane %v2182_v16, %v5318_v22  ;;  %v1742_v12 = vrot.slane %v4601_v13, %v4423_v28  ;;  %v4618_v23 = vrot.slane %v2182_v16, %v5319_v54 }
 0x29b   : > { %v3007_v57 = vpop.eup %3006  ;;  %v2083_v24 = vadd.f32 %v3005_v18, %v3003_v17 }
 0x29c   : > { %2194 = vbcast.lane.b32.xlu1 %v4608_v20, 264  ;;  %2190 = vbcast.lane.b32.xlu0 %v4608_v20, 256  ;;  %v2141_v55 = vmul.f32 0.6931472, %v3007_v57  ;;  %v1743_v21 = vsel %vm1550_vm14, %v1742_v12, %v1738_v5  ;;  %v4669_v57 = vmax.f32 %v4207_v4, %v4203_v40  ;;  %v5325_v5 = vld [vmem:[#allocation30_spill] sm:$0xff] }
 0x29d   : > { %v1826_v6 = vsel %vm1825_vm15, %v4514_v61, %v1743_v21  ;;  %3014 = vlog2.f32 %v2083_v24 }
 0x29e   : > { %v4623_v8 = vadd.f32 %v2141_v55, %v4402_v0  ;;  %1828 = vst [vmem:[%s4604_s22] sm:$0x3] %v1826_v6  ;;  %v4679_v55 = vmax.f32 %v5325_v5, %v4211_v36  ;;  %v1879_v21 = vsub.f32 %v4207_v4, %v4669_v57 }
 0x2a0   : > { %5320 = vst [vmem:[#allocation52_spill] sm:$0xff] %v4623_v8  ;;  %2257 = vbcast.lane.b32.xlu1 %v4618_v23, 256  ;;  %2198 = vbcast.lane.b32.xlu0 %v4608_v20, 272 }
 0x2a1   : > { %v3009_v44 = vpop.eup %3008 }
 0x2a2   : > { %v3011_v45 = vpop.eup %3010 }
 0x2a3   : > { %v3013_v30 = vpop.eup %3012  ;;  %v2084_v9 = vadd.f32 %v3011_v45, %v3009_v44  ;;  %v1975_v44 = vsub.f32 %v4203_v40, %v4669_v57 }
 0x2a4   : > { %2261 = vbcast.lane.b32.xlu1 %v4618_v23, 264  ;;  %2202 = vbcast.lane.b32.xlu0 %v4608_v20, 280  ;;  %v2143_v17 = vmul.f32 0.6931472, %v3013_v30  ;;  %v5327_v30 = vld [vmem:[#allocation47_spill] sm:$0xff] }
 0x2a5   : > { %3016 = vlog2.f32 %v2084_v9  ;;  %v4697_v9 = vmax.f32 %v5327_v30, %v4217_v47 }
 0x2a6   : > { %v4631_v61 = vadd.f32 %v2143_v17, %v4450_v11  ;;  %v1959_v17 = vsub.f32 %v4211_v36, %v4679_v55 }
 0x2a8   : > { %5321 = vst [vmem:[#allocation56_spill] sm:$0xff] %v4631_v61  ;;  %2265 = vbcast.lane.b32.xlu1 %v4618_v23, 272  ;;  %2206 = vbcast.lane.b32.xlu0 %v4608_v20, 288  ;;  %v5348_v61 = vld [vmem:[#allocation36_spill] sm:$0xff] }
 0x2aa   : > { %v3015_v0 = vpop.eup %3014 }
 0x2ab   : > { %v2145_v60 = vmul.f32 0.6931472, %v3015_v0  ;;  %v1928_v0 = vmul.f32 1.442695, %v1879_v21 }
 0x2ac   : > { %2269 = vbcast.lane.b32.xlu1 %v4618_v23, 280  ;;  %2210 = vbcast.lane.b32.xlu0 %v4608_v20, 296 }
 0x2ad   : > { %v4638_v1 = vadd.f32 %v2145_v60, %v4497_v42  ;;  %v4657_v42 = vmax.f32 %v4215_v46, %v4201_v56  ;;  %v2024_v60 = vmul.f32 1.442695, %v1975_v44 }
 0x2af   : > { %5322 = vst [vmem:[#allocation58_spill] sm:$0xff] %v4638_v1  ;;  %v1878_v22 = vsub.f32 %v4215_v46, %v4657_v42  ;;  %v1974_v19 = vsub.f32 %v4201_v56, %v4657_v42  ;;  %v5326_v56 = vld [vmem:[#allocation40_spill] sm:$0xff] }
 0x2b0   : > { %2273 = vbcast.lane.b32.xlu1 %v4618_v23, 288  ;;  %2214 = vbcast.lane.b32.xlu0 %v4608_v20, 304  ;;  %v4687_v54 = vmax.f32 %v5326_v56, %v4213_v14 }
 0x2b1   : > { %v1926_v24 = vmul.f32 1.442695, %v1878_v22  ;;  %v2022_v6 = vmul.f32 1.442695, %v1974_v19  ;;  %v1864_v19 = vsub.f32 %v5327_v30, %v4697_v9 }
 0x2b2   : > { %v3017_v16 = vpop.eup %3016  ;;  %v1880_v40 = vsub.f32 %v5326_v56, %v4687_v54 }
 0x2b3   : > { %v2147_v11 = vmul.f32 0.6931472, %v3017_v16  ;;  %3018 = vpow2.f32 %v1926_v24  ;;  %v1976_v16 = vsub.f32 %v4213_v14, %v4687_v54  ;;  %v5331_v24 = vld [vmem:[#allocation45_spill] sm:$0xff] }
 0x2b4   : > { %2277 = vbcast.lane.b32.xlu1 %v4618_v23, 296  ;;  %2218 = vbcast.lane.b32.xlu0 %v4608_v20, 312  ;;  %3020 = vpow2.f32 %v2022_v6  ;;  %v1930_v14 = vmul.f32 1.442695, %v1880_v40  ;;  %v1898_v6 = vmul.f32 1.442695, %v1864_v19 }
 0x2b5   : > { %v4645_v18 = vadd.f32 %v2147_v11, %v4541_v32  ;;  %v5324_v32 = vld [vmem:[#allocation31_spill] sm:$0xff]  ;;  %v5328_v11 = vld [vmem:[#allocation38_spill] sm:$0xff]  ;;  %v2026_v56 = vmul.f32 1.442695, %v1976_v16 }
 0x2b6   : > { %v4663_v27 = vmax.f32 %v5324_v32, %v4219_v25 }
 0x2b7   : > { %5323 = vst [vmem:[#allocation63_spill] sm:$0xff] %v4645_v18 }
 0x2b8   : > { %2281 = vbcast.lane.b32.xlu1 %v4618_v23, 304  ;;  %2222 = vbcast.lane.b32.xlu0 %v4608_v20, 320  ;;  %v1862_v12 = vsub.f32 %v5324_v32, %v4663_v27  ;;  %v1958_v46 = vsub.f32 %v4219_v25, %v4663_v27  ;;  %v1863_v25 = vsub.f32 %v5325_v5, %v4679_v55  ;;  %v5329_v32 = vld [vmem:[#allocation43_spill] sm:$0xff] }
 0x2b9   : > { %v4707_v22 = vmax.f32 %v5329_v32, %v5328_v11  ;;  %v1960_v5 = vsub.f32 %v4217_v47, %v4697_v9 }
 0x2ba   : > { %v1894_v45 = vmul.f32 1.442695, %v1862_v12  ;;  %v1990_v4 = vmul.f32 1.442695, %v1958_v46  ;;  %v1896_v36 = vmul.f32 1.442695, %v1863_v25 }
 0x2bb   : > { %v1992_v12 = vmul.f32 1.442695, %v1959_v17  ;;  %v5330_v46 = vld [vmem:[#allocation41_spill] sm:$0xff]  ;;  %v1977_v44 = vsub.f32 %v5328_v11, %v4707_v22  ;;  %v1994_v47 = vmul.f32 1.442695, %v1960_v5 }
 0x2bc   : > { %2285 = vbcast.lane.b32.xlu1 %v4618_v23, 312  ;;  %2226 = vbcast.lane.b32.xlu0 %v4608_v20, 328  ;;  %3022 = vpow2.f32 %v1894_v45  ;;  %v4717_v21 = vmax.f32 %v5331_v24, %v5330_v46 }
 0x2bd   : > { %3024 = vpow2.f32 %v1990_v4  ;;  %v5332_v4 = vld [vmem:[#allocation51_spill] sm:$0xff] }
 0x2be   : > { %3026 = vpow2.f32 %v1928_v0  ;;  %v1865_v45 = vsub.f32 %v5331_v24, %v4717_v21  ;;  %v1961_v30 = vsub.f32 %v5330_v46, %v4717_v21  ;;  %v4730_v17 = vmax.f32 %v5332_v4, %v4231_v33 }
 0x2bf   : > { %3028 = vpow2.f32 %v2024_v60  ;;  %v2028_v0 = vmul.f32 1.442695, %v1977_v44 }
 0x2c0   : > { %2289 = vbcast.lane.b32.xlu1 %v4618_v23, 320  ;;  %2230 = vbcast.lane.b32.xlu0 %v4608_v20, 336  ;;  %3030 = vpow2.f32 %v1896_v36  ;;  %v1900_v40 = vmul.f32 1.442695, %v1865_v45  ;;  %v3019_v60 = vpop.eup %3018  ;;  %v1996_v16 = vmul.f32 1.442695, %v1961_v30  ;;  %v1866_v11 = vsub.f32 %v5332_v4, %v4730_v17 }
 0x2c1   : > { %3032 = vpow2.f32 %v1992_v12  ;;  %v1962_v36 = vsub.f32 %v4231_v33, %v4730_v17 }
 0x2c2   : > { %3034 = vpow2.f32 %v1930_v14  ;;  %v1902_v46 = vmul.f32 1.442695, %v1866_v11  ;;  %v5335_v11 = vld [vmem:[#allocation49_spill] sm:$0xff] }
 0x2c3   : > { %3036 = vpow2.f32 %v2026_v56  ;;  %v1998_v56 = vmul.f32 1.442695, %v1962_v36  ;;  %v4751_v36 = vmax.f32 %v5335_v11, %v4237_v50 }
 0x2c4   : > { %2293 = vbcast.lane.b32.xlu1 %v4618_v23, 328  ;;  %2234 = vbcast.lane.b32.xlu0 %v4608_v20, 344  ;;  %3038 = vpow2.f32 %v1898_v6 }
 0x2c5   : > { %3040 = vpow2.f32 %v1994_v47  ;;  %v5334_v47 = vld [vmem:[#allocation46_spill] sm:$0xff] }
 0x2c6   : > { %v4745_v33 = vmax.f32 %v5334_v47, %v4233_v31 }
 0x2c8   : > { %2297 = vbcast.lane.b32.xlu1 %v4618_v23, 336  ;;  %2238 = vbcast.lane.b32.xlu0 %v4608_v20, 352 }
 0x2cc   : > { %2301 = vbcast.lane.b32.xlu1 %v4618_v23, 344  ;;  %2242 = vbcast.lane.b32.xlu0 %v4608_v20, 360 }
 0x2d0   : > { %2305 = vbcast.lane.b32.xlu1 %v4618_v23, 352  ;;  %2246 = vbcast.lane.b32.xlu0 %v4608_v20, 368 }
 0x2d4   : > { %2309 = vbcast.lane.b32.xlu1 %v4618_v23, 360  ;;  %2250 = vbcast.lane.b32.xlu0 %v4608_v20, 376  ;;  %v1881_v20 = vsub.f32 %v5329_v32, %v4707_v22  ;;  %v3021_v32 = vpop.eup %3020 }
 0x2d5   : > { %v3023_v19 = vpop.eup %3022  ;;  %v2070_v45 = vadd.f32 %v3021_v32, %v3019_v60  ;;  %v1883_v60 = vsub.f32 %v5334_v47, %v4745_v33 }
 0x2d6   : > { %v1932_v25 = vmul.f32 1.442695, %v1881_v20  ;;  %v3025_v12 = vpop.eup %3024 }
 0x2d7   : > { %v3027_v14 = vpop.eup %3026  ;;  %v2054_v4 = vadd.f32 %v3025_v12, %v3023_v19  ;;  %v5336_v12 = vld [vmem:[#allocation50_spill] sm:$0xff] }
 0x2d8   : > { %2313 = vbcast.lane.b32.xlu1 %v4618_v23, 368  ;;  %3042 = vpow2.f32 %v1932_v25  ;;  %v3029_v24 = vpop.eup %3028 }
 0x2d9   : > { %3044 = vpow2.f32 %v2028_v0  ;;  %v3031_v20 = vpop.eup %3030 }
 0x2da   : > { %3046 = vpow2.f32 %v1900_v40  ;;  %v3033_v6 = vpop.eup %3032  ;;  %v2071_v40 = vadd.f32 %v3029_v24, %v3027_v14  ;;  %v4759_v14 = vmax.f32 %v5336_v12, %v4241_v48 }
 0x2db   : > { %3048 = vpow2.f32 %v1996_v16  ;;  %v3035_v25 = vpop.eup %3034 }
 0x2dc   : > { %2317 = vbcast.lane.b32.xlu1 %v4618_v23, 376  ;;  %v5333_v23 = vld [vmem:[#allocation42_spill] sm:$0xff]  ;;  %3050 = vpow2.f32 %v1902_v46  ;;  %v3037_v0 = vpop.eup %3036 }
 0x2dd   : > { %v4739_v5 = vmax.f32 %v5333_v23, %v4227_v49  ;;  %3052 = vpow2.f32 %v1998_v56  ;;  %v3039_v16 = vpop.eup %3038  ;;  %v2072_v46 = vadd.f32 %v3037_v0, %v3035_v25  ;;  %v1867_v56 = vsub.f32 %v5335_v11, %v4751_v36 }
 0x2de   : > { %v3041_v28 = vpop.eup %3040  ;;  %3054 = vlog2.f32 %v2070_v45  ;;  %v1884_v25 = vsub.f32 %v5336_v12, %v4759_v14 }
 0x2df   : > { %v1882_v44 = vsub.f32 %v5333_v23, %v4739_v5  ;;  %v1978_v30 = vsub.f32 %v4227_v49, %v4739_v5  ;;  %v2055_v23 = vadd.f32 %v3033_v6, %v3031_v20  ;;  %v1979_v49 = vsub.f32 %v4233_v31, %v4745_v33  ;;  %v5337_v31 = vld [vmem:[#allocation33_spill] sm:$0xff] }
 0x2e0   : > { %3056 = vlog2.f32 %v2054_v4  ;;  %v2056_v20 = vadd.f32 %v3041_v28, %v3039_v16  ;;  %v1936_v6 = vmul.f32 1.442695, %v1883_v60  ;;  %v4767_v47 = vmax.f32 %v5337_v31, %v5307_v35  ;;  %v5338_v28 = vld [vmem:[#allocation53_spill] sm:$0xff]  ;;  %v5339_v60 = vld [vmem:[#allocation54_spill] sm:$0xff] }
 0x2e1   : > { %v1934_v26 = vmul.f32 1.442695, %v1882_v44  ;;  %v2030_v32 = vmul.f32 1.442695, %v1978_v30  ;;  %3058 = vlog2.f32 %v2071_v40  ;;  %v1963_v44 = vsub.f32 %v4237_v50, %v4751_v36 }
 0x2e2   : > { %3060 = vlog2.f32 %v2055_v23  ;;  %v2032_v30 = vmul.f32 1.442695, %v1979_v49  ;;  %v1904_v40 = vmul.f32 1.442695, %v1867_v56  ;;  %v4775_v50 = vmax.f32 %v5338_v28, %v5309_v43  ;;  %v5340_v56 = vld [vmem:[#allocation55_spill] sm:$0xff] }
 0x2e3   : > { %3062 = vpow2.f32 %v1934_v26  ;;  %v1980_v26 = vsub.f32 %v4241_v48, %v4759_v14  ;;  %v2000_v16 = vmul.f32 1.442695, %v1963_v44  ;;  %v1868_v11 = vsub.f32 %v5337_v31, %v4767_v47 }
 0x2e4   : > { %3064 = vpow2.f32 %v2030_v32  ;;  %v1964_v23 = vsub.f32 %v5307_v35, %v4767_v47  ;;  %v4783_v32 = vmax.f32 %v5339_v60, %v5308_v59 }
 0x2e5   : > { %v3043_v19 = vpop.eup %3042  ;;  %3066 = vlog2.f32 %v2072_v46  ;;  %v2034_v46 = vmul.f32 1.442695, %v1980_v26  ;;  %v1906_v35 = vmul.f32 1.442695, %v1868_v11 }
 0x2e6   : > { %v3045_v24 = vpop.eup %3044  ;;  %3068 = vlog2.f32 %v2056_v20  ;;  %v4789_v20 = vmax.f32 %v5340_v56, %v5311_v7  ;;  %v2002_v31 = vmul.f32 1.442695, %v1964_v23 }
 0x2e7   : > { %v3047_v45 = vpop.eup %3046  ;;  %v2073_v0 = vadd.f32 %v3045_v24, %v3043_v19  ;;  %3070 = vpow2.f32 %v1936_v6  ;;  %v1938_v19 = vmul.f32 1.442695, %v1884_v25  ;;  %v1869_v24 = vsub.f32 %v5338_v28, %v4775_v50 }
 0x2e8   : > { %v3049_v4 = vpop.eup %3048  ;;  %3072 = vpow2.f32 %v2032_v30  ;;  %v1965_v6 = vsub.f32 %v5309_v43, %v4775_v50  ;;  %v5341_v30 = vld [vmem:[#allocation57_spill] sm:$0xff]  ;;  %v1870_v28 = vsub.f32 %v5340_v56, %v4789_v20 }
 0x2e9   : > { %v2057_v49 = vadd.f32 %v3049_v4, %v3047_v45  ;;  %v3051_v48 = vpop.eup %3050  ;;  %3074 = vlog2.f32 %v2073_v0  ;;  %v1885_v45 = vsub.f32 %v5339_v60, %v4783_v32  ;;  %v4799_v4 = vmax.f32 %v5341_v30, %v5310_v38 }
 0x2ea   : > { %v3053_v12 = vpop.eup %3052  ;;  %3076 = vpow2.f32 %v1904_v40  ;;  %v1981_v0 = vsub.f32 %v5308_v59, %v4783_v32  ;;  %v1908_v43 = vmul.f32 1.442695, %v1869_v24  ;;  %v2004_v60 = vmul.f32 1.442695, %v1965_v6 }
 0x2eb   : > { %3078 = vpow2.f32 %v2000_v16  ;;  %v4793_v44 = vpop.eup %3054  ;;  %v2058_v40 = vadd.f32 %v3053_v12, %v3051_v48  ;;  %v5342_v16 = vld [vmem:[#allocation32_spill] sm:$0xff]  ;;  %v1940_v59 = vmul.f32 1.442695, %v1885_v45  ;;  %v1886_v48 = vsub.f32 %v5341_v30, %v4799_v4 }
 0x2ec   : > { %3080 = vlog2.f32 %v2057_v49  ;;  %v4809_v11 = vmax.f32 %v5342_v16, %v5315_v53  ;;  %v1966_v49 = vsub.f32 %v5311_v7, %v4789_v20  ;;  %v1982_v24 = vsub.f32 %v5310_v38, %v4799_v4  ;;  %v5343_v7 = vld [vmem:[#allocation35_spill] sm:$0xff] }
 0x2ed   : > { %v3057_v25 = vpop.eup %3056  ;;  %3082 = vpow2.f32 %v1938_v19  ;;  %v1942_v38 = vmul.f32 1.442695, %v1886_v48 }
 0x2ee   : > { %v4803_v26 = vpop.eup %3058  ;;  %3084 = vpow2.f32 %v2034_v46  ;;  %v2036_v46 = vmul.f32 1.442695, %v1981_v0  ;;  %v1871_v6 = vsub.f32 %v5342_v16, %v4809_v11  ;;  %v2006_v30 = vmul.f32 1.442695, %v1966_v49 }
 0x2ef   : > { %v3061_v23 = vpop.eup %3060  ;;  %3086 = vpow2.f32 %v1906_v35  ;;  %v1910_v35 = vmul.f32 1.442695, %v1870_v28  ;;  %v1967_v0 = vsub.f32 %v5315_v53, %v4809_v11 }
 0x2f0   : > { %v3063_v19 = vpop.eup %3062  ;;  %3088 = vpow2.f32 %v2002_v31  ;;  %v4823_v31 = vmax.f32 %v5343_v7, %v4376_v34  ;;  %v1912_v16 = vmul.f32 1.442695, %v1871_v6 }
 0x2f1   : > { %v3065_v12 = vpop.eup %3064  ;;  %3090 = vlog2.f32 %v2058_v40  ;;  %v2008_v53 = vmul.f32 1.442695, %v1967_v0  ;;  %v2087_v0 = vmul.f32 0.6931472, %v3057_v25 }
 0x2f2   : > { %v4817_v56 = vpop.eup %3066  ;;  %3092 = vpow2.f32 %v1908_v43  ;;  %5344 = vst [vmem:[#allocation66_spill] sm:$0xff] %v4823_v31  ;;  %v2038_v43 = vmul.f32 1.442695, %v1982_v24  ;;  %v1872_v51 = vsub.f32 %v5343_v7, %v4823_v31  ;;  %v2074_v24 = vadd.f32 %v3065_v12, %v3063_v19 }
 0x2f3   : > { %v3069_v45 = vpop.eup %3068  ;;  %3094 = vpow2.f32 %v2004_v60  ;;  %v4833_v60 = vmax.f32 %v5345_v52, %v4417_v37  ;;  %v2089_v19 = vmul.f32 0.6931472, %v3061_v23  ;;  %v4855_v23 = vmax.f32 %v5348_v61, %v4519_v41 }
 0x2f4   : > { %v3071_v62 = vpop.eup %3070  ;;  %3096 = vpow2.f32 %v1940_v59  ;;  %v1968_v59 = vsub.f32 %v4376_v34, %v4823_v31  ;;  %v1914_v6 = vmul.f32 1.442695, %v1872_v51 }
 0x2f5   : > { %v3073_v40 = vpop.eup %3072  ;;  %3098 = vpow2.f32 %v2036_v46  ;;  %5346 = vst [vmem:[#allocation70_spill] sm:$0xff] %v4833_v60  ;;  %v1873_v7 = vsub.f32 %v5345_v52, %v4833_v60 }
 0x2f6   : > { %v4827_v28 = vpop.eup %3074  ;;  %3100 = vpow2.f32 %v1910_v35  ;;  %v2010_v2 = vmul.f32 1.442695, %v1968_v59  ;;  %v2150_v59 = vadd.f32 %v2087_v0, %v4663_v27  ;;  %v2091_v0 = vmul.f32 0.6931472, %v3069_v45 }
 0x2f7   : > { %v3077_v49 = vpop.eup %3076  ;;  %3102 = vpow2.f32 %v2006_v30  ;;  %v1969_v30 = vsub.f32 %v4417_v37, %v4833_v60  ;;  %v1916_v52 = vmul.f32 1.442695, %v1873_v7  ;;  %v2119_v37 = vmul.f32 0.6931472, %v4793_v44 }
 0x2f8   : > { %v3079_v48 = vpop.eup %3078  ;;  %3104 = vpow2.f32 %v1942_v38  ;;  %v5347_v38 = vld [vmem:[#allocation37_spill] sm:$0xff] }
 0x2f9   : > { %v4837_v46 = vpop.eup %3080  ;;  %3106 = vpow2.f32 %v2038_v43  ;;  %v4845_v18 = vmax.f32 %v5347_v38, %v4471_v63  ;;  %v2059_v12 = vadd.f32 %v3079_v48, %v3077_v49  ;;  %v2121_v49 = vmul.f32 0.6931472, %v4803_v26 }
 0x2fa   : > { %v3083_v35 = vpop.eup %3082  ;;  %3108 = vpow2.f32 %v1912_v16  ;;  %v2075_v48 = vadd.f32 %v3073_v40, %v3071_v62 }
 0x2fb   : > { %v3085_v3 = vpop.eup %3084  ;;  %3110 = vpow2.f32 %v2008_v53  ;;  %v2012_v53 = vmul.f32 1.442695, %v1969_v30  ;;  %v1874_v1 = vsub.f32 %v5347_v38, %v4845_v18  ;;  %v2123_v38 = vmul.f32 0.6931472, %v4817_v56 }
 0x2fc   : > { %v3087_v34 = vpop.eup %3086  ;;  %3112 = vlog2.f32 %v2074_v24  ;;  %v2076_v8 = vadd.f32 %v3085_v3, %v3083_v35  ;;  %v1971_v3 = vsub.f32 %v4519_v41, %v4855_v23  ;;  %v2166_v56 = vadd.f32 %v2119_v37, %v4657_v42 }
 0x2fd   : > { %v3089_v43 = vpop.eup %3088  ;;  %3114 = vpow2.f32 %v1914_v6  ;;  %v2151_v6 = vadd.f32 %v2089_v19, %v4679_v55  ;;  %v1918_v31 = vmul.f32 1.442695, %v1874_v1  ;;  %v5349_v55 = vld [vmem:[#allocation39_spill] sm:$0xff]  ;;  %v4878_v37 = vmax.f32 %v4209_v10, %v4601_v13 }
 0x2fe   : > { %v4847_v51 = vpop.eup %3090  ;;  %3116 = vpow2.f32 %v2010_v2  ;;  %v1970_v2 = vsub.f32 %v4471_v63, %v4845_v18  ;;  %v2060_v27 = vadd.f32 %v3089_v43, %v3087_v34  ;;  %v1875_v63 = vsub.f32 %v5348_v61, %v4855_v23 }
 0x2ff   : > { %v3093_v16 = vpop.eup %3092  ;;  %3118 = vlog2.f32 %v2059_v12  ;;  %v4866_v34 = vmax.f32 %v5349_v55, %v4561_v39  ;;  %v2167_v61 = vadd.f32 %v2121_v49, %v4669_v57  ;;  %v2168_v12 = vadd.f32 %v2123_v38, %v4687_v54 }
 0x300   : > { %v3095_v25 = vpop.eup %3094  ;;  %3120 = vpow2.f32 %v1916_v52  ;;  %v2014_v45 = vmul.f32 1.442695, %v1970_v2  ;;  %v2016_v57 = vmul.f32 1.442695, %v1971_v3  ;;  %v2093_v54 = vmul.f32 0.6931472, %v4837_v46 }
 0x301   : > { %v3097_v24 = vpop.eup %3096  ;;  %3122 = vpow2.f32 %v2012_v53  ;;  %v2061_v40 = vadd.f32 %v3095_v25, %v3093_v16  ;;  %v1876_v42 = vsub.f32 %v5349_v55, %v4866_v34  ;;  %v2125_v49 = vmul.f32 0.6931472, %v4827_v28 }
 0x302   : > { %v3099_v44 = vpop.eup %3098  ;;  %3124 = vlog2.f32 %v2075_v48  ;;  %v1920_v48 = vmul.f32 1.442695, %v1875_v63  ;;  %v4887_v46 = vmax.f32 %v4536_v58, %v4579_v15  ;;  %v1973_v28 = vsub.f32 %v4601_v13, %v4878_v37 }
 0x303   : > { %v3101_v29 = vpop.eup %3100  ;;  %3126 = vlog2.f32 %v2060_v27  ;;  %v2077_v52 = vadd.f32 %v3099_v44, %v3097_v24 }
 0x304   : > { %v3103_v60 = vpop.eup %3102  ;;  %3128 = vlog2.f32 %v2076_v8  ;;  %v1972_v8 = vsub.f32 %v4561_v39, %v4866_v34  ;;  %v1922_v39 = vmul.f32 1.442695, %v1876_v42  ;;  %v1893_v13 = vsub.f32 %v4536_v58, %v4887_v46 }
 0x305   : > { %v3105_v43 = vpop.eup %3104  ;;  %3130 = vlog2.f32 %v2061_v40  ;;  %v2062_v41 = vadd.f32 %v3103_v60, %v3101_v29  ;;  %v2169_v40 = vadd.f32 %v2125_v49, %v4707_v22  ;;  %v1989_v22 = vsub.f32 %v4579_v15, %v4887_v46 }
 0x306   : > { %v3107_v35 = vpop.eup %3106  ;;  %3132 = vpow2.f32 %v1918_v31  ;;  %v2095_v31 = vmul.f32 0.6931472, %v4847_v51  ;;  %v2018_v51 = vmul.f32 1.442695, %v1972_v8 }
 0x307   : > { %v3109_v16 = vpop.eup %3108  ;;  %3134 = vpow2.f32 %v2014_v45  ;;  %v2078_v24 = vadd.f32 %v3107_v35, %v3105_v43  ;;  %v2052_v15 = vmul.f32 1.442695, %v1989_v22 }
 0x308   : > { %v3111_v25 = vpop.eup %3110  ;;  %3136 = vlog2.f32 %v2077_v52 }
 0x309   : > { %3138 = vlog2.f32 %v2062_v41  ;;  %v2063_v44 = vadd.f32 %v3111_v25, %v3109_v16  ;;  %v1956_v25 = vmul.f32 1.442695, %v1893_v13 }
 0x30a   : > { %3140 = vpow2.f32 %v1920_v48 }
 0x30b   : > { %3142 = vpow2.f32 %v2016_v57 }
 0x30e   : > { %v2195_v7 = vpop.permute.xlu1 %2194  ;;  %v2191_v30 = vpop.permute.xlu0 %2190 }
 0x30f   : > { %v2352_v26 = vsub.f32 %v2151_v6, %v2195_v7  ;;  %v2351_v62 = vsub.f32 %v2150_v59, %v2191_v30  ;;  %v2152_v59 = vadd.f32 %v2091_v0, %v4697_v9  ;;  %v3113_v9 = vpop.eup %3112  ;;  %v1877_v30 = vsub.f32 %v4209_v10, %v4878_v37 }
 0x310   : > { %v3115_v2 = vpop.eup %3114  ;;  %v2153_v0 = vadd.f32 %v2093_v54, %v4717_v21  ;;  %v2127_v63 = vmul.f32 0.6931472, %v3113_v9  ;;  %3144 = vlog2.f32 %v2078_v24 }
 0x311   : > { %2419 = vperm.xlu1 %2981, %v2352_v26   ;;  %2416 = vperm.xlu0 %2980, %v2351_v62   ;;  %v3117_v7 = vpop.eup %3116  ;;  %3146 = vlog2.f32 %v2063_v44  ;;  %v1924_v21 = vmul.f32 1.442695, %v1877_v30 }
 0x312   : > { %v2258_v1 = vpop.permute.xlu1 %2257  ;;  %v2199_v19 = vpop.permute.xlu0 %2198  ;;  %v2064_v10 = vadd.f32 %v3117_v7, %v3115_v2  ;;  %3148 = vpow2.f32 %v1922_v39 }
 0x313   : > { %v2367_v53 = vsub.f32 %v2166_v56, %v2258_v1  ;;  %v2353_v6 = vsub.f32 %v2152_v59, %v2199_v19  ;;  %v3119_v38 = vpop.eup %3118  ;;  %v2154_v56 = vadd.f32 %v2095_v31, %v4730_v17  ;;  %3150 = vpow2.f32 %v2018_v51 }
 0x314   : > { %v3121_v55 = vpop.eup %3120  ;;  %v2020_v1 = vmul.f32 1.442695, %v1973_v28  ;;  %v2097_v19 = vmul.f32 0.6931472, %v3119_v38  ;;  %3152 = vlog2.f32 %v2064_v10  ;;  %v2170_v17 = vadd.f32 %v2127_v63, %v4739_v5 }
 0x315   : > { %2464 = vperm.xlu1 %2981, %v2367_v53   ;;  %v3123_v3 = vpop.eup %3122  ;;  %3154 = vpow2.f32 %v1924_v21 }
 0x316   : > { %v2262_v29 = vpop.permute.xlu1 %2261  ;;  %v2203_v60 = vpop.permute.xlu0 %2202  ;;  %v2065_v58 = vadd.f32 %v3123_v3, %v3121_v55  ;;  %v2155_v57 = vadd.f32 %v2097_v19, %v4751_v36 }
 0x317   : > { %v2368_v27 = vsub.f32 %v2167_v61, %v2262_v29  ;;  %v2354_v43 = vsub.f32 %v2153_v0, %v2203_v60  ;;  %v3125_v35 = vpop.eup %3124  ;;  %3156 = vpow2.f32 %v2020_v1 }
 0x318   : > { %v3127_v61 = vpop.eup %3126  ;;  %v2129_v48 = vmul.f32 0.6931472, %v3125_v35  ;;  %3158 = vlog2.f32 %v2065_v58 }
 0x319   : > { %2467 = vperm.xlu0 %2980, %v2368_v27   ;;  %2422 = vperm.xlu1 %2981, %v2353_v6   ;;  %v3129_v16 = vpop.eup %3128  ;;  %v2099_v8 = vmul.f32 0.6931472, %v3127_v61  ;;  %3160 = vpow2.f32 %v1956_v25 }
 0x31a   : > { %v2266_v26 = vpop.permute.xlu1 %2265  ;;  %v2207_v62 = vpop.permute.xlu0 %2206  ;;  %v2171_v5 = vadd.f32 %v2129_v48, %v4745_v33  ;;  %v2131_v2 = vmul.f32 0.6931472, %v3129_v16 }
 0x31b   : > { %v2369_v45 = vsub.f32 %v2168_v12, %v2266_v26  ;;  %v2355_v53 = vsub.f32 %v2154_v56, %v2207_v62  ;;  %v3131_v41 = vpop.eup %3130  ;;  %3162 = vpow2.f32 %v2052_v15  ;;  %v2156_v27 = vadd.f32 %v2099_v8, %v4767_v47  ;;  %v5350_v15 = vld [vmem:[#allocation66_spill] sm:$0xff] }
 0x31c   : > { %v3133_v42 = vpop.eup %3132  ;;  %v2101_v36 = vmul.f32 0.6931472, %v3131_v41  ;;  %v2172_v26 = vadd.f32 %v2131_v2, %v4759_v14 }
 0x31d   : > { %2470 = vperm.xlu0 %2980, %v2369_v45   ;;  %2425 = vperm.xlu1 %2981, %v2354_v43   ;;  %v3135_v54 = vpop.eup %3134 }
 0x31e   : > { %v2270_v12 = vpop.permute.xlu1 %2269  ;;  %v2211_v52 = vpop.permute.xlu0 %2210  ;;  %v2066_v44 = vadd.f32 %v3135_v54, %v3133_v42 }
 0x31f   : > { %v2370_v59 = vsub.f32 %v2169_v40, %v2270_v12  ;;  %v3137_v60 = vpop.eup %3136  ;;  %v2356_v31 = vsub.f32 %v2155_v57, %v2211_v52  ;;  %v2157_v40 = vadd.f32 %v2101_v36, %v4775_v50 }
 0x320   : > { %v3139_v24 = vpop.eup %3138  ;;  %v2133_v62 = vmul.f32 0.6931472, %v3137_v60  ;;  %3164 = vlog2.f32 %v2066_v44  ;;  %v5351_v60 = vld [vmem:[#allocation44_spill] sm:$0xff] }
 0x321   : > { %2473 = vperm.xlu0 %2980, %v2370_v59   ;;  %2428 = vperm.xlu1 %2981, %v2355_v53   ;;  %v3141_v6 = vpop.eup %3140  ;;  %v2103_v47 = vmul.f32 0.6931472, %v3139_v24  ;;  %v5353_v44 = vld [vmem:[#allocation48_spill] sm:$0xff] }
 0x322   : > { %v2274_v9 = vpop.permute.xlu1 %2273  ;;  %v2215_v29 = vpop.permute.xlu0 %2214  ;;  %v2173_v21 = vadd.f32 %v2133_v62, %v4783_v32 }
 0x323   : > { %v2371_v49 = vsub.f32 %v2170_v17, %v2274_v9  ;;  %v3143_v7 = vpop.eup %3142  ;;  %v2357_v28 = vsub.f32 %v2156_v27, %v2215_v29  ;;  %v2158_v14 = vadd.f32 %v2103_v47, %v4789_v20 }
 0x324   : > { %v3145_v51 = vpop.eup %3144  ;;  %v2067_v63 = vadd.f32 %v3143_v7, %v3141_v6 }
 0x325   : > { %2476 = vperm.xlu0 %2980, %v2371_v49   ;;  %2431 = vperm.xlu1 %2981, %v2356_v31   ;;  %v3147_v38 = vpop.eup %3146  ;;  %v2135_v56 = vmul.f32 0.6931472, %v3145_v51  ;;  %v5352_v49 = vld [vmem:[#allocation70_spill] sm:$0xff] }
 0x326   : > { %v2278_v39 = vpop.permute.xlu1 %2277  ;;  %v2219_v30 = vpop.permute.xlu0 %2218  ;;  %v2105_v50 = vmul.f32 0.6931472, %v3147_v38  ;;  %3166 = vlog2.f32 %v2067_v63 }
 0x327   : > { %v2372_v0 = vsub.f32 %v2171_v5, %v2278_v39  ;;  %v3149_v33 = vpop.eup %3148  ;;  %v2358_v10 = vsub.f32 %v2157_v40, %v2219_v30  ;;  %v2174_v53 = vadd.f32 %v2135_v56, %v4799_v4 }
 0x328   : > { %v3151_v55 = vpop.eup %3150  ;;  %v2159_v32 = vadd.f32 %v2105_v50, %v4809_v11 }
 0x329   : > { %2479 = vperm.xlu0 %2980, %v2372_v0   ;;  %2434 = vperm.xlu1 %2981, %v2357_v28   ;;  %v3153_v13 = vpop.eup %3152  ;;  %v2068_v22 = vadd.f32 %v3151_v55, %v3149_v33 }
 0x32a   : > { %v2282_v43 = vpop.permute.xlu1 %2281  ;;  %v2223_v45 = vpop.permute.xlu0 %2222  ;;  %v2107_v58 = vmul.f32 0.6931472, %v3153_v13 }
 0x32b   : > { %v2373_v3 = vsub.f32 %v2172_v26, %v2282_v43  ;;  %v3155_v35 = vpop.eup %3154  ;;  %v2359_v12 = vsub.f32 %v2158_v14, %v2223_v45  ;;  %3168 = vlog2.f32 %v2068_v22  ;;  %v5354_v26 = vld [vmem:[#allocation52_spill] sm:$0xff] }
 0x32c   : > { %v3157_v1 = vpop.eup %3156  ;;  %v2160_v57 = vadd.f32 %v2107_v58, %v5350_v15  ;;  %v5355_v45 = vld [vmem:[#allocation56_spill] sm:$0xff] }
 0x32d   : > { %2482 = vperm.xlu0 %2980, %v2373_v3   ;;  %2437 = vperm.xlu1 %2981, %v2358_v10   ;;  %v3159_v16 = vpop.eup %3158  ;;  %v2069_v20 = vadd.f32 %v3157_v1, %v3155_v35  ;;  %v5356_v35 = vld [vmem:[#allocation58_spill] sm:$0xff] }
 0x32e   : > { %v2286_v19 = vpop.permute.xlu1 %2285  ;;  %v2227_v61 = vpop.permute.xlu0 %2226  ;;  %v2109_v8 = vmul.f32 0.6931472, %v3159_v16 }
 0x32f   : > { %v2374_v52 = vsub.f32 %v2173_v21, %v2286_v19  ;;  %v3161_v59 = vpop.eup %3160  ;;  %v2360_v48 = vsub.f32 %v2159_v32, %v2227_v61  ;;  %3170 = vlog2.f32 %v2069_v20  ;;  %v5357_v61 = vld [vmem:[#allocation63_spill] sm:$0xff] }
 0x330   : > { %v3163_v41 = vpop.eup %3162  ;;  %v2161_v24 = vadd.f32 %v2109_v8, %v5352_v49 }
 0x331   : > { %2485 = vperm.xlu0 %2980, %v2374_v52   ;;  %2440 = vperm.xlu1 %2981, %v2359_v12   ;;  %v2085_v4 = vadd.f32 %v3163_v41, %v3161_v59  ;;  %v3165_v54 = vpop.eup %3164 }
 0x332   : > { %v2290_v25 = vpop.permute.xlu1 %2289  ;;  %v2231_v17 = vpop.permute.xlu0 %2230  ;;  %v2111_v5 = vmul.f32 0.6931472, %v3165_v54 }
 0x333   : > { %v2375_v42 = vsub.f32 %v2174_v53, %v2290_v25  ;;  %v2361_v29 = vsub.f32 %v2160_v57, %v2231_v17  ;;  %3172 = vlog2.f32 %v2085_v4  ;;  %v3167_v2 = vpop.eup %3166 }
 0x334   : > { %v2162_v39 = vadd.f32 %v2111_v5, %v4845_v18  ;;  %v2113_v30 = vmul.f32 0.6931472, %v3167_v2  ;;  %v5358_v2 = vld [vmem:[#allocation59_spill] sm:$0xff] }
 0x335   : > { %2488 = vperm.xlu0 %2980, %v2375_v42   ;;  %2443 = vperm.xlu1 %2981, %v2360_v48  }
 0x336   : > { %v2294_v9 = vpop.permute.xlu1 %2293  ;;  %v2235_v11 = vpop.permute.xlu0 %2234  ;;  %v2163_v33 = vadd.f32 %v2113_v30, %v4855_v23 }
 0x337   : > { %v2376_v31 = vsub.f32 %v5351_v60, %v2294_v9  ;;  %v2362_v36 = vsub.f32 %v2161_v24, %v2235_v11 }
 0x338   : > { %v3169_v51 = vpop.eup %3168 }
 0x339   : > { %2491 = vperm.xlu0 %2980, %v2376_v31   ;;  %2446 = vperm.xlu1 %2981, %v2361_v29   ;;  %v2115_v40 = vmul.f32 0.6931472, %v3169_v51 }
 0x33a   : > { %v2298_v6 = vpop.permute.xlu1 %2297  ;;  %v2239_v27 = vpop.permute.xlu0 %2238 }
 0x33b   : > { %v2377_v7 = vsub.f32 %v5353_v44, %v2298_v6  ;;  %v2363_v38 = vsub.f32 %v2162_v39, %v2239_v27  ;;  %v2164_v10 = vadd.f32 %v2115_v40, %v4866_v34  ;;  %v5359_v27 = vld [vmem:[#allocation27_spill] sm:$0xff] }
 0x33c   : > { %v3171_v47 = vpop.eup %3170 }
 0x33d   : > { %2494 = vperm.xlu0 %2980, %v2377_v7   ;;  %2449 = vperm.xlu1 %2981, %v2362_v36   ;;  %v2117_v3 = vmul.f32 0.6931472, %v3171_v47  ;;  %v5360_v7 = vld [vmem:[#allocation60_spill] sm:$0xff] }
 0x33e   : > { %v2302_v28 = vpop.permute.xlu1 %2301  ;;  %v2243_v0 = vpop.permute.xlu0 %2242 }
 0x33f   : > { %v2378_v62 = vsub.f32 %v5354_v26, %v2302_v28  ;;  %v2364_v43 = vsub.f32 %v2163_v33, %v2243_v0  ;;  %v2165_v50 = vadd.f32 %v2117_v3, %v4878_v37  ;;  %v5361_v28 = vld [vmem:[#allocation61_spill] sm:$0xff]  ;;  %v5362_v26 = vld [vmem:[#allocation62_spill] sm:$0xff] }
 0x340   : > { %v3173_v13 = vpop.eup %3172 }
 0x341   : > { %2497 = vperm.xlu0 %2980, %v2378_v62   ;;  %2452 = vperm.xlu1 %2981, %v2363_v38   ;;  %v2149_v22 = vmul.f32 0.6931472, %v3173_v13  ;;  %v5364_v13 = vld [vmem:[#allocation65_spill] sm:$0xff] }
 0x342   : > { %v2306_v63 = vpop.permute.xlu1 %2305  ;;  %v2247_v55 = vpop.permute.xlu0 %2246 }
 0x343   : > { %v2379_v18 = vsub.f32 %v5355_v45, %v2306_v63  ;;  %v2365_v56 = vsub.f32 %v2164_v10, %v2247_v55  ;;  %v2181_v34 = vadd.f32 %v2149_v22, %v4887_v46 }
 0x345   : > { %2500 = vperm.xlu0 %2980, %v2379_v18   ;;  %2455 = vperm.xlu1 %2981, %v2364_v43   ;;  %v5363_v43 = vld [vmem:[#allocation64_spill] sm:$0xff] }
 0x346   : > { %v2310_v21 = vpop.permute.xlu1 %2309  ;;  %v2251_v23 = vpop.permute.xlu0 %2250 }
 0x347   : > { %v2380_v14 = vsub.f32 %v5356_v35, %v2310_v21  ;;  %v2366_v19 = vsub.f32 %v2165_v50, %v2251_v23  ;;  %v5365_v23 = vld [vmem:[#allocation67_spill] sm:$0xff] }
 0x349   : > { %2503 = vperm.xlu0 %2980, %v2380_v14   ;;  %2458 = vperm.xlu1 %2981, %v2365_v56  }
 0x34a   : > { %v2314_v1 = vpop.permute.xlu1 %2313 }
 0x34b   : > { %v2381_v12 = vsub.f32 %v5357_v61, %v2314_v1  ;;  %v5366_v61 = vld [vmem:[#allocation68_spill] sm:$0xff] }
 0x34d   : > { %2506 = vperm.xlu0 %2980, %v2381_v12   ;;  %2461 = vperm.xlu1 %2981, %v2366_v19  }
 0x34e   : > { %v2318_v52 = vpop.permute.xlu1 %2317 }
 0x34f   : > { %v2382_v16 = vsub.f32 %v2181_v34, %v2318_v52 }
 0x351   : > { %2509 = vperm.xlu0 %2980, %v2382_v16  }
 0x38c   : > { %v2420_v53 = vpop.permute.xlu1 %2419  ;;  %v2417_v59 = vpop.permute.xlu0 %2416 }
 0x38d   : > { %v2518_v6 = vrot.slane %v2420_v53, %v5358_v2  ;;  %v2514_v36 = vrot.slane %v2417_v59, %v5359_v27 }
 0x38f   : > { %v2519_v63 = vsel %vm1452_vm0, %v2518_v6, %v2514_v36 }
 0x390   : > { %v2465_v32 = vpop.permute.xlu1 %2464 }
 0x391   : > { %v2593_v51 = vrot.slane %v2465_v32, %v5359_v27  ;;  %v5367_v32 = vld [vmem:[#allocation69_spill] sm:$0xff]  ;;  %v5371_v27 = vld [vmem:[#allocation75_spill] sm:$0xff] }
 0x394   : > { %v2423_v58 = vpop.permute.xlu1 %2422  ;;  %v2468_v20 = vpop.permute.xlu0 %2467 }
 0x395   : > { %v2597_v44 = vrot.slane %v2468_v20, %v5358_v2  ;;  %v2523_v39 = vrot.slane %v2423_v58, %v5360_v7 }
 0x397   : > { %v2598_v55 = vsel %vm1452_vm0, %v2597_v44, %v2593_v51  ;;  %v2524_v10 = vsel %vm1459_vm1, %v2523_v39, %v2519_v63  ;;  %vm2669_vm0 = vcmask 1041409  }
 0x398   : > { %v2426_v37 = vpop.permute.xlu1 %2425  ;;  %v2471_v41 = vpop.permute.xlu0 %2470 }
 0x399   : > { %v2602_v30 = vrot.slane %v2471_v41, %v5360_v7  ;;  %v2528_v0 = vrot.slane %v2426_v37, %v5361_v28  ;;  %v5372_v7 = vld [vmem:[#allocation76_spill] sm:$0xff] }
 0x39b   : > { %v2603_v3 = vsel %vm1459_vm1, %v2602_v30, %v2598_v55  ;;  %v2529_v35 = vsel %vm1466_vm2, %v2528_v0, %v2524_v10  ;;  %vm2672_vm1 = vcmask 1041408  }
 0x39c   : > { %v2429_v25 = vpop.permute.xlu1 %2428  ;;  %v2474_v17 = vpop.permute.xlu0 %2473 }
 0x39d   : > { %v2607_v38 = vrot.slane %v2474_v17, %v5361_v28  ;;  %v2533_v62 = vrot.slane %v2429_v25, %v5362_v26  ;;  %v5368_v25 = vld [vmem:[#allocation71_spill] sm:$0xff]  ;;  %v5373_v28 = vld [vmem:[#allocation77_spill] sm:$0xff] }
 0x39f   : > { %v2608_v14 = vsel %vm1466_vm2, %v2607_v38, %v2603_v3  ;;  %v2534_v1 = vsel %vm1473_vm3, %v2533_v62, %v2529_v35 }
 0x3a0   : > { %v2432_v48 = vpop.permute.xlu1 %2431  ;;  %v2477_v42 = vpop.permute.xlu0 %2476 }
 0x3a1   : > { %v2612_v33 = vrot.slane %v2477_v42, %v5362_v26  ;;  %v2538_v45 = vrot.slane %v2432_v48, %v5363_v43 }
 0x3a3   : > { %v2613_v19 = vsel %vm1473_vm3, %v2612_v33, %v2608_v14  ;;  %v2539_v53 = vsel %vm1480_vm4, %v2538_v45, %v2534_v1 }
 0x3a4   : > { %v2435_v15 = vpop.permute.xlu1 %2434  ;;  %v2480_v57 = vpop.permute.xlu0 %2479 }
 0x3a5   : > { %v2617_v18 = vrot.slane %v2480_v57, %v5363_v43  ;;  %v2543_v21 = vrot.slane %v2435_v15, %v5364_v13  ;;  %v5369_v57 = vld [vmem:[#allocation72_spill] sm:$0xff] }
 0x3a7   : > { %v2618_v59 = vsel %vm1480_vm4, %v2617_v18, %v2613_v19  ;;  %v2544_v37 = vsel %vm1487_vm5, %v2543_v21, %v2539_v53 }
 0x3a8   : > { %v2438_v8 = vpop.permute.xlu1 %2437  ;;  %v2483_v4 = vpop.permute.xlu0 %2482 }
 0x3a9   : > { %v2622_v56 = vrot.slane %v2483_v4, %v5364_v13  ;;  %v2548_v50 = vrot.slane %v2438_v8, %v5365_v23 }
 0x3ab   : > { %v2623_v41 = vsel %vm1487_vm5, %v2622_v56, %v2618_v59  ;;  %v2549_v42 = vsel %vm1494_vm6, %v2548_v50, %v2544_v37 }
 0x3ac   : > { %v2441_v54 = vpop.permute.xlu1 %2440  ;;  %v2486_v46 = vpop.permute.xlu0 %2485 }
 0x3ad   : > { %v2627_v22 = vrot.slane %v2486_v46, %v5365_v23  ;;  %v2553_v12 = vrot.slane %v2441_v54, %v5366_v61 }
 0x3af   : > { %v2628_v15 = vsel %vm1494_vm6, %v2627_v22, %v2623_v41  ;;  %v2554_v54 = vsel %vm1501_vm7, %v2553_v12, %v2549_v42 }
 0x3b0   : > { %v2444_v9 = vpop.permute.xlu1 %2443  ;;  %v2489_v11 = vpop.permute.xlu0 %2488 }
 0x3b1   : > { %v2632_v34 = vrot.slane %v2489_v11, %v5366_v61  ;;  %v2558_v58 = vrot.slane %v2444_v9, %v5367_v32  ;;  %v5370_v9 = vld [vmem:[#allocation74_spill] sm:$0xff] }
 0x3b3   : > { %v2633_v46 = vsel %vm1501_vm7, %v2632_v34, %v2628_v15 }
 0x3b4   : > { %v2447_v29 = vpop.permute.xlu1 %2446  ;;  %v2492_v60 = vpop.permute.xlu0 %2491 }
 0x3b5   : > { %v2637_v20 = vrot.slane %v2492_v60, %v5367_v32  ;;  %v2563_v17 = vrot.slane %v2447_v29, %v5368_v25 }
 0x3b7   : > { %v2638_v6 = vsel %vm1508_vm8, %v2637_v20, %v2633_v46 }
 0x3b8   : > { %v2450_v31 = vpop.permute.xlu1 %2449  ;;  %v2495_v49 = vpop.permute.xlu0 %2494 }
 0x3b9   : > { %v2642_v48 = vrot.slane %v2495_v49, %v5368_v25  ;;  %v2568_v8 = vrot.slane %v2450_v31, %v5369_v57  ;;  %v2559_v49 = vsel %vm1508_vm8, %v2558_v58, %v2554_v54 }
 0x3bb   : > { %v2643_v44 = vsel %vm1515_vm9, %v2642_v48, %v2638_v6 }
 0x3bc   : > { %v4923_v24 = vpop.permute.xlu1 %2452  ;;  %v2498_v5 = vpop.permute.xlu0 %2497 }
 0x3bd   : > { %v2647_v4 = vrot.slane %v2498_v5, %v5369_v57  ;;  %v2573_v11 = vrot.slane %v4923_v24, %v5370_v9  ;;  %v2564_v5 = vsel %vm1515_vm9, %v2563_v17, %v2559_v49 }
 0x3be   : > { %v2569_v30 = vsel %vm1522_vm10, %v2568_v8, %v2564_v5 }
 0x3bf   : > { %v2648_v51 = vsel %vm1522_vm10, %v2647_v4, %v2643_v44  ;;  %v2574_v38 = vsel %vm1529_vm11, %v2573_v11, %v2569_v30 }
 0x3c0   : > { %v2456_v40 = vpop.permute.xlu1 %2455  ;;  %v2501_v47 = vpop.permute.xlu0 %2500 }
 0x3c1   : > { %v2652_v60 = vrot.slane %v2501_v47, %v5370_v9  ;;  %v2578_v36 = vrot.slane %v2456_v40, %v5371_v27 }
 0x3c3   : > { %v2653_v26 = vsel %vm1529_vm11, %v2652_v60, %v2648_v51  ;;  %v2579_v33 = vsel %vm1536_vm12, %v2578_v36, %v2574_v38 }
 0x3c4   : > { %v2459_v52 = vpop.permute.xlu1 %2458  ;;  %v2504_v16 = vpop.permute.xlu0 %2503 }
 0x3c5   : > { %v2657_v31 = vrot.slane %v2504_v16, %v5371_v27  ;;  %v2583_v39 = vrot.slane %v2459_v52, %v5372_v7 }
 0x3c7   : > { %v2658_v40 = vsel %vm1536_vm12, %v2657_v31, %v2653_v26  ;;  %v2584_v63 = vsel %vm1543_vm13, %v2583_v39, %v2579_v33 }
 0x3c8   : > { %v2462_v29 = vpop.permute.xlu1 %2461  ;;  %v2507_v2 = vpop.permute.xlu0 %2506 }
 0x3c9   : > { %v2662_v24 = vrot.slane %v2507_v2, %v5372_v7  ;;  %v2588_v0 = vrot.slane %v2462_v29, %v5373_v28 }
 0x3cb   : > { %v2663_v55 = vsel %vm1543_vm13, %v2662_v24, %v2658_v40  ;;  %v2589_v43 = vsel %vm1550_vm14, %v2588_v0, %v2584_v63 }
 0x3cc   : > { %v2510_v62 = vpop.permute.xlu0 %2509 }
 0x3cd   : > { %v2667_v47 = vrot.slane %v2510_v62, %v5373_v28 }
 0x3cf   : > { %v2668_v45 = vsel %vm1550_vm14, %v2667_v47, %v2663_v55 }
 0x3d0   : > { %v2670_v18 = vsel %vm2669_vm0, %v2668_v45, %v2589_v43 }
 0x3d1   : > { %v2673_v10 = vsel %vm2672_vm1, %v2670_v18, 0.0 }
 0x3d2   : > { %2674 = vadd.xlane.f32.xlu1 %v2673_v10 }
 0x3d3   : > { %3239 = shalt.err (!%p3236_p4)
}
 0x3d4   : > { %s3240_s12 = scalar_lea.hbm %s4997_s29, 64  ;;  %s3244_s20 = scalar_lea.hbm %s5055_s6, 128 }
 0x3d5   : > { %p3241_p5 = scmp.ne.s32.totalorder %s4997_s29, %s3240_s12  ;;  %p3245_p13 = scmp.lt.s32.totalorder %s4997_s29, %s5055_s6 }
 0x3d6   : > { %p3246_p2 = scmp.lt.s32.totalorder %s3244_s20, %s3240_s12 }
 0x3d7   : > { %p3242_p6 = pnand %p3241_p5, %p5375_p10 }
 0x3d8   : > { %p3247_p0 = por %p3246_p2, %p3245_p13 }
 0x3d9   : > { %p3243_p11 = pneg %p3242_p6 }
 0x3db   : > { %p3248_p1 = pnand %p3247_p0, %p3243_p11 }
 0x3dd   : > { %3251 = shalt.err (!%p3248_p1)
}
 0x3de   : > { %s3338_s21 = smov 32   ;;  %s3339_s23 = smov 64  }
 0x3df   : > { %s3340_s4 = smov 2   ;;  %s2183_s19 = sld [smem:[#allocation2]] }
 0x3e0   : > { %2900 = dma.vmem_to_hbm [thread:$0]  (%p5375_p10), %s4991_s18, 64, %s4997_s29, %s2690_s8, %s3338_s21, %s3339_s23, %s3340_s4  }
 0x3e1   : > { %s3341_s15 = smov [#allocation13]   ;;  %p5376_p3 = scmp.eq.s32.totalorder %s3403_s28, 1 }
 0x3e3   : > { %p5377_p10 = pmov %p5376_p3 }
 0x45b   : > { %v2675_v3 = vpop.xlane.xlu1 %2674 }
 0x45c   : > { %v2676_v13 = vrot.slane %v2675_v3, 4 }
 0x45e   : > { %v2677_v21 = vadd.f32 %v2676_v13, %v2675_v3 }
 0x460   : > { %v2678_v56 = vrot.slane %v2677_v21, 2 }
 0x462   : > { %v2679_v35 = vadd.f32 %v2678_v56, %v2677_v21 }
 0x464   : > { %v2680_v14 = vrot.slane %v2679_v35, 1 }
 0x466   : > { %v2681_v23 = vadd.f32 %v2680_v14, %v2679_v35 }
 0x468   : > { %2870 = vpush %v2681_v23 }
 0x499   : > { %s2871_s0 = spop %2870 }
 0x49a   : > { %s2683_s11 = sadd.f32 %s2871_s0, %s2183_s19 }
 0x49c   : > { %2685 = sst [smem:[#allocation2]] %s2683_s11 }
 0x49d   : > { %2688 = sst [smem:[#allocation13]] %s2683_s11 }
 0x49e   : > { %2902 = dma.smem_to_hbm (%p5376_p3), %s3341_s15, 16, %s5056_s7, [#allocation6]  }
 0x49f   : > { %3295 = dma.done.wait (%p5377_p10), [#allocation6], 16   ;;  %p5378_p8 = pmov %p5376_p3 }
 0x4a1   : > { %3297 = vsyncadd (%p5378_p8), [#allocation6], 4294967280 }
 0x4a2   : > { %2722 = sfence }
 0x4a3 PF: > { %s2731_s18 = sand.u32 1, %s3304_s24   ;;  %p5379_p7 = scmp.ne.s32.totalorder %s5190_s14, 0 }
 0x4a4   : > { %s2732_s29 = scalar_lea.sflag [#allocation5], %s2731_s18 }
 0x4a5   : > { %p2914_p12 = pnand %p2844_p9, %p5379_p7 }
 0x4a7   : > { %p2915_p4 = pneg %p2914_p12 }
 0x4a9   : > { %3299 = dma.done.wait (%p2915_p4), %s2732_s29, 64  }
 0x4aa   : > { %3301 = vsyncadd (%p2915_p4), %s2732_s29, 4294967232  ;;  %s5380_s8 = sld [smem:[#allocation26_spill]]  ;;  %p26_p5 = scmp.ge.s32.totalorder %s3407_s30, 4  }
 0x4ab   : > { %s5381_s24 = smov %s3308_s25  ;;  %s5382_s25 = smov %s3312_s26 }
 0x4ac   : > { %s5384_s27 = smov %s3407_s30  ;;  %28 = sbr.rel (!%p26_p5) target bundleno = 13 (0xd), region = 136 }
 0x4b0   : > { %s5383_s26 = smov %s5380_s8 }
 0x4b1   :  { %2737 = vsyncpa [#allocation4], 1 }
 0x4b2   :  { %2739 = vsyncpa [#allocation4 + $0x1], 1 }
 0x4b3   :  { %2740 = vsyncpa [#allocation8], 1 }
 0x4b4   :  { %2742 = vsyncpa [#allocation8 + $0x1], 1 }
 0x4b5   :  { %2743 = vsyncpa [#allocation11], 1 }
 0x4b6   :  { %2744 = vsyncpa [#allocation5], 1 }
 0x4b7   :  { %2746 = vsyncpa [#allocation5 + $0x1], 1 }
 0x4b8   :  { %2747 = vsyncpa [#allocation6], 1 }
 0x4b9   :  { %2749 = vsyncpa [#allocation6 + $0x1], 1 }

</bundles_post_ra>
